<compile_context>
chip_gen: v6e
topology: v6e:2x2x1
jax: 0.10.0
libtpu: 0.0.40
codegen_flags: <defaults>
</compile_context>

<pallas_src>
import functools

import jax
import jax.numpy as jnp
from jax.experimental import pallas as pl
from jax.experimental.pallas import tpu as pltpu


def _round_up(x, m):
    return (x + m - 1) // m * m


# ------------------------------ fused per-layer kernel ------------------------------
def _gru_layer_kernel(x_ref, h0_ref, wih_ref, whh_ref, bi_ref, bhn_ref,
                      out_ref, hn_ref, h_scr, gi_scr, *, seq_len):
    ts, tb, d = x_ref.shape
    g3 = whh_ref.shape[1]
    hp = g3 // 3
    t_chunk = pl.program_id(1)

    @pl.when(t_chunk == 0)
    def _():
        h_scr[...] = h0_ref[...]

    # Chunk-level input projection: one (ts*tb, d) x (d, 3Hp) MXU GEMM outside the
    # serial loop.  Result (+ folded input / hidden r,z biases) lives only in VMEM.
    x = x_ref[...].reshape(ts * tb, d)                                # bf16
    gi = jnp.dot(x, wih_ref[...], preferred_element_type=jnp.float32)
    gi_scr[...] = (gi + bi_ref[...]).reshape(ts, tb, g3)

    whh = whh_ref[...]                                                # (Hp, 3Hp) bf16
    bhn = bhn_ref[...]                                                # (1, Hp) f32
    t_base = t_chunk * ts

    def step(i, h):
        gi_t = gi_scr[i]                                              # (tb, 3Hp) f32
        gh = jnp.dot(h.astype(jnp.bfloat16), whh,
                     preferred_element_type=jnp.float32)              # (tb, 3Hp) f32
        r = jax.nn.sigmoid(gi_t[:, :hp] + gh[:, :hp])
        z = jax.nn.sigmoid(gi_t[:, hp:2 * hp] + gh[:, hp:2 * hp])
        n = jnp.tanh(gi_t[:, 2 * hp:] + r * (gh[:, 2 * hp:] + bhn))
        h_new = n + z * (h - n)
        out_ref[i] = h_new.astype(out_ref.dtype)

        # Capture h_n exactly at the last real timestep (padded tail steps keep
        # running; their outputs are sliced away by the wrapper).
        @pl.when(t_base + i == seq_len - 1)
        def _():
            hn_ref[...] = h_new

        return h_new

    h_scr[...] = jax.lax.fori_loop(0, ts, step, h_scr[...],
                                   unroll=True if ts <= 16 else 8)


def _gru_layer(x, h0, wihT, whhT, bi, bhn, *, seq_len, ts, tb, out_dtype):
    sp, bp, d = x.shape
    hp = whhT.shape[0]
    g3 = 3 * hp
    out_isize = jnp.dtype(out_dtype).itemsize

    # Size the scoped VMEM limit from the actual blocks (defaults are 16/32 MiB).
    vmem_bytes = (
        2 * ts * tb * d * 2              # x chunk, double-buffered bf16
        + 2 * ts * tb * hp * out_isize   # out chunk, double-buffered
        + ts * tb * g3 * 4               # gi scratch (single buffer)
        + (d + hp) * g3 * 2              # resident weights (bf16, not pipelined)
        + 4 * tb * hp * 4                # h0 / hn blocks
        + tb * hp * 4                    # h carry scratch
        + (g3 + hp) * 4                  # biases
        + (2 << 20)                      # slack for compiler-internal scratch
    )
    vmem_limit = int(min(128 << 20, max(32 << 20, (vmem_bytes * 3) // 2)))

    kernel = functools.partial(_gru_layer_kernel, seq_len=seq_len)
    cost = pl.CostEstimate(
        flops=2 * sp * bp * (d + hp) * g3 + 12 * sp * bp * hp,
        transcendentals=3 * sp * bp * hp,
        bytes_accessed=int(x.size * 2 + sp * bp * hp * out_isize
                           + (d + hp) * g3 * 2 + 2 * bp * hp * 4),
    )

    return pl.pallas_call(
        kernel,
        out_shape=(jax.ShapeDtypeStruct((sp, bp, hp), out_dtype),
                   jax.ShapeDtypeStruct((bp, hp), jnp.float32)),
        grid_spec=pltpu.PrefetchScalarGridSpec(
            num_scalar_prefetch=0,
            grid=(bp // tb, sp // ts),
            in_specs=[
                pl.BlockSpec((ts, tb, d), lambda b, t: (t, b, 0)),    # x chunk (bf16)
                pl.BlockSpec((tb, hp), lambda b, t: (b, 0)),          # h0 block
                pl.BlockSpec(memory_space=pltpu.MemorySpace.VMEM),    # W_ih^T resident
                pl.BlockSpec(memory_space=pltpu.MemorySpace.VMEM),    # W_hh^T resident
                pl.BlockSpec(memory_space=pltpu.MemorySpace.VMEM),    # folded bias
                pl.BlockSpec(memory_space=pltpu.MemorySpace.VMEM),    # b_hn
            ],
            out_specs=[
                pl.BlockSpec((ts, tb, hp), lambda b, t: (t, b, 0)),   # per-step h
                pl.BlockSpec((tb, hp), lambda b, t: (b, 0)),          # final h
            ],
            scratch_shapes=[pltpu.VMEM((tb, hp), jnp.float32),        # h carry
                            pltpu.VMEM((ts, tb, g3), jnp.float32)],   # gi chunk
        ),
        compiler_params=pltpu.CompilerParams(
            dimension_semantics=("parallel", "arbitrary"),
            vmem_limit_bytes=vmem_limit),
        cost_estimate=cost,
    )(x, h0, wihT, whhT, bi, bhn)


# ------------------------------- parameter repacking --------------------------------
def _pad_gate_weight(w, in_dim_p, hp):
    """w: (3H, in_dim) PyTorch layout -> (in_dim_p, 3*Hp) transposed, gate-blocked, 0-padded."""
    three_h, in_dim = w.shape
    h = three_h // 3
    wg = w.reshape(3, h, in_dim)
    wp = jnp.zeros((3, hp, in_dim_p), w.dtype).at[:, :h, :in_dim].set(wg)
    return wp.transpose(2, 0, 1).reshape(in_dim_p, 3 * hp)


def pack_gru_params(params, hidden_size):
    """One-time repack of nn.GRU parameters (hoisted out of the forward)."""
    H = hidden_size
    hp = _round_up(H, 128)
    packed = []
    for (w_ih, w_hh, b_ih, b_hh) in params:
        in_p = _round_up(w_ih.shape[1], 128)
        wihT = _pad_gate_weight(w_ih, in_p, hp).astype(jnp.bfloat16)
        whhT = _pad_gate_weight(w_hh, hp, hp).astype(jnp.bfloat16)
        b_ih3 = b_ih.astype(jnp.float32).reshape(3, H)
        b_hh3 = b_hh.astype(jnp.float32).reshape(3, H)
        # Fold b_hh's r/z components into the chunk-level input bias.  b_hn stays
        # separate: PyTorch applies it inside r ⊙ (W_hn h + b_hn).
        bi = jnp.zeros((3, hp), jnp.float32)
        bi = bi.at[0, :H].set(b_ih3[0] + b_hh3[0])
        bi = bi.at[1, :H].set(b_ih3[1] + b_hh3[1])
        bi = bi.at[2, :H].set(b_ih3[2])
        bi = bi.reshape(1, 3 * hp)
        bhn = jnp.zeros((1, hp), jnp.float32).at[0, :H].set(b_hh3[2])
        packed.append((wihT, whhT, bi, bhn))
    return packed


# ------------------------------------ forward ---------------------------------------
@functools.partial(jax.jit, static_argnames=("time_chunk",))
def gru_forward(s, h, packed_params, *, time_chunk=8):
    """Multi-layer GRU forward. packed_params = pack_gru_params(params, hidden_size).

    time_chunk: steps per grid iteration. 8 fits v7x's 64 MiB VMEM at large widths;
    16-32 is a good choice on v5e/v6e (128 MiB) for very long sequences.
    """
    S, B, IN = s.shape
    L, _, H = h.shape
    hp = packed_params[0][1].shape[0]       # W_hh^T: (Hp, 3Hp)
    d0 = packed_params[0][0].shape[0]       # padded layer-0 input width

    b8 = _round_up(B, 8)
    # tb=256 fills the 256-wide MXU on v6e/v7x, but only when it still leaves >=2
    # batch blocks (so v7x's two TensorCores both get work).  Otherwise 128 (a
    # perfect fit for v5e's 128x128 MXU) or the padded batch if smaller.
    tb = 256 if b8 >= 512 else min(128, b8)
    bp = _round_up(B, tb)
    ts = time_chunk
    sp = _round_up(S, ts)

    # Layer-0 input stored bf16 (the GEMM consumes bf16 anyway).
    x = jnp.zeros((sp, bp, d0), jnp.bfloat16).at[:S, :B, :IN].set(s.astype(jnp.bfloat16))

    num_layers = len(packed_params)
    h_n = []
    for layer, (wihT, whhT, bi, bhn) in enumerate(packed_params):
        h0 = jnp.zeros((bp, hp), jnp.float32).at[:B, :H].set(h[layer].astype(jnp.float32))
        out_dtype = jnp.float32 if layer == num_layers - 1 else jnp.bfloat16
        x, h_last = _gru_layer(x, h0, wihT, whhT, bi, bhn,
                               seq_len=S, ts=ts, tb=tb, out_dtype=out_dtype)
        h_n.append(h_last[:B, :H])

    out = x[:S, :B, :H].astype(s.dtype)
    return out, jnp.stack(h_n, axis=0).astype(h.dtype)


# ------------------------- pure-JAX references (for checking) -----------------------
def gru_forward_ref(s, h, params, matmul_dtype=jnp.float32):
    """lax.scan reference; matmul_dtype=bfloat16 mirrors the kernel's MXU precision."""
    x = s
    h_n = []
    for layer, (w_ih, w_hh, b_ih, b_hh) in enumerate(params):
        H = w_hh.shape[1]
        wih_t = w_ih.T.astype(matmul_dtype)
        whh_t = w_hh.T.astype(matmul_dtype)

        def step(hprev, xt, wih_t=wih_t, whh_t=whh_t, b_ih=b_ih, b_hh=b_hh, H=H):
            gi = jnp.dot(xt.astype(matmul_dtype), wih_t,
                         preferred_element_type=jnp.float32) + b_ih
            gh = jnp.dot(hprev.astype(matmul_dtype), whh_t,
                         preferred_element_type=jnp.float32) + b_hh
            r = jax.nn.sigmoid(gi[:, :H] + gh[:, :H])
            z = jax.nn.sigmoid(gi[:, H:2 * H] + gh[:, H:2 * H])
            n = jnp.tanh(gi[:, 2 * H:] + r * gh[:, 2 * H:])
            hnew = (1.0 - z) * n + z * hprev
            return hnew, hnew

        h_last, ys = jax.lax.scan(step, h[layer], x)
        x = ys
        h_n.append(h_last)
    return x, jnp.stack(h_n, axis=0)


def init_gru_params(key, input_size, hidden_size, num_layers):
    """Deterministic init matching nn.GRU param shapes (uniform(-1/sqrt(H), 1/sqrt(H)))."""
    bound = 1.0 / (hidden_size ** 0.5)
    params = []
    for layer in range(num_layers):
        in_dim = input_size if layer == 0 else hidden_size
        key, k1, k2, k3, k4 = jax.random.split(key, 5)
        w_ih = jax.random.uniform(k1, (3 * hidden_size, in_dim), jnp.float32, -bound, bound)
        w_hh = jax.random.uniform(k2, (3 * hidden_size, hidden_size), jnp.float32, -bound, bound)
        b_ih = jax.random.uniform(k3, (3 * hidden_size,), jnp.float32, -bound, bound)
        b_hh = jax.random.uniform(k4, (3 * hidden_size,), jnp.float32, -bound, bound)
        params.append((w_ih, w_hh, b_ih, b_hh))
    return params


if __name__ == "__main__":
    # Small shapes; SEQ=12 with time_chunk=8 exercises both multi-chunk carry and the
    # tail-of-sequence handling; BATCH=4 / HIDDEN=32 exercise the pad-to-(8,128) path.
    SEQ, BATCH, INPUT, HIDDEN, LAYERS = 12, 4, 16, 32, 2

    root = jax.random.PRNGKey(0)
    k_s, k_h, k_p = jax.random.split(root, 3)
    s = jax.random.normal(k_s, (SEQ, BATCH, INPUT), jnp.float32)
    h0 = jax.random.normal(k_h, (LAYERS, BATCH, HIDDEN), jnp.float32)
    params = init_gru_params(k_p, INPUT, HIDDEN, LAYERS)

    packed = pack_gru_params(params, HIDDEN)          # one-time weight repack

    out, h_n = gru_forward(s, h0, packed)
    out = jax.block_until_ready(out)
    h_n = jax.block_until_ready(h_n)

    assert out.shape == (SEQ, BATCH, HIDDEN)
    assert h_n.shape == (LAYERS, BATCH, HIDDEN)

    # Tight check against a reference that mirrors the kernel's bf16 MXU operands.
    out_bf, hn_bf = gru_forward_ref(s, h0, params, matmul_dtype=jnp.bfloat16)
    assert jnp.allclose(out, out_bf, atol=1e-2, rtol=1e-2)
    assert jnp.allclose(h_n, hn_bf, atol=1e-2, rtol=1e-2)

    # Loose sanity check against the full-f32 reference (bf16 matmul operands only).
    out_f, hn_f = gru_forward_ref(s, h0, params, matmul_dtype=jnp.float32)
    assert jnp.allclose(out, out_f, atol=1e-1, rtol=0)
    assert jnp.allclose(h_n, hn_f, atol=1e-1, rtol=0)

    print("KERNEL_OK")
</pallas_src>

<mosaic_0001>
module attributes {stable_mosaic.version = 11 : i64} {
  func.func @_gru_layer_kernel(%arg0: i32, %arg1: i32, %arg2: memref<8x8x128xbf16, #tpu.memory_space<vmem>>, %arg3: memref<8x128xf32, #tpu.memory_space<vmem>>, %arg4: memref<128x384xbf16, #tpu.memory_space<vmem>>, %arg5: memref<128x384xbf16, #tpu.memory_space<vmem>>, %arg6: memref<1x384xf32, #tpu.memory_space<vmem>>, %arg7: memref<1x128xf32, #tpu.memory_space<vmem>>, %arg8: memref<8x8x128xbf16, #tpu.memory_space<vmem>>, %arg9: memref<8x128xf32, #tpu.memory_space<vmem>>, %arg10: memref<8x128xf32, #tpu.memory_space<vmem>>, %arg11: memref<8x8x384xf32, #tpu.memory_space<vmem>>) attributes {dimension_semantics = [#tpu.dimension_semantics<parallel>, #tpu.dimension_semantics<arbitrary>], iteration_bounds = array<i64: 1, 2>, scalar_prefetch = 0 : i64, scratch_operands = 2 : i64, tpu.core_type = #tpu.core_type<tc>, window_params = [{transform_indices = @transform_0, window_bounds = array<i64: 8, 8, 128>}, {transform_indices = @transform_1, window_bounds = array<i64: 8, 128>}, {pipeline_mode = #tpu.pipeline_mode<synchronous>, transform_indices = @transform_2, window_bounds = array<i64: 128, 384>}, {pipeline_mode = #tpu.pipeline_mode<synchronous>, transform_indices = @transform_3, window_bounds = array<i64: 128, 384>}, {pipeline_mode = #tpu.pipeline_mode<synchronous>, transform_indices = @transform_4, window_bounds = array<i64: 1, 384>}, {pipeline_mode = #tpu.pipeline_mode<synchronous>, transform_indices = @transform_5, window_bounds = array<i64: 1, 128>}, {transform_indices = @transform_6, window_bounds = array<i64: 8, 8, 128>}, {transform_indices = @transform_7, window_bounds = array<i64: 8, 128>}]} {
    %c0_i32 = arith.constant 0 : i32
    %0 = arith.cmpi eq, %arg1, %c0_i32 : i32
    %1 = arith.extui %0 : i1 to i32
    %c0_i32_0 = arith.constant 0 : i32
    %2 = arith.cmpi ne, %1, %c0_i32_0 : i32
    scf.if %2 {
      %c0_91 = arith.constant 0 : index
      %c0_92 = arith.constant 0 : index
      %337 = vector.load %arg3[%c0_91, %c0_92] : memref<8x128xf32, #tpu.memory_space<vmem>>, vector<8x128xf32>
      %c0_93 = arith.constant 0 : index
      %c0_94 = arith.constant 0 : index
      %338 = vector.load %arg10[%c0_93, %c0_94] : memref<8x128xf32, #tpu.memory_space<vmem>>, vector<8x128xf32>
      tpu.vector_store %arg10[%c0_93, %c0_94], %337 {strides = array<i32>} : memref<8x128xf32, #tpu.memory_space<vmem>>, vector<8x128xf32>,
    } else {
    }
    %c0 = arith.constant 0 : index
    %c0_1 = arith.constant 0 : index
    %c0_2 = arith.constant 0 : index
    %3 = vector.load %arg2[%c0, %c0_1, %c0_2] : memref<8x8x128xbf16, #tpu.memory_space<vmem>>, vector<8x8x128xbf16>
    %4 = vector.shape_cast %3 : vector<8x8x128xbf16> to vector<64x128xbf16>
    %c0_3 = arith.constant 0 : index
    %c0_4 = arith.constant 0 : index
    %5 = vector.load %arg4[%c0_3, %c0_4] : memref<128x384xbf16, #tpu.memory_space<vmem>>, vector<128x384xbf16>
    %cst = arith.constant dense<0.000000e+00> : vector<64x384xf32>
    %6 = tpu.matmul %4, %5, %cst {dimension_numbers = #tpu.dot_dimension_numbers<[1], [0], [0], [1], [0, 0, 1, 1], [], []>} : vector<64x128xbf16>, vector<128x384xbf16>, vector<64x384xf32> -> vector<64x384xf32>
    %c0_5 = arith.constant 0 : index
    %c0_6 = arith.constant 0 : index
    %7 = vector.load %arg6[%c0_5, %c0_6] : memref<1x384xf32, #tpu.memory_space<vmem>>, vector<1x384xf32>
    %8 = vector.broadcast %7 : vector<1x384xf32> to vector<64x384xf32>
    %9 = arith.addf %6, %8 : vector<64x384xf32>
    %10 = vector.shape_cast %9 : vector<64x384xf32> to vector<8x8x384xf32>
    %c0_7 = arith.constant 0 : index
    %c0_8 = arith.constant 0 : index
    %c0_9 = arith.constant 0 : index
    %11 = vector.load %arg11[%c0_7, %c0_8, %c0_9] : memref<8x8x384xf32, #tpu.memory_space<vmem>>, vector<8x8x384xf32>
    tpu.vector_store %arg11[%c0_7, %c0_8, %c0_9], %10 {strides = array<i32>} : memref<8x8x384xf32, #tpu.memory_space<vmem>>, vector<8x8x384xf32>,
    %c0_10 = arith.constant 0 : index
    %c0_11 = arith.constant 0 : index
    %12 = vector.load %arg5[%c0_10, %c0_11] : memref<128x384xbf16, #tpu.memory_space<vmem>>, vector<128x384xbf16>
    %c0_12 = arith.constant 0 : index
    %c0_13 = arith.constant 0 : index
    %13 = vector.load %arg7[%c0_12, %c0_13] : memref<1x128xf32, #tpu.memory_space<vmem>>, vector<1x128xf32>
    %c8_i32 = arith.constant 8 : i32
    %14 = arith.muli %arg1, %c8_i32 : i32
    %c0_14 = arith.constant 0 : index
    %c0_15 = arith.constant 0 : index
    %15 = vector.load %arg10[%c0_14, %c0_15] : memref<8x128xf32, #tpu.memory_space<vmem>>, vector<8x128xf32>
    %c0_i32_16 = arith.constant 0 : i32
    %16 = arith.index_cast %c0_i32_16 : i32 to index
    %c0_17 = arith.constant 0 : index
    %c0_18 = arith.constant 0 : index
    %17 = vector.load %arg11[%16, %c0_17, %c0_18] : memref<8x8x384xf32, #tpu.memory_space<vmem>>, vector<1x8x384xf32>
    %18 = vector.shape_cast %17 : vector<1x8x384xf32> to vector<8x384xf32>
    %19 = arith.truncf %15 : vector<8x128xf32> to vector<8x128xbf16>
    %cst_19 = arith.constant dense<0.000000e+00> : vector<8x384xf32>
    %20 = tpu.matmul %19, %12, %cst_19 {dimension_numbers = #tpu.dot_dimension_numbers<[1], [0], [0], [1], [0, 0, 1, 1], [], []>} : vector<8x128xbf16>, vector<128x384xbf16>, vector<8x384xf32> -> vector<8x384xf32>
    %21 = vector.extract_strided_slice %18 {offsets = [0, 0], sizes = [8, 128], strides = [1, 1]} : vector<8x384xf32> to vector<8x128xf32>
    %22 = vector.extract_strided_slice %20 {offsets = [0, 0], sizes = [8, 128], strides = [1, 1]} : vector<8x384xf32> to vector<8x128xf32>
    %23 = arith.addf %21, %22 : vector<8x128xf32>
    %24 = arith.negf %23 : vector<8x128xf32>
    %25 = math.exp %24 : vector<8x128xf32>
    %cst_20 = arith.constant 1.000000e+00 : f32
    %26 = vector.broadcast %cst_20 : f32 to vector<8x128xf32>
    %27 = arith.addf %26, %25 : vector<8x128xf32>
    %28 = arith.divf %26, %27 : vector<8x128xf32>
    %29 = vector.extract_strided_slice %18 {offsets = [0, 128], sizes = [8, 128], strides = [1, 1]} : vector<8x384xf32> to vector<8x128xf32>
    %30 = vector.extract_strided_slice %20 {offsets = [0, 128], sizes = [8, 128], strides = [1, 1]} : vector<8x384xf32> to vector<8x128xf32>
    %31 = arith.addf %29, %30 : vector<8x128xf32>
    %32 = arith.negf %31 : vector<8x128xf32>
    %33 = math.exp %32 : vector<8x128xf32>
    %cst_21 = arith.constant 1.000000e+00 : f32
    %34 = vector.broadcast %cst_21 : f32 to vector<8x128xf32>
    %35 = arith.addf %34, %33 : vector<8x128xf32>
    %36 = arith.divf %34, %35 : vector<8x128xf32>
    %37 = vector.extract_strided_slice %18 {offsets = [0, 256], sizes = [8, 128], strides = [1, 1]} : vector<8x384xf32> to vector<8x128xf32>
    %38 = vector.extract_strided_slice %20 {offsets = [0, 256], sizes = [8, 128], strides = [1, 1]} : vector<8x384xf32> to vector<8x128xf32>
    %39 = vector.broadcast %13 : vector<1x128xf32> to vector<8x128xf32>
    %40 = arith.addf %38, %39 : vector<8x128xf32>
    %41 = arith.mulf %28, %40 : vector<8x128xf32>
    %42 = arith.addf %37, %41 : vector<8x128xf32>
    %43 = math.tanh %42 : vector<8x128xf32>
    %44 = arith.subf %15, %43 : vector<8x128xf32>
    %45 = arith.mulf %36, %44 : vector<8x128xf32>
    %46 = arith.addf %43, %45 : vector<8x128xf32>
    %47 = arith.truncf %46 : vector<8x128xf32> to vector<8x128xbf16>
    %48 = arith.index_cast %c0_i32_16 : i32 to index
    %c0_22 = arith.constant 0 : index
    %c0_23 = arith.constant 0 : index
    %49 = vector.load %arg8[%48, %c0_22, %c0_23] : memref<8x8x128xbf16, #tpu.memory_space<vmem>>, vector<1x8x128xbf16>
    %50 = vector.shape_cast %49 : vector<1x8x128xbf16> to vector<8x128xbf16>
    %51 = vector.shape_cast %47 : vector<8x128xbf16> to vector<1x8x128xbf16>
    tpu.vector_store %arg8[%48, %c0_22, %c0_23], %51 {strides = array<i32>} : memref<8x8x128xbf16, #tpu.memory_space<vmem>>, vector<1x8x128xbf16>,
    %52 = arith.addi %14, %c0_i32_16 : i32
    %c11_i32 = arith.constant 11 : i32
    %53 = arith.cmpi eq, %52, %c11_i32 : i32
    %54 = arith.extui %53 : i1 to i32
    %c0_i32_24 = arith.constant 0 : i32
    %55 = arith.cmpi ne, %54, %c0_i32_24 : i32
    scf.if %55 {
      %c0_91 = arith.constant 0 : index
      %c0_92 = arith.constant 0 : index
      %337 = vector.load %arg9[%c0_91, %c0_92] : memref<8x128xf32, #tpu.memory_space<vmem>>, vector<8x128xf32>
      tpu.vector_store %arg9[%c0_91, %c0_92], %46 {strides = array<i32>} : memref<8x128xf32, #tpu.memory_space<vmem>>, vector<8x128xf32>,
    } else {
    }
    %c1_i32 = arith.constant 1 : i32
    %56 = arith.index_cast %c1_i32 : i32 to index
    %c0_25 = arith.constant 0 : index
    %c0_26 = arith.constant 0 : index
    %57 = vector.load %arg11[%56, %c0_25, %c0_26] : memref<8x8x384xf32, #tpu.memory_space<vmem>>, vector<1x8x384xf32>
    %58 = vector.shape_cast %57 : vector<1x8x384xf32> to vector<8x384xf32>
    %59 = arith.truncf %46 : vector<8x128xf32> to vector<8x128xbf16>
    %cst_27 = arith.constant dense<0.000000e+00> : vector<8x384xf32>
    %60 = tpu.matmul %59, %12, %cst_27 {dimension_numbers = #tpu.dot_dimension_numbers<[1], [0], [0], [1], [0, 0, 1, 1], [], []>} : vector<8x128xbf16>, vector<128x384xbf16>, vector<8x384xf32> -> vector<8x384xf32>
    %61 = vector.extract_strided_slice %58 {offsets = [0, 0], sizes = [8, 128], strides = [1, 1]} : vector<8x384xf32> to vector<8x128xf32>
    %62 = vector.extract_strided_slice %60 {offsets = [0, 0], sizes = [8, 128], strides = [1, 1]} : vector<8x384xf32> to vector<8x128xf32>
    %63 = arith.addf %61, %62 : vector<8x128xf32>
    %64 = arith.negf %63 : vector<8x128xf32>
    %65 = math.exp %64 : vector<8x128xf32>
    %cst_28 = arith.constant 1.000000e+00 : f32
    %66 = vector.broadcast %cst_28 : f32 to vector<8x128xf32>
    %67 = arith.addf %66, %65 : vector<8x128xf32>
    %68 = arith.divf %66, %67 : vector<8x128xf32>
    %69 = vector.extract_strided_slice %58 {offsets = [0, 128], sizes = [8, 128], strides = [1, 1]} : vector<8x384xf32> to vector<8x128xf32>
    %70 = vector.extract_strided_slice %60 {offsets = [0, 128], sizes = [8, 128], strides = [1, 1]} : vector<8x384xf32> to vector<8x128xf32>
    %71 = arith.addf %69, %70 : vector<8x128xf32>
    %72 = arith.negf %71 : vector<8x128xf32>
    %73 = math.exp %72 : vector<8x128xf32>
    %cst_29 = arith.constant 1.000000e+00 : f32
    %74 = vector.broadcast %cst_29 : f32 to vector<8x128xf32>
    %75 = arith.addf %74, %73 : vector<8x128xf32>
    %76 = arith.divf %74, %75 : vector<8x128xf32>
    %77 = vector.extract_strided_slice %58 {offsets = [0, 256], sizes = [8, 128], strides = [1, 1]} : vector<8x384xf32> to vector<8x128xf32>
    %78 = vector.extract_strided_slice %60 {offsets = [0, 256], sizes = [8, 128], strides = [1, 1]} : vector<8x384xf32> to vector<8x128xf32>
    %79 = vector.broadcast %13 : vector<1x128xf32> to vector<8x128xf32>
    %80 = arith.addf %78, %79 : vector<8x128xf32>
    %81 = arith.mulf %68, %80 : vector<8x128xf32>
    %82 = arith.addf %77, %81 : vector<8x128xf32>
    %83 = math.tanh %82 : vector<8x128xf32>
    %84 = arith.subf %46, %83 : vector<8x128xf32>
    %85 = arith.mulf %76, %84 : vector<8x128xf32>
    %86 = arith.addf %83, %85 : vector<8x128xf32>
    %87 = arith.truncf %86 : vector<8x128xf32> to vector<8x128xbf16>
    %88 = arith.index_cast %c1_i32 : i32 to index
    %c0_30 = arith.constant 0 : index
    %c0_31 = arith.constant 0 : index
    %89 = vector.load %arg8[%88, %c0_30, %c0_31] : memref<8x8x128xbf16, #tpu.memory_space<vmem>>, vector<1x8x128xbf16>
    %90 = vector.shape_cast %89 : vector<1x8x128xbf16> to vector<8x128xbf16>
    %91 = vector.shape_cast %87 : vector<8x128xbf16> to vector<1x8x128xbf16>
    tpu.vector_store %arg8[%88, %c0_30, %c0_31], %91 {strides = array<i32>} : memref<8x8x128xbf16, #tpu.memory_space<vmem>>, vector<1x8x128xbf16>,
    %92 = arith.addi %14, %c1_i32 : i32
    %c11_i32_32 = arith.constant 11 : i32
    %93 = arith.cmpi eq, %92, %c11_i32_32 : i32
    %94 = arith.extui %93 : i1 to i32
    %c0_i32_33 = arith.constant 0 : i32
    %95 = arith.cmpi ne, %94, %c0_i32_33 : i32
    scf.if %95 {
      %c0_91 = arith.constant 0 : index
      %c0_92 = arith.constant 0 : index
      %337 = vector.load %arg9[%c0_91, %c0_92] : memref<8x128xf32, #tpu.memory_space<vmem>>, vector<8x128xf32>
      tpu.vector_store %arg9[%c0_91, %c0_92], %86 {strides = array<i32>} : memref<8x128xf32, #tpu.memory_space<vmem>>, vector<8x128xf32>,
    } else {
    }
    %c2_i32 = arith.constant 2 : i32
    %96 = arith.index_cast %c2_i32 : i32 to index
    %c0_34 = arith.constant 0 : index
    %c0_35 = arith.constant 0 : index
    %97 = vector.load %arg11[%96, %c0_34, %c0_35] : memref<8x8x384xf32, #tpu.memory_space<vmem>>, vector<1x8x384xf32>
    %98 = vector.shape_cast %97 : vector<1x8x384xf32> to vector<8x384xf32>
    %99 = arith.truncf %86 : vector<8x128xf32> to vector<8x128xbf16>
    %cst_36 = arith.constant dense<0.000000e+00> : vector<8x384xf32>
    %100 = tpu.matmul %99, %12, %cst_36 {dimension_numbers = #tpu.dot_dimension_numbers<[1], [0], [0], [1], [0, 0, 1, 1], [], []>} : vector<8x128xbf16>, vector<128x384xbf16>, vector<8x384xf32> -> vector<8x384xf32>
    %101 = vector.extract_strided_slice %98 {offsets = [0, 0], sizes = [8, 128], strides = [1, 1]} : vector<8x384xf32> to vector<8x128xf32>
    %102 = vector.extract_strided_slice %100 {offsets = [0, 0], sizes = [8, 128], strides = [1, 1]} : vector<8x384xf32> to vector<8x128xf32>
    %103 = arith.addf %101, %102 : vector<8x128xf32>
    %104 = arith.negf %103 : vector<8x128xf32>
    %105 = math.exp %104 : vector<8x128xf32>
    %cst_37 = arith.constant 1.000000e+00 : f32
    %106 = vector.broadcast %cst_37 : f32 to vector<8x128xf32>
    %107 = arith.addf %106, %105 : vector<8x128xf32>
    %108 = arith.divf %106, %107 : vector<8x128xf32>
    %109 = vector.extract_strided_slice %98 {offsets = [0, 128], sizes = [8, 128], strides = [1, 1]} : vector<8x384xf32> to vector<8x128xf32>
    %110 = vector.extract_strided_slice %100 {offsets = [0, 128], sizes = [8, 128], strides = [1, 1]} : vector<8x384xf32> to vector<8x128xf32>
    %111 = arith.addf %109, %110 : vector<8x128xf32>
    %112 = arith.negf %111 : vector<8x128xf32>
    %113 = math.exp %112 : vector<8x128xf32>
    %cst_38 = arith.constant 1.000000e+00 : f32
    %114 = vector.broadcast %cst_38 : f32 to vector<8x128xf32>
    %115 = arith.addf %114, %113 : vector<8x128xf32>
    %116 = arith.divf %114, %115 : vector<8x128xf32>
    %117 = vector.extract_strided_slice %98 {offsets = [0, 256], sizes = [8, 128], strides = [1, 1]} : vector<8x384xf32> to vector<8x128xf32>
    %118 = vector.extract_strided_slice %100 {offsets = [0, 256], sizes = [8, 128], strides = [1, 1]} : vector<8x384xf32> to vector<8x128xf32>
    %119 = vector.broadcast %13 : vector<1x128xf32> to vector<8x128xf32>
    %120 = arith.addf %118, %119 : vector<8x128xf32>
    %121 = arith.mulf %108, %120 : vector<8x128xf32>
    %122 = arith.addf %117, %121 : vector<8x128xf32>
    %123 = math.tanh %122 : vector<8x128xf32>
    %124 = arith.subf %86, %123 : vector<8x128xf32>
    %125 = arith.mulf %116, %124 : vector<8x128xf32>
    %126 = arith.addf %123, %125 : vector<8x128xf32>
    %127 = arith.truncf %126 : vector<8x128xf32> to vector<8x128xbf16>
    %128 = arith.index_cast %c2_i32 : i32 to index
    %c0_39 = arith.constant 0 : index
    %c0_40 = arith.constant 0 : index
    %129 = vector.load %arg8[%128, %c0_39, %c0_40] : memref<8x8x128xbf16, #tpu.memory_space<vmem>>, vector<1x8x128xbf16>
    %130 = vector.shape_cast %129 : vector<1x8x128xbf16> to vector<8x128xbf16>
    %131 = vector.shape_cast %127 : vector<8x128xbf16> to vector<1x8x128xbf16>
    tpu.vector_store %arg8[%128, %c0_39, %c0_40], %131 {strides = array<i32>} : memref<8x8x128xbf16, #tpu.memory_space<vmem>>, vector<1x8x128xbf16>,
    %132 = arith.addi %14, %c2_i32 : i32
    %c11_i32_41 = arith.constant 11 : i32
    %133 = arith.cmpi eq, %132, %c11_i32_41 : i32
    %134 = arith.extui %133 : i1 to i32
    %c0_i32_42 = arith.constant 0 : i32
    %135 = arith.cmpi ne, %134, %c0_i32_42 : i32
    scf.if %135 {
      %c0_91 = arith.constant 0 : index
      %c0_92 = arith.constant 0 : index
      %337 = vector.load %arg9[%c0_91, %c0_92] : memref<8x128xf32, #tpu.memory_space<vmem>>, vector<8x128xf32>
      tpu.vector_store %arg9[%c0_91, %c0_92], %126 {strides = array<i32>} : memref<8x128xf32, #tpu.memory_space<vmem>>, vector<8x128xf32>,
    } else {
    }
    %c3_i32 = arith.constant 3 : i32
    %136 = arith.index_cast %c3_i32 : i32 to index
    %c0_43 = arith.constant 0 : index
    %c0_44 = arith.constant 0 : index
    %137 = vector.load %arg11[%136, %c0_43, %c0_44] : memref<8x8x384xf32, #tpu.memory_space<vmem>>, vector<1x8x384xf32>
    %138 = vector.shape_cast %137 : vector<1x8x384xf32> to vector<8x384xf32>
    %139 = arith.truncf %126 : vector<8x128xf32> to vector<8x128xbf16>
    %cst_45 = arith.constant dense<0.000000e+00> : vector<8x384xf32>
    %140 = tpu.matmul %139, %12, %cst_45 {dimension_numbers = #tpu.dot_dimension_numbers<[1], [0], [0], [1], [0, 0, 1, 1], [], []>} : vector<8x128xbf16>, vector<128x384xbf16>, vector<8x384xf32> -> vector<8x384xf32>
    %141 = vector.extract_strided_slice %138 {offsets = [0, 0], sizes = [8, 128], strides = [1, 1]} : vector<8x384xf32> to vector<8x128xf32>
    %142 = vector.extract_strided_slice %140 {offsets = [0, 0], sizes = [8, 128], strides = [1, 1]} : vector<8x384xf32> to vector<8x128xf32>
    %143 = arith.addf %141, %142 : vector<8x128xf32>
    %144 = arith.negf %143 : vector<8x128xf32>
    %145 = math.exp %144 : vector<8x128xf32>
    %cst_46 = arith.constant 1.000000e+00 : f32
    %146 = vector.broadcast %cst_46 : f32 to vector<8x128xf32>
    %147 = arith.addf %146, %145 : vector<8x128xf32>
    %148 = arith.divf %146, %147 : vector<8x128xf32>
    %149 = vector.extract_strided_slice %138 {offsets = [0, 128], sizes = [8, 128], strides = [1, 1]} : vector<8x384xf32> to vector<8x128xf32>
    %150 = vector.extract_strided_slice %140 {offsets = [0, 128], sizes = [8, 128], strides = [1, 1]} : vector<8x384xf32> to vector<8x128xf32>
    %151 = arith.addf %149, %150 : vector<8x128xf32>
    %152 = arith.negf %151 : vector<8x128xf32>
    %153 = math.exp %152 : vector<8x128xf32>
    %cst_47 = arith.constant 1.000000e+00 : f32
    %154 = vector.broadcast %cst_47 : f32 to vector<8x128xf32>
    %155 = arith.addf %154, %153 : vector<8x128xf32>
    %156 = arith.divf %154, %155 : vector<8x128xf32>
    %157 = vector.extract_strided_slice %138 {offsets = [0, 256], sizes = [8, 128], strides = [1, 1]} : vector<8x384xf32> to vector<8x128xf32>
    %158 = vector.extract_strided_slice %140 {offsets = [0, 256], sizes = [8, 128], strides = [1, 1]} : vector<8x384xf32> to vector<8x128xf32>
    %159 = vector.broadcast %13 : vector<1x128xf32> to vector<8x128xf32>
    %160 = arith.addf %158, %159 : vector<8x128xf32>
    %161 = arith.mulf %148, %160 : vector<8x128xf32>
    %162 = arith.addf %157, %161 : vector<8x128xf32>
    %163 = math.tanh %162 : vector<8x128xf32>
    %164 = arith.subf %126, %163 : vector<8x128xf32>
    %165 = arith.mulf %156, %164 : vector<8x128xf32>
    %166 = arith.addf %163, %165 : vector<8x128xf32>
    %167 = arith.truncf %166 : vector<8x128xf32> to vector<8x128xbf16>
    %168 = arith.index_cast %c3_i32 : i32 to index
    %c0_48 = arith.constant 0 : index
    %c0_49 = arith.constant 0 : index
    %169 = vector.load %arg8[%168, %c0_48, %c0_49] : memref<8x8x128xbf16, #tpu.memory_space<vmem>>, vector<1x8x128xbf16>
    %170 = vector.shape_cast %169 : vector<1x8x128xbf16> to vector<8x128xbf16>
    %171 = vector.shape_cast %167 : vector<8x128xbf16> to vector<1x8x128xbf16>
    tpu.vector_store %arg8[%168, %c0_48, %c0_49], %171 {strides = array<i32>} : memref<8x8x128xbf16, #tpu.memory_space<vmem>>, vector<1x8x128xbf16>,
    %172 = arith.addi %14, %c3_i32 : i32
    %c11_i32_50 = arith.constant 11 : i32
    %173 = arith.cmpi eq, %172, %c11_i32_50 : i32
    %174 = arith.extui %173 : i1 to i32
    %c0_i32_51 = arith.constant 0 : i32
    %175 = arith.cmpi ne, %174, %c0_i32_51 : i32
    scf.if %175 {
      %c0_91 = arith.constant 0 : index
      %c0_92 = arith.constant 0 : index
      %337 = vector.load %arg9[%c0_91, %c0_92] : memref<8x128xf32, #tpu.memory_space<vmem>>, vector<8x128xf32>
      tpu.vector_store %arg9[%c0_91, %c0_92], %166 {strides = array<i32>} : memref<8x128xf32, #tpu.memory_space<vmem>>, vector<8x128xf32>,
    } else {
    }
    %c4_i32 = arith.constant 4 : i32
    %176 = arith.index_cast %c4_i32 : i32 to index
    %c0_52 = arith.constant 0 : index
    %c0_53 = arith.constant 0 : index
    %177 = vector.load %arg11[%176, %c0_52, %c0_53] : memref<8x8x384xf32, #tpu.memory_space<vmem>>, vector<1x8x384xf32>
    %178 = vector.shape_cast %177 : vector<1x8x384xf32> to vector<8x384xf32>
    %179 = arith.truncf %166 : vector<8x128xf32> to vector<8x128xbf16>
    %cst_54 = arith.constant dense<0.000000e+00> : vector<8x384xf32>
    %180 = tpu.matmul %179, %12, %cst_54 {dimension_numbers = #tpu.dot_dimension_numbers<[1], [0], [0], [1], [0, 0, 1, 1], [], []>} : vector<8x128xbf16>, vector<128x384xbf16>, vector<8x384xf32> -> vector<8x384xf32>
    %181 = vector.extract_strided_slice %178 {offsets = [0, 0], sizes = [8, 128], strides = [1, 1]} : vector<8x384xf32> to vector<8x128xf32>
    %182 = vector.extract_strided_slice %180 {offsets = [0, 0], sizes = [8, 128], strides = [1, 1]} : vector<8x384xf32> to vector<8x128xf32>
    %183 = arith.addf %181, %182 : vector<8x128xf32>
    %184 = arith.negf %183 : vector<8x128xf32>
    %185 = math.exp %184 : vector<8x128xf32>
    %cst_55 = arith.constant 1.000000e+00 : f32
    %186 = vector.broadcast %cst_55 : f32 to vector<8x128xf32>
    %187 = arith.addf %186, %185 : vector<8x128xf32>
    %188 = arith.divf %186, %187 : vector<8x128xf32>
    %189 = vector.extract_strided_slice %178 {offsets = [0, 128], sizes = [8, 128], strides = [1, 1]} : vector<8x384xf32> to vector<8x128xf32>
    %190 = vector.extract_strided_slice %180 {offsets = [0, 128], sizes = [8, 128], strides = [1, 1]} : vector<8x384xf32> to vector<8x128xf32>
    %191 = arith.addf %189, %190 : vector<8x128xf32>
    %192 = arith.negf %191 : vector<8x128xf32>
    %193 = math.exp %192 : vector<8x128xf32>
    %cst_56 = arith.constant 1.000000e+00 : f32
    %194 = vector.broadcast %cst_56 : f32 to vector<8x128xf32>
    %195 = arith.addf %194, %193 : vector<8x128xf32>
    %196 = arith.divf %194, %195 : vector<8x128xf32>
    %197 = vector.extract_strided_slice %178 {offsets = [0, 256], sizes = [8, 128], strides = [1, 1]} : vector<8x384xf32> to vector<8x128xf32>
    %198 = vector.extract_strided_slice %180 {offsets = [0, 256], sizes = [8, 128], strides = [1, 1]} : vector<8x384xf32> to vector<8x128xf32>
    %199 = vector.broadcast %13 : vector<1x128xf32> to vector<8x128xf32>
    %200 = arith.addf %198, %199 : vector<8x128xf32>
    %201 = arith.mulf %188, %200 : vector<8x128xf32>
    %202 = arith.addf %197, %201 : vector<8x128xf32>
    %203 = math.tanh %202 : vector<8x128xf32>
    %204 = arith.subf %166, %203 : vector<8x128xf32>
    %205 = arith.mulf %196, %204 : vector<8x128xf32>
    %206 = arith.addf %203, %205 : vector<8x128xf32>
    %207 = arith.truncf %206 : vector<8x128xf32> to vector<8x128xbf16>
    %208 = arith.index_cast %c4_i32 : i32 to index
    %c0_57 = arith.constant 0 : index
    %c0_58 = arith.constant 0 : index
    %209 = vector.load %arg8[%208, %c0_57, %c0_58] : memref<8x8x128xbf16, #tpu.memory_space<vmem>>, vector<1x8x128xbf16>
    %210 = vector.shape_cast %209 : vector<1x8x128xbf16> to vector<8x128xbf16>
    %211 = vector.shape_cast %207 : vector<8x128xbf16> to vector<1x8x128xbf16>
    tpu.vector_store %arg8[%208, %c0_57, %c0_58], %211 {strides = array<i32>} : memref<8x8x128xbf16, #tpu.memory_space<vmem>>, vector<1x8x128xbf16>,
    %212 = arith.addi %14, %c4_i32 : i32
    %c11_i32_59 = arith.constant 11 : i32
    %213 = arith.cmpi eq, %212, %c11_i32_59 : i32
    %214 = arith.extui %213 : i1 to i32
    %c0_i32_60 = arith.constant 0 : i32
    %215 = arith.cmpi ne, %214, %c0_i32_60 : i32
    scf.if %215 {
      %c0_91 = arith.constant 0 : index
      %c0_92 = arith.constant 0 : index
      %337 = vector.load %arg9[%c0_91, %c0_92] : memref<8x128xf32, #tpu.memory_space<vmem>>, vector<8x128xf32>
      tpu.vector_store %arg9[%c0_91, %c0_92], %206 {strides = array<i32>} : memref<8x128xf32, #tpu.memory_space<vmem>>, vector<8x128xf32>,
    } else {
    }
    %c5_i32 = arith.constant 5 : i32
    %216 = arith.index_cast %c5_i32 : i32 to index
    %c0_61 = arith.constant 0 : index
    %c0_62 = arith.constant 0 : index
    %217 = vector.load %arg11[%216, %c0_61, %c0_62] : memref<8x8x384xf32, #tpu.memory_space<vmem>>, vector<1x8x384xf32>
    %218 = vector.shape_cast %217 : vector<1x8x384xf32> to vector<8x384xf32>
    %219 = arith.truncf %206 : vector<8x128xf32> to vector<8x128xbf16>
    %cst_63 = arith.constant dense<0.000000e+00> : vector<8x384xf32>
    %220 = tpu.matmul %219, %12, %cst_63 {dimension_numbers = #tpu.dot_dimension_numbers<[1], [0], [0], [1], [0, 0, 1, 1], [], []>} : vector<8x128xbf16>, vector<128x384xbf16>, vector<8x384xf32> -> vector<8x384xf32>
    %221 = vector.extract_strided_slice %218 {offsets = [0, 0], sizes = [8, 128], strides = [1, 1]} : vector<8x384xf32> to vector<8x128xf32>
    %222 = vector.extract_strided_slice %220 {offsets = [0, 0], sizes = [8, 128], strides = [1, 1]} : vector<8x384xf32> to vector<8x128xf32>
    %223 = arith.addf %221, %222 : vector<8x128xf32>
    %224 = arith.negf %223 : vector<8x128xf32>
    %225 = math.exp %224 : vector<8x128xf32>
    %cst_64 = arith.constant 1.000000e+00 : f32
    %226 = vector.broadcast %cst_64 : f32 to vector<8x128xf32>
    %227 = arith.addf %226, %225 : vector<8x128xf32>
    %228 = arith.divf %226, %227 : vector<8x128xf32>
    %229 = vector.extract_strided_slice %218 {offsets = [0, 128], sizes = [8, 128], strides = [1, 1]} : vector<8x384xf32> to vector<8x128xf32>
    %230 = vector.extract_strided_slice %220 {offsets = [0, 128], sizes = [8, 128], strides = [1, 1]} : vector<8x384xf32> to vector<8x128xf32>
    %231 = arith.addf %229, %230 : vector<8x128xf32>
    %232 = arith.negf %231 : vector<8x128xf32>
    %233 = math.exp %232 : vector<8x128xf32>
    %cst_65 = arith.constant 1.000000e+00 : f32
    %234 = vector.broadcast %cst_65 : f32 to vector<8x128xf32>
    %235 = arith.addf %234, %233 : vector<8x128xf32>
    %236 = arith.divf %234, %235 : vector<8x128xf32>
    %237 = vector.extract_strided_slice %218 {offsets = [0, 256], sizes = [8, 128], strides = [1, 1]} : vector<8x384xf32> to vector<8x128xf32>
    %238 = vector.extract_strided_slice %220 {offsets = [0, 256], sizes = [8, 128], strides = [1, 1]} : vector<8x384xf32> to vector<8x128xf32>
    %239 = vector.broadcast %13 : vector<1x128xf32> to vector<8x128xf32>
    %240 = arith.addf %238, %239 : vector<8x128xf32>
    %241 = arith.mulf %228, %240 : vector<8x128xf32>
    %242 = arith.addf %237, %241 : vector<8x128xf32>
    %243 = math.tanh %242 : vector<8x128xf32>
    %244 = arith.subf %206, %243 : vector<8x128xf32>
    %245 = arith.mulf %236, %244 : vector<8x128xf32>
    %246 = arith.addf %243, %245 : vector<8x128xf32>
    %247 = arith.truncf %246 : vector<8x128xf32> to vector<8x128xbf16>
    %248 = arith.index_cast %c5_i32 : i32 to index
    %c0_66 = arith.constant 0 : index
    %c0_67 = arith.constant 0 : index
    %249 = vector.load %arg8[%248, %c0_66, %c0_67] : memref<8x8x128xbf16, #tpu.memory_space<vmem>>, vector<1x8x128xbf16>
    %250 = vector.shape_cast %249 : vector<1x8x128xbf16> to vector<8x128xbf16>
    %251 = vector.shape_cast %247 : vector<8x128xbf16> to vector<1x8x128xbf16>
    tpu.vector_store %arg8[%248, %c0_66, %c0_67], %251 {strides = array<i32>} : memref<8x8x128xbf16, #tpu.memory_space<vmem>>, vector<1x8x128xbf16>,
    %252 = arith.addi %14, %c5_i32 : i32
    %c11_i32_68 = arith.constant 11 : i32
    %253 = arith.cmpi eq, %252, %c11_i32_68 : i32
    %254 = arith.extui %253 : i1 to i32
    %c0_i32_69 = arith.constant 0 : i32
    %255 = arith.cmpi ne, %254, %c0_i32_69 : i32
    scf.if %255 {
      %c0_91 = arith.constant 0 : index
      %c0_92 = arith.constant 0 : index
      %337 = vector.load %arg9[%c0_91, %c0_92] : memref<8x128xf32, #tpu.memory_space<vmem>>, vector<8x128xf32>
      tpu.vector_store %arg9[%c0_91, %c0_92], %246 {strides = array<i32>} : memref<8x128xf32, #tpu.memory_space<vmem>>, vector<8x128xf32>,
    } else {
    }
    %c6_i32 = arith.constant 6 : i32
    %256 = arith.index_cast %c6_i32 : i32 to index
    %c0_70 = arith.constant 0 : index
    %c0_71 = arith.constant 0 : index
    %257 = vector.load %arg11[%256, %c0_70, %c0_71] : memref<8x8x384xf32, #tpu.memory_space<vmem>>, vector<1x8x384xf32>
    %258 = vector.shape_cast %257 : vector<1x8x384xf32> to vector<8x384xf32>
    %259 = arith.truncf %246 : vector<8x128xf32> to vector<8x128xbf16>
    %cst_72 = arith.constant dense<0.000000e+00> : vector<8x384xf32>
    %260 = tpu.matmul %259, %12, %cst_72 {dimension_numbers = #tpu.dot_dimension_numbers<[1], [0], [0], [1], [0, 0, 1, 1], [], []>} : vector<8x128xbf16>, vector<128x384xbf16>, vector<8x384xf32> -> vector<8x384xf32>
    %261 = vector.extract_strided_slice %258 {offsets = [0, 0], sizes = [8, 128], strides = [1, 1]} : vector<8x384xf32> to vector<8x128xf32>
    %262 = vector.extract_strided_slice %260 {offsets = [0, 0], sizes = [8, 128], strides = [1, 1]} : vector<8x384xf32> to vector<8x128xf32>
    %263 = arith.addf %261, %262 : vector<8x128xf32>
    %264 = arith.negf %263 : vector<8x128xf32>
    %265 = math.exp %264 : vector<8x128xf32>
    %cst_73 = arith.constant 1.000000e+00 : f32
    %266 = vector.broadcast %cst_73 : f32 to vector<8x128xf32>
    %267 = arith.addf %266, %265 : vector<8x128xf32>
    %268 = arith.divf %266, %267 : vector<8x128xf32>
    %269 = vector.extract_strided_slice %258 {offsets = [0, 128], sizes = [8, 128], strides = [1, 1]} : vector<8x384xf32> to vector<8x128xf32>
    %270 = vector.extract_strided_slice %260 {offsets = [0, 128], sizes = [8, 128], strides = [1, 1]} : vector<8x384xf32> to vector<8x128xf32>
    %271 = arith.addf %269, %270 : vector<8x128xf32>
    %272 = arith.negf %271 : vector<8x128xf32>
    %273 = math.exp %272 : vector<8x128xf32>
    %cst_74 = arith.constant 1.000000e+00 : f32
    %274 = vector.broadcast %cst_74 : f32 to vector<8x128xf32>
    %275 = arith.addf %274, %273 : vector<8x128xf32>
    %276 = arith.divf %274, %275 : vector<8x128xf32>
    %277 = vector.extract_strided_slice %258 {offsets = [0, 256], sizes = [8, 128], strides = [1, 1]} : vector<8x384xf32> to vector<8x128xf32>
    %278 = vector.extract_strided_slice %260 {offsets = [0, 256], sizes = [8, 128], strides = [1, 1]} : vector<8x384xf32> to vector<8x128xf32>
    %279 = vector.broadcast %13 : vector<1x128xf32> to vector<8x128xf32>
    %280 = arith.addf %278, %279 : vector<8x128xf32>
    %281 = arith.mulf %268, %280 : vector<8x128xf32>
    %282 = arith.addf %277, %281 : vector<8x128xf32>
    %283 = math.tanh %282 : vector<8x128xf32>
    %284 = arith.subf %246, %283 : vector<8x128xf32>
    %285 = arith.mulf %276, %284 : vector<8x128xf32>
    %286 = arith.addf %283, %285 : vector<8x128xf32>
    %287 = arith.truncf %286 : vector<8x128xf32> to vector<8x128xbf16>
    %288 = arith.index_cast %c6_i32 : i32 to index
    %c0_75 = arith.constant 0 : index
    %c0_76 = arith.constant 0 : index
    %289 = vector.load %arg8[%288, %c0_75, %c0_76] : memref<8x8x128xbf16, #tpu.memory_space<vmem>>, vector<1x8x128xbf16>
    %290 = vector.shape_cast %289 : vector<1x8x128xbf16> to vector<8x128xbf16>
    %291 = vector.shape_cast %287 : vector<8x128xbf16> to vector<1x8x128xbf16>
    tpu.vector_store %arg8[%288, %c0_75, %c0_76], %291 {strides = array<i32>} : memref<8x8x128xbf16, #tpu.memory_space<vmem>>, vector<1x8x128xbf16>,
    %292 = arith.addi %14, %c6_i32 : i32
    %c11_i32_77 = arith.constant 11 : i32
    %293 = arith.cmpi eq, %292, %c11_i32_77 : i32
    %294 = arith.extui %293 : i1 to i32
    %c0_i32_78 = arith.constant 0 : i32
    %295 = arith.cmpi ne, %294, %c0_i32_78 : i32
    scf.if %295 {
      %c0_91 = arith.constant 0 : index
      %c0_92 = arith.constant 0 : index
      %337 = vector.load %arg9[%c0_91, %c0_92] : memref<8x128xf32, #tpu.memory_space<vmem>>, vector<8x128xf32>
      tpu.vector_store %arg9[%c0_91, %c0_92], %286 {strides = array<i32>} : memref<8x128xf32, #tpu.memory_space<vmem>>, vector<8x128xf32>,
    } else {
    }
    %c7_i32 = arith.constant 7 : i32
    %296 = arith.index_cast %c7_i32 : i32 to index
    %c0_79 = arith.constant 0 : index
    %c0_80 = arith.constant 0 : index
    %297 = vector.load %arg11[%296, %c0_79, %c0_80] : memref<8x8x384xf32, #tpu.memory_space<vmem>>, vector<1x8x384xf32>
    %298 = vector.shape_cast %297 : vector<1x8x384xf32> to vector<8x384xf32>
    %299 = arith.truncf %286 : vector<8x128xf32> to vector<8x128xbf16>
    %cst_81 = arith.constant dense<0.000000e+00> : vector<8x384xf32>
    %300 = tpu.matmul %299, %12, %cst_81 {dimension_numbers = #tpu.dot_dimension_numbers<[1], [0], [0], [1], [0, 0, 1, 1], [], []>} : vector<8x128xbf16>, vector<128x384xbf16>, vector<8x384xf32> -> vector<8x384xf32>
    %301 = vector.extract_strided_slice %298 {offsets = [0, 0], sizes = [8, 128], strides = [1, 1]} : vector<8x384xf32> to vector<8x128xf32>
    %302 = vector.extract_strided_slice %300 {offsets = [0, 0], sizes = [8, 128], strides = [1, 1]} : vector<8x384xf32> to vector<8x128xf32>
    %303 = arith.addf %301, %302 : vector<8x128xf32>
    %304 = arith.negf %303 : vector<8x128xf32>
    %305 = math.exp %304 : vector<8x128xf32>
    %cst_82 = arith.constant 1.000000e+00 : f32
    %306 = vector.broadcast %cst_82 : f32 to vector<8x128xf32>
    %307 = arith.addf %306, %305 : vector<8x128xf32>
    %308 = arith.divf %306, %307 : vector<8x128xf32>
    %309 = vector.extract_strided_slice %298 {offsets = [0, 128], sizes = [8, 128], strides = [1, 1]} : vector<8x384xf32> to vector<8x128xf32>
    %310 = vector.extract_strided_slice %300 {offsets = [0, 128], sizes = [8, 128], strides = [1, 1]} : vector<8x384xf32> to vector<8x128xf32>
    %311 = arith.addf %309, %310 : vector<8x128xf32>
    %312 = arith.negf %311 : vector<8x128xf32>
    %313 = math.exp %312 : vector<8x128xf32>
    %cst_83 = arith.constant 1.000000e+00 : f32
    %314 = vector.broadcast %cst_83 : f32 to vector<8x128xf32>
    %315 = arith.addf %314, %313 : vector<8x128xf32>
    %316 = arith.divf %314, %315 : vector<8x128xf32>
    %317 = vector.extract_strided_slice %298 {offsets = [0, 256], sizes = [8, 128], strides = [1, 1]} : vector<8x384xf32> to vector<8x128xf32>
    %318 = vector.extract_strided_slice %300 {offsets = [0, 256], sizes = [8, 128], strides = [1, 1]} : vector<8x384xf32> to vector<8x128xf32>
    %319 = vector.broadcast %13 : vector<1x128xf32> to vector<8x128xf32>
    %320 = arith.addf %318, %319 : vector<8x128xf32>
    %321 = arith.mulf %308, %320 : vector<8x128xf32>
    %322 = arith.addf %317, %321 : vector<8x128xf32>
    %323 = math.tanh %322 : vector<8x128xf32>
    %324 = arith.subf %286, %323 : vector<8x128xf32>
    %325 = arith.mulf %316, %324 : vector<8x128xf32>
    %326 = arith.addf %323, %325 : vector<8x128xf32>
    %327 = arith.truncf %326 : vector<8x128xf32> to vector<8x128xbf16>
    %328 = arith.index_cast %c7_i32 : i32 to index
    %c0_84 = arith.constant 0 : index
    %c0_85 = arith.constant 0 : index
    %329 = vector.load %arg8[%328, %c0_84, %c0_85] : memref<8x8x128xbf16, #tpu.memory_space<vmem>>, vector<1x8x128xbf16>
    %330 = vector.shape_cast %329 : vector<1x8x128xbf16> to vector<8x128xbf16>
    %331 = vector.shape_cast %327 : vector<8x128xbf16> to vector<1x8x128xbf16>
    tpu.vector_store %arg8[%328, %c0_84, %c0_85], %331 {strides = array<i32>} : memref<8x8x128xbf16, #tpu.memory_space<vmem>>, vector<1x8x128xbf16>,
    %332 = arith.addi %14, %c7_i32 : i32
    %c11_i32_86 = arith.constant 11 : i32
    %333 = arith.cmpi eq, %332, %c11_i32_86 : i32
    %334 = arith.extui %333 : i1 to i32
    %c0_i32_87 = arith.constant 0 : i32
    %335 = arith.cmpi ne, %334, %c0_i32_87 : i32
    scf.if %335 {
      %c0_91 = arith.constant 0 : index
      %c0_92 = arith.constant 0 : index
      %337 = vector.load %arg9[%c0_91, %c0_92] : memref<8x128xf32, #tpu.memory_space<vmem>>, vector<8x128xf32>
      tpu.vector_store %arg9[%c0_91, %c0_92], %326 {strides = array<i32>} : memref<8x128xf32, #tpu.memory_space<vmem>>, vector<8x128xf32>,
    } else {
    }
    %c8_i32_88 = arith.constant 8 : i32
    %c0_89 = arith.constant 0 : index
    %c0_90 = arith.constant 0 : index
    %336 = vector.load %arg10[%c0_89, %c0_90] : memref<8x128xf32, #tpu.memory_space<vmem>>, vector<8x128xf32>
    tpu.vector_store %arg10[%c0_89, %c0_90], %326 {strides = array<i32>} : memref<8x128xf32, #tpu.memory_space<vmem>>, vector<8x128xf32>,
    return
  }
  func.func @transform_0(%arg0: i32, %arg1: i32) -> (i32, i32, i32) {
    %c0_i32 = arith.constant 0 : i32
    %c0_i32_0 = arith.constant 0 : i32
    return %arg1, %arg0, %c0_i32 : i32, i32, i32
  }
  func.func @transform_1(%arg0: i32, %arg1: i32) -> (i32, i32) {
    %c0_i32 = arith.constant 0 : i32
    %c0_i32_0 = arith.constant 0 : i32
    return %arg0, %c0_i32 : i32, i32
  }
  func.func @transform_2(%arg0: i32, %arg1: i32) -> (i32, i32) {
    %c0_i32 = arith.constant 0 : i32
    %c0_i32_0 = arith.constant 0 : i32
    %c0_i32_1 = arith.constant 0 : i32
    return %c0_i32, %c0_i32_0 : i32, i32
  }
  func.func @transform_3(%arg0: i32, %arg1: i32) -> (i32, i32) {
    %c0_i32 = arith.constant 0 : i32
    %c0_i32_0 = arith.constant 0 : i32
    %c0_i32_1 = arith.constant 0 : i32
    return %c0_i32, %c0_i32_0 : i32, i32
  }
  func.func @transform_4(%arg0: i32, %arg1: i32) -> (i32, i32) {
    %c0_i32 = arith.constant 0 : i32
    %c0_i32_0 = arith.constant 0 : i32
    %c0_i32_1 = arith.constant 0 : i32
    return %c0_i32, %c0_i32_0 : i32, i32
  }
  func.func @transform_5(%arg0: i32, %arg1: i32) -> (i32, i32) {
    %c0_i32 = arith.constant 0 : i32
    %c0_i32_0 = arith.constant 0 : i32
    %c0_i32_1 = arith.constant 0 : i32
    return %c0_i32, %c0_i32_0 : i32, i32
  }
  func.func @transform_6(%arg0: i32, %arg1: i32) -> (i32, i32, i32) {
    %c0_i32 = arith.constant 0 : i32
    %c0_i32_0 = arith.constant 0 : i32
    return %arg1, %arg0, %c0_i32 : i32, i32, i32
  }
  func.func @transform_7(%arg0: i32, %arg1: i32) -> (i32, i32) {
    %c0_i32 = arith.constant 0 : i32
    %c0_i32_0 = arith.constant 0 : i32
    return %arg0, %c0_i32 : i32, i32
  }
}

module attributes {stable_mosaic.version = 11 : i64} {
  func.func @_gru_layer_kernel(%arg0: i32, %arg1: i32, %arg2: memref<8x8x128xbf16, #tpu.memory_space<vmem>>, %arg3: memref<8x128xf32, #tpu.memory_space<vmem>>, %arg4: memref<128x384xbf16, #tpu.memory_space<vmem>>, %arg5: memref<128x384xbf16, #tpu.memory_space<vmem>>, %arg6: memref<1x384xf32, #tpu.memory_space<vmem>>, %arg7: memref<1x128xf32, #tpu.memory_space<vmem>>, %arg8: memref<8x8x128xf32, #tpu.memory_space<vmem>>, %arg9: memref<8x128xf32, #tpu.memory_space<vmem>>, %arg10: memref<8x128xf32, #tpu.memory_space<vmem>>, %arg11: memref<8x8x384xf32, #tpu.memory_space<vmem>>) attributes {dimension_semantics = [#tpu.dimension_semantics<parallel>, #tpu.dimension_semantics<arbitrary>], iteration_bounds = array<i64: 1, 2>, scalar_prefetch = 0 : i64, scratch_operands = 2 : i64, tpu.core_type = #tpu.core_type<tc>, window_params = [{transform_indices = @transform_0, window_bounds = array<i64: 8, 8, 128>}, {transform_indices = @transform_1, window_bounds = array<i64: 8, 128>}, {pipeline_mode = #tpu.pipeline_mode<synchronous>, transform_indices = @transform_2, window_bounds = array<i64: 128, 384>}, {pipeline_mode = #tpu.pipeline_mode<synchronous>, transform_indices = @transform_3, window_bounds = array<i64: 128, 384>}, {pipeline_mode = #tpu.pipeline_mode<synchronous>, transform_indices = @transform_4, window_bounds = array<i64: 1, 384>}, {pipeline_mode = #tpu.pipeline_mode<synchronous>, transform_indices = @transform_5, window_bounds = array<i64: 1, 128>}, {transform_indices = @transform_6, window_bounds = array<i64: 8, 8, 128>}, {transform_indices = @transform_7, window_bounds = array<i64: 8, 128>}]} {
    %c0_i32 = arith.constant 0 : i32
    %0 = arith.cmpi eq, %arg1, %c0_i32 : i32
    %1 = arith.extui %0 : i1 to i32
    %c0_i32_0 = arith.constant 0 : i32
    %2 = arith.cmpi ne, %1, %c0_i32_0 : i32
    scf.if %2 {
      %c0_91 = arith.constant 0 : index
      %c0_92 = arith.constant 0 : index
      %329 = vector.load %arg3[%c0_91, %c0_92] : memref<8x128xf32, #tpu.memory_space<vmem>>, vector<8x128xf32>
      %c0_93 = arith.constant 0 : index
      %c0_94 = arith.constant 0 : index
      %330 = vector.load %arg10[%c0_93, %c0_94] : memref<8x128xf32, #tpu.memory_space<vmem>>, vector<8x128xf32>
      tpu.vector_store %arg10[%c0_93, %c0_94], %329 {strides = array<i32>} : memref<8x128xf32, #tpu.memory_space<vmem>>, vector<8x128xf32>,
    } else {
    }
    %c0 = arith.constant 0 : index
    %c0_1 = arith.constant 0 : index
    %c0_2 = arith.constant 0 : index
    %3 = vector.load %arg2[%c0, %c0_1, %c0_2] : memref<8x8x128xbf16, #tpu.memory_space<vmem>>, vector<8x8x128xbf16>
    %4 = vector.shape_cast %3 : vector<8x8x128xbf16> to vector<64x128xbf16>
    %c0_3 = arith.constant 0 : index
    %c0_4 = arith.constant 0 : index
    %5 = vector.load %arg4[%c0_3, %c0_4] : memref<128x384xbf16, #tpu.memory_space<vmem>>, vector<128x384xbf16>
    %cst = arith.constant dense<0.000000e+00> : vector<64x384xf32>
    %6 = tpu.matmul %4, %5, %cst {dimension_numbers = #tpu.dot_dimension_numbers<[1], [0], [0], [1], [0, 0, 1, 1], [], []>} : vector<64x128xbf16>, vector<128x384xbf16>, vector<64x384xf32> -> vector<64x384xf32>
    %c0_5 = arith.constant 0 : index
    %c0_6 = arith.constant 0 : index
    %7 = vector.load %arg6[%c0_5, %c0_6] : memref<1x384xf32, #tpu.memory_space<vmem>>, vector<1x384xf32>
    %8 = vector.broadcast %7 : vector<1x384xf32> to vector<64x384xf32>
    %9 = arith.addf %6, %8 : vector<64x384xf32>
    %10 = vector.shape_cast %9 : vector<64x384xf32> to vector<8x8x384xf32>
    %c0_7 = arith.constant 0 : index
    %c0_8 = arith.constant 0 : index
    %c0_9 = arith.constant 0 : index
    %11 = vector.load %arg11[%c0_7, %c0_8, %c0_9] : memref<8x8x384xf32, #tpu.memory_space<vmem>>, vector<8x8x384xf32>
    tpu.vector_store %arg11[%c0_7, %c0_8, %c0_9], %10 {strides = array<i32>} : memref<8x8x384xf32, #tpu.memory_space<vmem>>, vector<8x8x384xf32>,
    %c0_10 = arith.constant 0 : index
    %c0_11 = arith.constant 0 : index
    %12 = vector.load %arg5[%c0_10, %c0_11] : memref<128x384xbf16, #tpu.memory_space<vmem>>, vector<128x384xbf16>
    %c0_12 = arith.constant 0 : index
    %c0_13 = arith.constant 0 : index
    %13 = vector.load %arg7[%c0_12, %c0_13] : memref<1x128xf32, #tpu.memory_space<vmem>>, vector<1x128xf32>
    %c8_i32 = arith.constant 8 : i32
    %14 = arith.muli %arg1, %c8_i32 : i32
    %c0_14 = arith.constant 0 : index
    %c0_15 = arith.constant 0 : index
    %15 = vector.load %arg10[%c0_14, %c0_15] : memref<8x128xf32, #tpu.memory_space<vmem>>, vector<8x128xf32>
    %c0_i32_16 = arith.constant 0 : i32
    %16 = arith.index_cast %c0_i32_16 : i32 to index
    %c0_17 = arith.constant 0 : index
    %c0_18 = arith.constant 0 : index
    %17 = vector.load %arg11[%16, %c0_17, %c0_18] : memref<8x8x384xf32, #tpu.memory_space<vmem>>, vector<1x8x384xf32>
    %18 = vector.shape_cast %17 : vector<1x8x384xf32> to vector<8x384xf32>
    %19 = arith.truncf %15 : vector<8x128xf32> to vector<8x128xbf16>
    %cst_19 = arith.constant dense<0.000000e+00> : vector<8x384xf32>
    %20 = tpu.matmul %19, %12, %cst_19 {dimension_numbers = #tpu.dot_dimension_numbers<[1], [0], [0], [1], [0, 0, 1, 1], [], []>} : vector<8x128xbf16>, vector<128x384xbf16>, vector<8x384xf32> -> vector<8x384xf32>
    %21 = vector.extract_strided_slice %18 {offsets = [0, 0], sizes = [8, 128], strides = [1, 1]} : vector<8x384xf32> to vector<8x128xf32>
    %22 = vector.extract_strided_slice %20 {offsets = [0, 0], sizes = [8, 128], strides = [1, 1]} : vector<8x384xf32> to vector<8x128xf32>
    %23 = arith.addf %21, %22 : vector<8x128xf32>
    %24 = arith.negf %23 : vector<8x128xf32>
    %25 = math.exp %24 : vector<8x128xf32>
    %cst_20 = arith.constant 1.000000e+00 : f32
    %26 = vector.broadcast %cst_20 : f32 to vector<8x128xf32>
    %27 = arith.addf %26, %25 : vector<8x128xf32>
    %28 = arith.divf %26, %27 : vector<8x128xf32>
    %29 = vector.extract_strided_slice %18 {offsets = [0, 128], sizes = [8, 128], strides = [1, 1]} : vector<8x384xf32> to vector<8x128xf32>
    %30 = vector.extract_strided_slice %20 {offsets = [0, 128], sizes = [8, 128], strides = [1, 1]} : vector<8x384xf32> to vector<8x128xf32>
    %31 = arith.addf %29, %30 : vector<8x128xf32>
    %32 = arith.negf %31 : vector<8x128xf32>
    %33 = math.exp %32 : vector<8x128xf32>
    %cst_21 = arith.constant 1.000000e+00 : f32
    %34 = vector.broadcast %cst_21 : f32 to vector<8x128xf32>
    %35 = arith.addf %34, %33 : vector<8x128xf32>
    %36 = arith.divf %34, %35 : vector<8x128xf32>
    %37 = vector.extract_strided_slice %18 {offsets = [0, 256], sizes = [8, 128], strides = [1, 1]} : vector<8x384xf32> to vector<8x128xf32>
    %38 = vector.extract_strided_slice %20 {offsets = [0, 256], sizes = [8, 128], strides = [1, 1]} : vector<8x384xf32> to vector<8x128xf32>
    %39 = vector.broadcast %13 : vector<1x128xf32> to vector<8x128xf32>
    %40 = arith.addf %38, %39 : vector<8x128xf32>
    %41 = arith.mulf %28, %40 : vector<8x128xf32>
    %42 = arith.addf %37, %41 : vector<8x128xf32>
    %43 = math.tanh %42 : vector<8x128xf32>
    %44 = arith.subf %15, %43 : vector<8x128xf32>
    %45 = arith.mulf %36, %44 : vector<8x128xf32>
    %46 = arith.addf %43, %45 : vector<8x128xf32>
    %47 = arith.index_cast %c0_i32_16 : i32 to index
    %c0_22 = arith.constant 0 : index
    %c0_23 = arith.constant 0 : index
    %48 = vector.load %arg8[%47, %c0_22, %c0_23] : memref<8x8x128xf32, #tpu.memory_space<vmem>>, vector<1x8x128xf32>
    %49 = vector.shape_cast %48 : vector<1x8x128xf32> to vector<8x128xf32>
    %50 = vector.shape_cast %46 : vector<8x128xf32> to vector<1x8x128xf32>
    tpu.vector_store %arg8[%47, %c0_22, %c0_23], %50 {strides = array<i32>} : memref<8x8x128xf32, #tpu.memory_space<vmem>>, vector<1x8x128xf32>,
    %51 = arith.addi %14, %c0_i32_16 : i32
    %c11_i32 = arith.constant 11 : i32
    %52 = arith.cmpi eq, %51, %c11_i32 : i32
    %53 = arith.extui %52 : i1 to i32
    %c0_i32_24 = arith.constant 0 : i32
    %54 = arith.cmpi ne, %53, %c0_i32_24 : i32
    scf.if %54 {
      %c0_91 = arith.constant 0 : index
      %c0_92 = arith.constant 0 : index
      %329 = vector.load %arg9[%c0_91, %c0_92] : memref<8x128xf32, #tpu.memory_space<vmem>>, vector<8x128xf32>
      tpu.vector_store %arg9[%c0_91, %c0_92], %46 {strides = array<i32>} : memref<8x128xf32, #tpu.memory_space<vmem>>, vector<8x128xf32>,
    } else {
    }
    %c1_i32 = arith.constant 1 : i32
    %55 = arith.index_cast %c1_i32 : i32 to index
    %c0_25 = arith.constant 0 : index
    %c0_26 = arith.constant 0 : index
    %56 = vector.load %arg11[%55, %c0_25, %c0_26] : memref<8x8x384xf32, #tpu.memory_space<vmem>>, vector<1x8x384xf32>
    %57 = vector.shape_cast %56 : vector<1x8x384xf32> to vector<8x384xf32>
    %58 = arith.truncf %46 : vector<8x128xf32> to vector<8x128xbf16>
    %cst_27 = arith.constant dense<0.000000e+00> : vector<8x384xf32>
    %59 = tpu.matmul %58, %12, %cst_27 {dimension_numbers = #tpu.dot_dimension_numbers<[1], [0], [0], [1], [0, 0, 1, 1], [], []>} : vector<8x128xbf16>, vector<128x384xbf16>, vector<8x384xf32> -> vector<8x384xf32>
    %60 = vector.extract_strided_slice %57 {offsets = [0, 0], sizes = [8, 128], strides = [1, 1]} : vector<8x384xf32> to vector<8x128xf32>
    %61 = vector.extract_strided_slice %59 {offsets = [0, 0], sizes = [8, 128], strides = [1, 1]} : vector<8x384xf32> to vector<8x128xf32>
    %62 = arith.addf %60, %61 : vector<8x128xf32>
    %63 = arith.negf %62 : vector<8x128xf32>
    %64 = math.exp %63 : vector<8x128xf32>
    %cst_28 = arith.constant 1.000000e+00 : f32
    %65 = vector.broadcast %cst_28 : f32 to vector<8x128xf32>
    %66 = arith.addf %65, %64 : vector<8x128xf32>
    %67 = arith.divf %65, %66 : vector<8x128xf32>
    %68 = vector.extract_strided_slice %57 {offsets = [0, 128], sizes = [8, 128], strides = [1, 1]} : vector<8x384xf32> to vector<8x128xf32>
    %69 = vector.extract_strided_slice %59 {offsets = [0, 128], sizes = [8, 128], strides = [1, 1]} : vector<8x384xf32> to vector<8x128xf32>
    %70 = arith.addf %68, %69 : vector<8x128xf32>
    %71 = arith.negf %70 : vector<8x128xf32>
    %72 = math.exp %71 : vector<8x128xf32>
    %cst_29 = arith.constant 1.000000e+00 : f32
    %73 = vector.broadcast %cst_29 : f32 to vector<8x128xf32>
    %74 = arith.addf %73, %72 : vector<8x128xf32>
    %75 = arith.divf %73, %74 : vector<8x128xf32>
    %76 = vector.extract_strided_slice %57 {offsets = [0, 256], sizes = [8, 128], strides = [1, 1]} : vector<8x384xf32> to vector<8x128xf32>
    %77 = vector.extract_strided_slice %59 {offsets = [0, 256], sizes = [8, 128], strides = [1, 1]} : vector<8x384xf32> to vector<8x128xf32>
    %78 = vector.broadcast %13 : vector<1x128xf32> to vector<8x128xf32>
    %79 = arith.addf %77, %78 : vector<8x128xf32>
    %80 = arith.mulf %67, %79 : vector<8x128xf32>
    %81 = arith.addf %76, %80 : vector<8x128xf32>
    %82 = math.tanh %81 : vector<8x128xf32>
    %83 = arith.subf %46, %82 : vector<8x128xf32>
    %84 = arith.mulf %75, %83 : vector<8x128xf32>
    %85 = arith.addf %82, %84 : vector<8x128xf32>
    %86 = arith.index_cast %c1_i32 : i32 to index
    %c0_30 = arith.constant 0 : index
    %c0_31 = arith.constant 0 : index
    %87 = vector.load %arg8[%86, %c0_30, %c0_31] : memref<8x8x128xf32, #tpu.memory_space<vmem>>, vector<1x8x128xf32>
    %88 = vector.shape_cast %87 : vector<1x8x128xf32> to vector<8x128xf32>
    %89 = vector.shape_cast %85 : vector<8x128xf32> to vector<1x8x128xf32>
    tpu.vector_store %arg8[%86, %c0_30, %c0_31], %89 {strides = array<i32>} : memref<8x8x128xf32, #tpu.memory_space<vmem>>, vector<1x8x128xf32>,
    %90 = arith.addi %14, %c1_i32 : i32
    %c11_i32_32 = arith.constant 11 : i32
    %91 = arith.cmpi eq, %90, %c11_i32_32 : i32
    %92 = arith.extui %91 : i1 to i32
    %c0_i32_33 = arith.constant 0 : i32
    %93 = arith.cmpi ne, %92, %c0_i32_33 : i32
    scf.if %93 {
      %c0_91 = arith.constant 0 : index
      %c0_92 = arith.constant 0 : index
      %329 = vector.load %arg9[%c0_91, %c0_92] : memref<8x128xf32, #tpu.memory_space<vmem>>, vector<8x128xf32>
      tpu.vector_store %arg9[%c0_91, %c0_92], %85 {strides = array<i32>} : memref<8x128xf32, #tpu.memory_space<vmem>>, vector<8x128xf32>,
    } else {
    }
    %c2_i32 = arith.constant 2 : i32
    %94 = arith.index_cast %c2_i32 : i32 to index
    %c0_34 = arith.constant 0 : index
    %c0_35 = arith.constant 0 : index
    %95 = vector.load %arg11[%94, %c0_34, %c0_35] : memref<8x8x384xf32, #tpu.memory_space<vmem>>, vector<1x8x384xf32>
    %96 = vector.shape_cast %95 : vector<1x8x384xf32> to vector<8x384xf32>
    %97 = arith.truncf %85 : vector<8x128xf32> to vector<8x128xbf16>
    %cst_36 = arith.constant dense<0.000000e+00> : vector<8x384xf32>
    %98 = tpu.matmul %97, %12, %cst_36 {dimension_numbers = #tpu.dot_dimension_numbers<[1], [0], [0], [1], [0, 0, 1, 1], [], []>} : vector<8x128xbf16>, vector<128x384xbf16>, vector<8x384xf32> -> vector<8x384xf32>
    %99 = vector.extract_strided_slice %96 {offsets = [0, 0], sizes = [8, 128], strides = [1, 1]} : vector<8x384xf32> to vector<8x128xf32>
    %100 = vector.extract_strided_slice %98 {offsets = [0, 0], sizes = [8, 128], strides = [1, 1]} : vector<8x384xf32> to vector<8x128xf32>
    %101 = arith.addf %99, %100 : vector<8x128xf32>
    %102 = arith.negf %101 : vector<8x128xf32>
    %103 = math.exp %102 : vector<8x128xf32>
    %cst_37 = arith.constant 1.000000e+00 : f32
    %104 = vector.broadcast %cst_37 : f32 to vector<8x128xf32>
    %105 = arith.addf %104, %103 : vector<8x128xf32>
    %106 = arith.divf %104, %105 : vector<8x128xf32>
    %107 = vector.extract_strided_slice %96 {offsets = [0, 128], sizes = [8, 128], strides = [1, 1]} : vector<8x384xf32> to vector<8x128xf32>
    %108 = vector.extract_strided_slice %98 {offsets = [0, 128], sizes = [8, 128], strides = [1, 1]} : vector<8x384xf32> to vector<8x128xf32>
    %109 = arith.addf %107, %108 : vector<8x128xf32>
    %110 = arith.negf %109 : vector<8x128xf32>
    %111 = math.exp %110 : vector<8x128xf32>
    %cst_38 = arith.constant 1.000000e+00 : f32
    %112 = vector.broadcast %cst_38 : f32 to vector<8x128xf32>
    %113 = arith.addf %112, %111 : vector<8x128xf32>
    %114 = arith.divf %112, %113 : vector<8x128xf32>
    %115 = vector.extract_strided_slice %96 {offsets = [0, 256], sizes = [8, 128], strides = [1, 1]} : vector<8x384xf32> to vector<8x128xf32>
    %116 = vector.extract_strided_slice %98 {offsets = [0, 256], sizes = [8, 128], strides = [1, 1]} : vector<8x384xf32> to vector<8x128xf32>
    %117 = vector.broadcast %13 : vector<1x128xf32> to vector<8x128xf32>
    %118 = arith.addf %116, %117 : vector<8x128xf32>
    %119 = arith.mulf %106, %118 : vector<8x128xf32>
    %120 = arith.addf %115, %119 : vector<8x128xf32>
    %121 = math.tanh %120 : vector<8x128xf32>
    %122 = arith.subf %85, %121 : vector<8x128xf32>
    %123 = arith.mulf %114, %122 : vector<8x128xf32>
    %124 = arith.addf %121, %123 : vector<8x128xf32>
    %125 = arith.index_cast %c2_i32 : i32 to index
    %c0_39 = arith.constant 0 : index
    %c0_40 = arith.constant 0 : index
    %126 = vector.load %arg8[%125, %c0_39, %c0_40] : memref<8x8x128xf32, #tpu.memory_space<vmem>>, vector<1x8x128xf32>
    %127 = vector.shape_cast %126 : vector<1x8x128xf32> to vector<8x128xf32>
    %128 = vector.shape_cast %124 : vector<8x128xf32> to vector<1x8x128xf32>
    tpu.vector_store %arg8[%125, %c0_39, %c0_40], %128 {strides = array<i32>} : memref<8x8x128xf32, #tpu.memory_space<vmem>>, vector<1x8x128xf32>,
    %129 = arith.addi %14, %c2_i32 : i32
    %c11_i32_41 = arith.constant 11 : i32
    %130 = arith.cmpi eq, %129, %c11_i32_41 : i32
    %131 = arith.extui %130 : i1 to i32
    %c0_i32_42 = arith.constant 0 : i32
    %132 = arith.cmpi ne, %131, %c0_i32_42 : i32
    scf.if %132 {
      %c0_91 = arith.constant 0 : index
      %c0_92 = arith.constant 0 : index
      %329 = vector.load %arg9[%c0_91, %c0_92] : memref<8x128xf32, #tpu.memory_space<vmem>>, vector<8x128xf32>
      tpu.vector_store %arg9[%c0_91, %c0_92], %124 {strides = array<i32>} : memref<8x128xf32, #tpu.memory_space<vmem>>, vector<8x128xf32>,
    } else {
    }
    %c3_i32 = arith.constant 3 : i32
    %133 = arith.index_cast %c3_i32 : i32 to index
    %c0_43 = arith.constant 0 : index
    %c0_44 = arith.constant 0 : index
    %134 = vector.load %arg11[%133, %c0_43, %c0_44] : memref<8x8x384xf32, #tpu.memory_space<vmem>>, vector<1x8x384xf32>
    %135 = vector.shape_cast %134 : vector<1x8x384xf32> to vector<8x384xf32>
    %136 = arith.truncf %124 : vector<8x128xf32> to vector<8x128xbf16>
    %cst_45 = arith.constant dense<0.000000e+00> : vector<8x384xf32>
    %137 = tpu.matmul %136, %12, %cst_45 {dimension_numbers = #tpu.dot_dimension_numbers<[1], [0], [0], [1], [0, 0, 1, 1], [], []>} : vector<8x128xbf16>, vector<128x384xbf16>, vector<8x384xf32> -> vector<8x384xf32>
    %138 = vector.extract_strided_slice %135 {offsets = [0, 0], sizes = [8, 128], strides = [1, 1]} : vector<8x384xf32> to vector<8x128xf32>
    %139 = vector.extract_strided_slice %137 {offsets = [0, 0], sizes = [8, 128], strides = [1, 1]} : vector<8x384xf32> to vector<8x128xf32>
    %140 = arith.addf %138, %139 : vector<8x128xf32>
    %141 = arith.negf %140 : vector<8x128xf32>
    %142 = math.exp %141 : vector<8x128xf32>
    %cst_46 = arith.constant 1.000000e+00 : f32
    %143 = vector.broadcast %cst_46 : f32 to vector<8x128xf32>
    %144 = arith.addf %143, %142 : vector<8x128xf32>
    %145 = arith.divf %143, %144 : vector<8x128xf32>
    %146 = vector.extract_strided_slice %135 {offsets = [0, 128], sizes = [8, 128], strides = [1, 1]} : vector<8x384xf32> to vector<8x128xf32>
    %147 = vector.extract_strided_slice %137 {offsets = [0, 128], sizes = [8, 128], strides = [1, 1]} : vector<8x384xf32> to vector<8x128xf32>
    %148 = arith.addf %146, %147 : vector<8x128xf32>
    %149 = arith.negf %148 : vector<8x128xf32>
    %150 = math.exp %149 : vector<8x128xf32>
    %cst_47 = arith.constant 1.000000e+00 : f32
    %151 = vector.broadcast %cst_47 : f32 to vector<8x128xf32>
    %152 = arith.addf %151, %150 : vector<8x128xf32>
    %153 = arith.divf %151, %152 : vector<8x128xf32>
    %154 = vector.extract_strided_slice %135 {offsets = [0, 256], sizes = [8, 128], strides = [1, 1]} : vector<8x384xf32> to vector<8x128xf32>
    %155 = vector.extract_strided_slice %137 {offsets = [0, 256], sizes = [8, 128], strides = [1, 1]} : vector<8x384xf32> to vector<8x128xf32>
    %156 = vector.broadcast %13 : vector<1x128xf32> to vector<8x128xf32>
    %157 = arith.addf %155, %156 : vector<8x128xf32>
    %158 = arith.mulf %145, %157 : vector<8x128xf32>
    %159 = arith.addf %154, %158 : vector<8x128xf32>
    %160 = math.tanh %159 : vector<8x128xf32>
    %161 = arith.subf %124, %160 : vector<8x128xf32>
    %162 = arith.mulf %153, %161 : vector<8x128xf32>
    %163 = arith.addf %160, %162 : vector<8x128xf32>
    %164 = arith.index_cast %c3_i32 : i32 to index
    %c0_48 = arith.constant 0 : index
    %c0_49 = arith.constant 0 : index
    %165 = vector.load %arg8[%164, %c0_48, %c0_49] : memref<8x8x128xf32, #tpu.memory_space<vmem>>, vector<1x8x128xf32>
    %166 = vector.shape_cast %165 : vector<1x8x128xf32> to vector<8x128xf32>
    %167 = vector.shape_cast %163 : vector<8x128xf32> to vector<1x8x128xf32>
    tpu.vector_store %arg8[%164, %c0_48, %c0_49], %167 {strides = array<i32>} : memref<8x8x128xf32, #tpu.memory_space<vmem>>, vector<1x8x128xf32>,
    %168 = arith.addi %14, %c3_i32 : i32
    %c11_i32_50 = arith.constant 11 : i32
    %169 = arith.cmpi eq, %168, %c11_i32_50 : i32
    %170 = arith.extui %169 : i1 to i32
    %c0_i32_51 = arith.constant 0 : i32
    %171 = arith.cmpi ne, %170, %c0_i32_51 : i32
    scf.if %171 {
      %c0_91 = arith.constant 0 : index
      %c0_92 = arith.constant 0 : index
      %329 = vector.load %arg9[%c0_91, %c0_92] : memref<8x128xf32, #tpu.memory_space<vmem>>, vector<8x128xf32>
      tpu.vector_store %arg9[%c0_91, %c0_92], %163 {strides = array<i32>} : memref<8x128xf32, #tpu.memory_space<vmem>>, vector<8x128xf32>,
    } else {
    }
    %c4_i32 = arith.constant 4 : i32
    %172 = arith.index_cast %c4_i32 : i32 to index
    %c0_52 = arith.constant 0 : index
    %c0_53 = arith.constant 0 : index
    %173 = vector.load %arg11[%172, %c0_52, %c0_53] : memref<8x8x384xf32, #tpu.memory_space<vmem>>, vector<1x8x384xf32>
    %174 = vector.shape_cast %173 : vector<1x8x384xf32> to vector<8x384xf32>
    %175 = arith.truncf %163 : vector<8x128xf32> to vector<8x128xbf16>
    %cst_54 = arith.constant dense<0.000000e+00> : vector<8x384xf32>
    %176 = tpu.matmul %175, %12, %cst_54 {dimension_numbers = #tpu.dot_dimension_numbers<[1], [0], [0], [1], [0, 0, 1, 1], [], []>} : vector<8x128xbf16>, vector<128x384xbf16>, vector<8x384xf32> -> vector<8x384xf32>
    %177 = vector.extract_strided_slice %174 {offsets = [0, 0], sizes = [8, 128], strides = [1, 1]} : vector<8x384xf32> to vector<8x128xf32>
    %178 = vector.extract_strided_slice %176 {offsets = [0, 0], sizes = [8, 128], strides = [1, 1]} : vector<8x384xf32> to vector<8x128xf32>
    %179 = arith.addf %177, %178 : vector<8x128xf32>
    %180 = arith.negf %179 : vector<8x128xf32>
    %181 = math.exp %180 : vector<8x128xf32>
    %cst_55 = arith.constant 1.000000e+00 : f32
    %182 = vector.broadcast %cst_55 : f32 to vector<8x128xf32>
    %183 = arith.addf %182, %181 : vector<8x128xf32>
    %184 = arith.divf %182, %183 : vector<8x128xf32>
    %185 = vector.extract_strided_slice %174 {offsets = [0, 128], sizes = [8, 128], strides = [1, 1]} : vector<8x384xf32> to vector<8x128xf32>
    %186 = vector.extract_strided_slice %176 {offsets = [0, 128], sizes = [8, 128], strides = [1, 1]} : vector<8x384xf32> to vector<8x128xf32>
    %187 = arith.addf %185, %186 : vector<8x128xf32>
    %188 = arith.negf %187 : vector<8x128xf32>
    %189 = math.exp %188 : vector<8x128xf32>
    %cst_56 = arith.constant 1.000000e+00 : f32
    %190 = vector.broadcast %cst_56 : f32 to vector<8x128xf32>
    %191 = arith.addf %190, %189 : vector<8x128xf32>
    %192 = arith.divf %190, %191 : vector<8x128xf32>
    %193 = vector.extract_strided_slice %174 {offsets = [0, 256], sizes = [8, 128], strides = [1, 1]} : vector<8x384xf32> to vector<8x128xf32>
    %194 = vector.extract_strided_slice %176 {offsets = [0, 256], sizes = [8, 128], strides = [1, 1]} : vector<8x384xf32> to vector<8x128xf32>
    %195 = vector.broadcast %13 : vector<1x128xf32> to vector<8x128xf32>
    %196 = arith.addf %194, %195 : vector<8x128xf32>
    %197 = arith.mulf %184, %196 : vector<8x128xf32>
    %198 = arith.addf %193, %197 : vector<8x128xf32>
    %199 = math.tanh %198 : vector<8x128xf32>
    %200 = arith.subf %163, %199 : vector<8x128xf32>
    %201 = arith.mulf %192, %200 : vector<8x128xf32>
    %202 = arith.addf %199, %201 : vector<8x128xf32>
    %203 = arith.index_cast %c4_i32 : i32 to index
    %c0_57 = arith.constant 0 : index
    %c0_58 = arith.constant 0 : index
    %204 = vector.load %arg8[%203, %c0_57, %c0_58] : memref<8x8x128xf32, #tpu.memory_space<vmem>>, vector<1x8x128xf32>
    %205 = vector.shape_cast %204 : vector<1x8x128xf32> to vector<8x128xf32>
    %206 = vector.shape_cast %202 : vector<8x128xf32> to vector<1x8x128xf32>
    tpu.vector_store %arg8[%203, %c0_57, %c0_58], %206 {strides = array<i32>} : memref<8x8x128xf32, #tpu.memory_space<vmem>>, vector<1x8x128xf32>,
    %207 = arith.addi %14, %c4_i32 : i32
    %c11_i32_59 = arith.constant 11 : i32
    %208 = arith.cmpi eq, %207, %c11_i32_59 : i32
    %209 = arith.extui %208 : i1 to i32
    %c0_i32_60 = arith.constant 0 : i32
    %210 = arith.cmpi ne, %209, %c0_i32_60 : i32
    scf.if %210 {
      %c0_91 = arith.constant 0 : index
      %c0_92 = arith.constant 0 : index
      %329 = vector.load %arg9[%c0_91, %c0_92] : memref<8x128xf32, #tpu.memory_space<vmem>>, vector<8x128xf32>
      tpu.vector_store %arg9[%c0_91, %c0_92], %202 {strides = array<i32>} : memref<8x128xf32, #tpu.memory_space<vmem>>, vector<8x128xf32>,
    } else {
    }
    %c5_i32 = arith.constant 5 : i32
    %211 = arith.index_cast %c5_i32 : i32 to index
    %c0_61 = arith.constant 0 : index
    %c0_62 = arith.constant 0 : index
    %212 = vector.load %arg11[%211, %c0_61, %c0_62] : memref<8x8x384xf32, #tpu.memory_space<vmem>>, vector<1x8x384xf32>
    %213 = vector.shape_cast %212 : vector<1x8x384xf32> to vector<8x384xf32>
    %214 = arith.truncf %202 : vector<8x128xf32> to vector<8x128xbf16>
    %cst_63 = arith.constant dense<0.000000e+00> : vector<8x384xf32>
    %215 = tpu.matmul %214, %12, %cst_63 {dimension_numbers = #tpu.dot_dimension_numbers<[1], [0], [0], [1], [0, 0, 1, 1], [], []>} : vector<8x128xbf16>, vector<128x384xbf16>, vector<8x384xf32> -> vector<8x384xf32>
    %216 = vector.extract_strided_slice %213 {offsets = [0, 0], sizes = [8, 128], strides = [1, 1]} : vector<8x384xf32> to vector<8x128xf32>
    %217 = vector.extract_strided_slice %215 {offsets = [0, 0], sizes = [8, 128], strides = [1, 1]} : vector<8x384xf32> to vector<8x128xf32>
    %218 = arith.addf %216, %217 : vector<8x128xf32>
    %219 = arith.negf %218 : vector<8x128xf32>
    %220 = math.exp %219 : vector<8x128xf32>
    %cst_64 = arith.constant 1.000000e+00 : f32
    %221 = vector.broadcast %cst_64 : f32 to vector<8x128xf32>
    %222 = arith.addf %221, %220 : vector<8x128xf32>
    %223 = arith.divf %221, %222 : vector<8x128xf32>
    %224 = vector.extract_strided_slice %213 {offsets = [0, 128], sizes = [8, 128], strides = [1, 1]} : vector<8x384xf32> to vector<8x128xf32>
    %225 = vector.extract_strided_slice %215 {offsets = [0, 128], sizes = [8, 128], strides = [1, 1]} : vector<8x384xf32> to vector<8x128xf32>
    %226 = arith.addf %224, %225 : vector<8x128xf32>
    %227 = arith.negf %226 : vector<8x128xf32>
    %228 = math.exp %227 : vector<8x128xf32>
    %cst_65 = arith.constant 1.000000e+00 : f32
    %229 = vector.broadcast %cst_65 : f32 to vector<8x128xf32>
    %230 = arith.addf %229, %228 : vector<8x128xf32>
    %231 = arith.divf %229, %230 : vector<8x128xf32>
    %232 = vector.extract_strided_slice %213 {offsets = [0, 256], sizes = [8, 128], strides = [1, 1]} : vector<8x384xf32> to vector<8x128xf32>
    %233 = vector.extract_strided_slice %215 {offsets = [0, 256], sizes = [8, 128], strides = [1, 1]} : vector<8x384xf32> to vector<8x128xf32>
    %234 = vector.broadcast %13 : vector<1x128xf32> to vector<8x128xf32>
    %235 = arith.addf %233, %234 : vector<8x128xf32>
    %236 = arith.mulf %223, %235 : vector<8x128xf32>
    %237 = arith.addf %232, %236 : vector<8x128xf32>
    %238 = math.tanh %237 : vector<8x128xf32>
    %239 = arith.subf %202, %238 : vector<8x128xf32>
    %240 = arith.mulf %231, %239 : vector<8x128xf32>
    %241 = arith.addf %238, %240 : vector<8x128xf32>
    %242 = arith.index_cast %c5_i32 : i32 to index
    %c0_66 = arith.constant 0 : index
    %c0_67 = arith.constant 0 : index
    %243 = vector.load %arg8[%242, %c0_66, %c0_67] : memref<8x8x128xf32, #tpu.memory_space<vmem>>, vector<1x8x128xf32>
    %244 = vector.shape_cast %243 : vector<1x8x128xf32> to vector<8x128xf32>
    %245 = vector.shape_cast %241 : vector<8x128xf32> to vector<1x8x128xf32>
    tpu.vector_store %arg8[%242, %c0_66, %c0_67], %245 {strides = array<i32>} : memref<8x8x128xf32, #tpu.memory_space<vmem>>, vector<1x8x128xf32>,
    %246 = arith.addi %14, %c5_i32 : i32
    %c11_i32_68 = arith.constant 11 : i32
    %247 = arith.cmpi eq, %246, %c11_i32_68 : i32
    %248 = arith.extui %247 : i1 to i32
    %c0_i32_69 = arith.constant 0 : i32
    %249 = arith.cmpi ne, %248, %c0_i32_69 : i32
    scf.if %249 {
      %c0_91 = arith.constant 0 : index
      %c0_92 = arith.constant 0 : index
      %329 = vector.load %arg9[%c0_91, %c0_92] : memref<8x128xf32, #tpu.memory_space<vmem>>, vector<8x128xf32>
      tpu.vector_store %arg9[%c0_91, %c0_92], %241 {strides = array<i32>} : memref<8x128xf32, #tpu.memory_space<vmem>>, vector<8x128xf32>,
    } else {
    }
    %c6_i32 = arith.constant 6 : i32
    %250 = arith.index_cast %c6_i32 : i32 to index
    %c0_70 = arith.constant 0 : index
    %c0_71 = arith.constant 0 : index
    %251 = vector.load %arg11[%250, %c0_70, %c0_71] : memref<8x8x384xf32, #tpu.memory_space<vmem>>, vector<1x8x384xf32>
    %252 = vector.shape_cast %251 : vector<1x8x384xf32> to vector<8x384xf32>
    %253 = arith.truncf %241 : vector<8x128xf32> to vector<8x128xbf16>
    %cst_72 = arith.constant dense<0.000000e+00> : vector<8x384xf32>
    %254 = tpu.matmul %253, %12, %cst_72 {dimension_numbers = #tpu.dot_dimension_numbers<[1], [0], [0], [1], [0, 0, 1, 1], [], []>} : vector<8x128xbf16>, vector<128x384xbf16>, vector<8x384xf32> -> vector<8x384xf32>
    %255 = vector.extract_strided_slice %252 {offsets = [0, 0], sizes = [8, 128], strides = [1, 1]} : vector<8x384xf32> to vector<8x128xf32>
    %256 = vector.extract_strided_slice %254 {offsets = [0, 0], sizes = [8, 128], strides = [1, 1]} : vector<8x384xf32> to vector<8x128xf32>
    %257 = arith.addf %255, %256 : vector<8x128xf32>
    %258 = arith.negf %257 : vector<8x128xf32>
    %259 = math.exp %258 : vector<8x128xf32>
    %cst_73 = arith.constant 1.000000e+00 : f32
    %260 = vector.broadcast %cst_73 : f32 to vector<8x128xf32>
    %261 = arith.addf %260, %259 : vector<8x128xf32>
    %262 = arith.divf %260, %261 : vector<8x128xf32>
    %263 = vector.extract_strided_slice %252 {offsets = [0, 128], sizes = [8, 128], strides = [1, 1]} : vector<8x384xf32> to vector<8x128xf32>
    %264 = vector.extract_strided_slice %254 {offsets = [0, 128], sizes = [8, 128], strides = [1, 1]} : vector<8x384xf32> to vector<8x128xf32>
    %265 = arith.addf %263, %264 : vector<8x128xf32>
    %266 = arith.negf %265 : vector<8x128xf32>
    %267 = math.exp %266 : vector<8x128xf32>
    %cst_74 = arith.constant 1.000000e+00 : f32
    %268 = vector.broadcast %cst_74 : f32 to vector<8x128xf32>
    %269 = arith.addf %268, %267 : vector<8x128xf32>
    %270 = arith.divf %268, %269 : vector<8x128xf32>
    %271 = vector.extract_strided_slice %252 {offsets = [0, 256], sizes = [8, 128], strides = [1, 1]} : vector<8x384xf32> to vector<8x128xf32>
    %272 = vector.extract_strided_slice %254 {offsets = [0, 256], sizes = [8, 128], strides = [1, 1]} : vector<8x384xf32> to vector<8x128xf32>
    %273 = vector.broadcast %13 : vector<1x128xf32> to vector<8x128xf32>
    %274 = arith.addf %272, %273 : vector<8x128xf32>
    %275 = arith.mulf %262, %274 : vector<8x128xf32>
    %276 = arith.addf %271, %275 : vector<8x128xf32>
    %277 = math.tanh %276 : vector<8x128xf32>
    %278 = arith.subf %241, %277 : vector<8x128xf32>
    %279 = arith.mulf %270, %278 : vector<8x128xf32>
    %280 = arith.addf %277, %279 : vector<8x128xf32>
    %281 = arith.index_cast %c6_i32 : i32 to index
    %c0_75 = arith.constant 0 : index
    %c0_76 = arith.constant 0 : index
    %282 = vector.load %arg8[%281, %c0_75, %c0_76] : memref<8x8x128xf32, #tpu.memory_space<vmem>>, vector<1x8x128xf32>
    %283 = vector.shape_cast %282 : vector<1x8x128xf32> to vector<8x128xf32>
    %284 = vector.shape_cast %280 : vector<8x128xf32> to vector<1x8x128xf32>
    tpu.vector_store %arg8[%281, %c0_75, %c0_76], %284 {strides = array<i32>} : memref<8x8x128xf32, #tpu.memory_space<vmem>>, vector<1x8x128xf32>,
    %285 = arith.addi %14, %c6_i32 : i32
    %c11_i32_77 = arith.constant 11 : i32
    %286 = arith.cmpi eq, %285, %c11_i32_77 : i32
    %287 = arith.extui %286 : i1 to i32
    %c0_i32_78 = arith.constant 0 : i32
    %288 = arith.cmpi ne, %287, %c0_i32_78 : i32
    scf.if %288 {
      %c0_91 = arith.constant 0 : index
      %c0_92 = arith.constant 0 : index
      %329 = vector.load %arg9[%c0_91, %c0_92] : memref<8x128xf32, #tpu.memory_space<vmem>>, vector<8x128xf32>
      tpu.vector_store %arg9[%c0_91, %c0_92], %280 {strides = array<i32>} : memref<8x128xf32, #tpu.memory_space<vmem>>, vector<8x128xf32>,
    } else {
    }
    %c7_i32 = arith.constant 7 : i32
    %289 = arith.index_cast %c7_i32 : i32 to index
    %c0_79 = arith.constant 0 : index
    %c0_80 = arith.constant 0 : index
    %290 = vector.load %arg11[%289, %c0_79, %c0_80] : memref<8x8x384xf32, #tpu.memory_space<vmem>>, vector<1x8x384xf32>
    %291 = vector.shape_cast %290 : vector<1x8x384xf32> to vector<8x384xf32>
    %292 = arith.truncf %280 : vector<8x128xf32> to vector<8x128xbf16>
    %cst_81 = arith.constant dense<0.000000e+00> : vector<8x384xf32>
    %293 = tpu.matmul %292, %12, %cst_81 {dimension_numbers = #tpu.dot_dimension_numbers<[1], [0], [0], [1], [0, 0, 1, 1], [], []>} : vector<8x128xbf16>, vector<128x384xbf16>, vector<8x384xf32> -> vector<8x384xf32>
    %294 = vector.extract_strided_slice %291 {offsets = [0, 0], sizes = [8, 128], strides = [1, 1]} : vector<8x384xf32> to vector<8x128xf32>
    %295 = vector.extract_strided_slice %293 {offsets = [0, 0], sizes = [8, 128], strides = [1, 1]} : vector<8x384xf32> to vector<8x128xf32>
    %296 = arith.addf %294, %295 : vector<8x128xf32>
    %297 = arith.negf %296 : vector<8x128xf32>
    %298 = math.exp %297 : vector<8x128xf32>
    %cst_82 = arith.constant 1.000000e+00 : f32
    %299 = vector.broadcast %cst_82 : f32 to vector<8x128xf32>
    %300 = arith.addf %299, %298 : vector<8x128xf32>
    %301 = arith.divf %299, %300 : vector<8x128xf32>
    %302 = vector.extract_strided_slice %291 {offsets = [0, 128], sizes = [8, 128], strides = [1, 1]} : vector<8x384xf32> to vector<8x128xf32>
    %303 = vector.extract_strided_slice %293 {offsets = [0, 128], sizes = [8, 128], strides = [1, 1]} : vector<8x384xf32> to vector<8x128xf32>
    %304 = arith.addf %302, %303 : vector<8x128xf32>
    %305 = arith.negf %304 : vector<8x128xf32>
    %306 = math.exp %305 : vector<8x128xf32>
    %cst_83 = arith.constant 1.000000e+00 : f32
    %307 = vector.broadcast %cst_83 : f32 to vector<8x128xf32>
    %308 = arith.addf %307, %306 : vector<8x128xf32>
    %309 = arith.divf %307, %308 : vector<8x128xf32>
    %310 = vector.extract_strided_slice %291 {offsets = [0, 256], sizes = [8, 128], strides = [1, 1]} : vector<8x384xf32> to vector<8x128xf32>
    %311 = vector.extract_strided_slice %293 {offsets = [0, 256], sizes = [8, 128], strides = [1, 1]} : vector<8x384xf32> to vector<8x128xf32>
    %312 = vector.broadcast %13 : vector<1x128xf32> to vector<8x128xf32>
    %313 = arith.addf %311, %312 : vector<8x128xf32>
    %314 = arith.mulf %301, %313 : vector<8x128xf32>
    %315 = arith.addf %310, %314 : vector<8x128xf32>
    %316 = math.tanh %315 : vector<8x128xf32>
    %317 = arith.subf %280, %316 : vector<8x128xf32>
    %318 = arith.mulf %309, %317 : vector<8x128xf32>
    %319 = arith.addf %316, %318 : vector<8x128xf32>
    %320 = arith.index_cast %c7_i32 : i32 to index
    %c0_84 = arith.constant 0 : index
    %c0_85 = arith.constant 0 : index
    %321 = vector.load %arg8[%320, %c0_84, %c0_85] : memref<8x8x128xf32, #tpu.memory_space<vmem>>, vector<1x8x128xf32>
    %322 = vector.shape_cast %321 : vector<1x8x128xf32> to vector<8x128xf32>
    %323 = vector.shape_cast %319 : vector<8x128xf32> to vector<1x8x128xf32>
    tpu.vector_store %arg8[%320, %c0_84, %c0_85], %323 {strides = array<i32>} : memref<8x8x128xf32, #tpu.memory_space<vmem>>, vector<1x8x128xf32>,
    %324 = arith.addi %14, %c7_i32 : i32
    %c11_i32_86 = arith.constant 11 : i32
    %325 = arith.cmpi eq, %324, %c11_i32_86 : i32
    %326 = arith.extui %325 : i1 to i32
    %c0_i32_87 = arith.constant 0 : i32
    %327 = arith.cmpi ne, %326, %c0_i32_87 : i32
    scf.if %327 {
      %c0_91 = arith.constant 0 : index
      %c0_92 = arith.constant 0 : index
      %329 = vector.load %arg9[%c0_91, %c0_92] : memref<8x128xf32, #tpu.memory_space<vmem>>, vector<8x128xf32>
      tpu.vector_store %arg9[%c0_91, %c0_92], %319 {strides = array<i32>} : memref<8x128xf32, #tpu.memory_space<vmem>>, vector<8x128xf32>,
    } else {
    }
    %c8_i32_88 = arith.constant 8 : i32
    %c0_89 = arith.constant 0 : index
    %c0_90 = arith.constant 0 : index
    %328 = vector.load %arg10[%c0_89, %c0_90] : memref<8x128xf32, #tpu.memory_space<vmem>>, vector<8x128xf32>
    tpu.vector_store %arg10[%c0_89, %c0_90], %319 {strides = array<i32>} : memref<8x128xf32, #tpu.memory_space<vmem>>, vector<8x128xf32>,
    return
  }
  func.func @transform_0(%arg0: i32, %arg1: i32) -> (i32, i32, i32) {
    %c0_i32 = arith.constant 0 : i32
    %c0_i32_0 = arith.constant 0 : i32
    return %arg1, %arg0, %c0_i32 : i32, i32, i32
  }
  func.func @transform_1(%arg0: i32, %arg1: i32) -> (i32, i32) {
    %c0_i32 = arith.constant 0 : i32
    %c0_i32_0 = arith.constant 0 : i32
    return %arg0, %c0_i32 : i32, i32
  }
  func.func @transform_2(%arg0: i32, %arg1: i32) -> (i32, i32) {
    %c0_i32 = arith.constant 0 : i32
    %c0_i32_0 = arith.constant 0 : i32
    %c0_i32_1 = arith.constant 0 : i32
    return %c0_i32, %c0_i32_0 : i32, i32
  }
  func.func @transform_3(%arg0: i32, %arg1: i32) -> (i32, i32) {
    %c0_i32 = arith.constant 0 : i32
    %c0_i32_0 = arith.constant 0 : i32
    %c0_i32_1 = arith.constant 0 : i32
    return %c0_i32, %c0_i32_0 : i32, i32
  }
  func.func @transform_4(%arg0: i32, %arg1: i32) -> (i32, i32) {
    %c0_i32 = arith.constant 0 : i32
    %c0_i32_0 = arith.constant 0 : i32
    %c0_i32_1 = arith.constant 0 : i32
    return %c0_i32, %c0_i32_0 : i32, i32
  }
  func.func @transform_5(%arg0: i32, %arg1: i32) -> (i32, i32) {
    %c0_i32 = arith.constant 0 : i32
    %c0_i32_0 = arith.constant 0 : i32
    %c0_i32_1 = arith.constant 0 : i32
    return %c0_i32, %c0_i32_0 : i32, i32
  }
  func.func @transform_6(%arg0: i32, %arg1: i32) -> (i32, i32, i32) {
    %c0_i32 = arith.constant 0 : i32
    %c0_i32_0 = arith.constant 0 : i32
    return %arg1, %arg0, %c0_i32 : i32, i32, i32
  }
  func.func @transform_7(%arg0: i32, %arg1: i32) -> (i32, i32) {
    %c0_i32 = arith.constant 0 : i32
    %c0_i32_0 = arith.constant 0 : i32
    return %arg0, %c0_i32 : i32, i32
  }
}

</mosaic_0001>

<bundles_post_ra>
// kernel: gru_forward.3
= control target key start
LH: loop header
LB: loop body
LE: loop exit
PB: predicated region body
PF: predicated region fallthrough
CT: control target
= control target key end

     0   :  { %s2536_s24 = smov 0   ;;  %s2538_s25 = smov 0   ;;  %s3213_s0 = inlined_call_operand.vmem [shape: bf16[16,8,128], index: 0, kind: input, shape index: {}]   ;;  %s3214_s1 = inlined_call_operand.vmem [shape: f32[8,128], index: 1, kind: input, shape index: {}]   ;;  %s3215_s2 = inlined_call_operand.vmem [shape: bf16[128,384], index: 2, kind: input, shape index: {}]   ;;  %s3216_s3 = inlined_call_operand.vmem [shape: bf16[128,384], index: 3, kind: input, shape index: {}]   ;;  %s3217_s4 = inlined_call_operand.vmem [shape: f32[1,384], index: 4, kind: input, shape index: {}]   ;;  %s3218_s5 = inlined_call_operand.vmem [shape: f32[1,128], index: 5, kind: input, shape index: {}]   ;;  %s3219_s6 = inlined_call_operand.vmem [shape: f32[16,8,128], index: 6, kind: output, shape index: {0}]   ;;  %s3220_s7 = inlined_call_operand.vmem [shape: f32[8,128], index: 7, kind: output, shape index: {1}]  }
   0x1   :  { %s2540_s26 = smov 0  }
   0x2 LB: > { %s27_s27 = sadd.s32 1, %s2487_s25  ;;  %p1932_p0 = scmp.ge.s32.totalorder %s2491_s26, 1  ;;  %s2491_s26 = sphi %s2540_s26, %s18_s26   ;;  %s2487_s25 = sphi %s2538_s25, %s3222_s25   ;;  %s2483_s24 = sphi %s2536_s24, %s3221_s24  }
   0x3   : > { %p28_p1 = scmp.ge.s32.totalorder %s27_s27, 2  ;;  %p269_p2 = scmp.lt.s32.totalorder %s2491_s26, 3 }
   0x5   : > { %s3224_s27 = smov (%p28_p1, %s27_s27), 0  ;;  %p270_p3 = pnand %p1932_p0, %p269_p2 }
   0x6   : > { %s2554_s28 = sshll.u32 (!%p270_p3), %s2483_s24, 3  ;;  %p1937_p5 = scmp.ne.s32.totalorder (!%p270_p3), %s2483_s24, 0 }
   0x7   : > { %273 = sbr.rel (%p270_p3) target bundleno = 2334 (0x91e), region = 44  ;;  %p316_p4 = scmp.lt.s32.totalorder (!%p270_p3), %s2554_s28, 15 }
   0xc   : > { %s317_s29 = scalar_select %p316_p4, %s2554_s28, 15 }
   0xd   : > { %345 = sbr.rel (%p1937_p5) target bundleno = 20 (0x14), region = 48 }
   0xe   : > { %s1934_s30 = sshll.u32 %s317_s29, 2  ;;  %s1936_s8 = sshll.u32 %s317_s29, 3 }
   0xf   : > { %s2561_s11 = scalar_lea.vmem %s3213_s0, %s1934_s30  ;;  %s2566_s14 = scalar_lea.vmem %s3219_s6, %s1936_s8 }
  0x12   : > { %v346_v0 = vld [vmem:[%s3214_s1] sm:$0xff] }
  0x13   : > { %347 = vst [vmem:[#allocation2] sm:$0xff] %v346_v0 }
  0x14 PF: > { %v2321_v1 = vld [vmem:[%s3215_s2 + $0xac] ss:$12 sps:$4 sm:$0xff]   ;;  %v2323_v2 = vld [vmem:[%s3215_s2 + $0xa8] ss:$12 sps:$4 sm:$0xff]   ;;  %v2493_v3 = vmov 0   ;;  %v2347_v13 = vld [vmem:[%s2561_s11] sm:$0xff]   ;;  %v390_v57 = vlaneseq }
  0x15   : > { %589 = vmatprep.mubr.bf16.mxu0 %v2493_v3  ;;  %557 = vmatprep.subr.bf16.mxu0 %v2321_v1  ;;  %v2324_v4 = vld [vmem:[%s3215_s2 + $0x94] ss:$12 sps:$4 sm:$0xff]   ;;  %v2326_v5 = vld [vmem:[%s3215_s2 + $0x90] ss:$12 sps:$4 sm:$0xff]   ;;  %v2329_v7 = vld [vmem:[%s3215_s2 + $0x78] ss:$12 sps:$4 sm:$0xff]  }
  0x16   : > { %558 = vmatpush1.bf16.msra.mxu0 %v2323_v2  ;;  %v2327_v6 = vld [vmem:[%s3215_s2 + $0x7c] ss:$12 sps:$4 sm:$0xff]   ;;  %v2330_v8 = vld [vmem:[%s3215_s2 + $0x64] ss:$12 sps:$4 sm:$0xff]   ;;  %v2332_v10 = vld [vmem:[%s3215_s2 + $0x60] ss:$12 sps:$4 sm:$0xff]   ;;  %2126 = vmatprep.mubr.bf16.mxu1 %v2347_v13 }
  0x17   : > { %559 = vmatprep.subr.bf16.mxu0 %v2324_v4  ;;  %v2342_v9 = vld [vmem:[%s3215_s2 + $0xb0] ss:$12 sps:$4 sm:$0xff]   ;;  %v2333_v11 = vld [vmem:[%s3215_s2 + $0x4c] ss:$12 sps:$4 sm:$0xff]   ;;  %v2335_v14 = vld [vmem:[%s3215_s2 + $0x48] ss:$12 sps:$4 sm:$0xff]  }
  0x18   : > { %2110 = vmatprep.subr.bf16.mxu1 %v2342_v9  ;;  %v2346_v12 = vld [vmem:[%s3215_s2 + $0x98] ss:$12 sps:$4 sm:$0xff]   ;;  %v2351_v15 = vld [vmem:[%s3215_s2 + $0x80] ss:$12 sps:$4 sm:$0xff]   ;;  %v2355_v17 = vld [vmem:[%s3215_s2 + $0x68] ss:$12 sps:$4 sm:$0xff]  }
  0x19   : > { %2111 = vmatpush3.bf16.msra.mxu1 %v2342_v9  ;;  %v2336_v16 = vld [vmem:[%s3215_s2 + $0x34] ss:$12 sps:$4 sm:$0xff]   ;;  %v2338_v18 = vld [vmem:[%s3215_s2 + $0x30] ss:$12 sps:$4 sm:$0xff]   ;;  %v2341_v21 = vld [vmem:[%s3215_s2 + $0x18] ss:$12 sps:$4 sm:$0xff]  }
  0x1a   : > { %560 = vmatpush1.bf16.msra.mxu0 %v2326_v5  ;;  %2112 = vmatprep.subr.bf16.mxu1 %v2346_v12  ;;  %v2339_v19 = vld [vmem:[%s3215_s2 + $0x1c] ss:$12 sps:$4 sm:$0xff]   ;;  %v2343_v22 = vld [vmem:[%s3215_s2 + $0x4] ss:$12 sps:$4 sm:$0xff]   ;;  %v2345_v24 = vld [vmem:[%s3215_s2] ss:$12 sps:$4 sm:$0xff]  }
  0x1b   : > { %561 = vmatprep.subr.bf16.mxu0 %v2327_v6  ;;  %v2360_v20 = vld [vmem:[%s3215_s2 + $0x50] ss:$12 sps:$4 sm:$0xff]   ;;  %v2364_v23 = vld [vmem:[%s3215_s2 + $0x38] ss:$12 sps:$4 sm:$0xff]   ;;  %v2369_v26 = vld [vmem:[%s3215_s2 + $0x20] ss:$12 sps:$4 sm:$0xff]  }
  0x1c   : > { %v2642_v25 = vld [vmem:[%s3216_s3 + $0xac] ss:$12 sps:$4 sm:$0xff]   ;;  %v2650_v27 = vld [vmem:[%s3216_s3 + $0xa8] ss:$12 sps:$4 sm:$0xff]   ;;  %v2665_v30 = vld [vmem:[%s3216_s3 + $0x90] ss:$12 sps:$4 sm:$0xff]  }
  0x1d   : > { %2113 = vmatpush3.bf16.msra.mxu1 %v2346_v12  ;;  %v2656_v28 = vld [vmem:[%s3216_s3 + $0x94] ss:$12 sps:$4 sm:$0xff]   ;;  %v2672_v31 = vld [vmem:[%s3216_s3 + $0x7c] ss:$12 sps:$4 sm:$0xff]   ;;  %v2679_v33 = vld [vmem:[%s3216_s3 + $0x78] ss:$12 sps:$4 sm:$0xff]  }
  0x1e   : > { %562 = vmatpush1.bf16.msra.mxu0 %v2329_v7  ;;  %2114 = vmatprep.subr.bf16.mxu1 %v2351_v15  ;;  %v2373_v29 = vld [vmem:[%s3215_s2 + $0x8] ss:$12 sps:$4 sm:$0xff]   ;;  %v2685_v34 = vld [vmem:[%s3216_s3 + $0x64] ss:$12 sps:$4 sm:$0xff]   ;;  %v2494_v36 = vmov 0.0   ;;  %v2374_v44 = vld [vmem:[%s2561_s11 + $0x18] sm:$0xff]  }
  0x1f   : > { %563 = vmatprep.subr.bf16.mxu0 %v2330_v8  ;;  %v2356_v32 = vld [vmem:[%s2561_s11 + $0x8] sm:$0xff]   ;;  %v2690_v35 = vld [vmem:[%s3216_s3 + $0xb0] ss:$12 sps:$4 sm:$0xff]   ;;  %v2711_v40 = vld [vmem:[%s3216_s3 + $0x98] ss:$12 sps:$4 sm:$0xff]   ;;  %vm2495_vm0 = vmmov 0  }
  0x20   : > { %v2697_v37 = vld [vmem:[%s3216_s3 + $0x60] ss:$12 sps:$4 sm:$0xff]   ;;  %v2365_v38 = vld [vmem:[%s2561_s11 + $0x10] sm:$0xff]   ;;  %v2745_v46 = vld [vmem:[%s3216_s3 + $0x1c] ss:$12 sps:$4 sm:$0xff]   ;;  %v391_v58 = vshrl.u32 %v390_v57, 7 }
  0x21   : > { %2115 = vmatpush3.bf16.msra.mxu1 %v2351_v15  ;;  %v2705_v39 = vld [vmem:[%s3216_s3 + $0x4c] ss:$12 sps:$4 sm:$0xff]   ;;  %v2718_v41 = vld [vmem:[%s3216_s3 + $0x48] ss:$12 sps:$4 sm:$0xff]   ;;  %v2738_v45 = vld [vmem:[%s3216_s3 + $0x30] ss:$12 sps:$4 sm:$0xff]  }
  0x22   : > { %564 = vmatpush1.bf16.msra.mxu0 %v2332_v10  ;;  %2116 = vmatprep.subr.bf16.mxu1 %v2355_v17  ;;  %v2724_v42 = vld [vmem:[%s3216_s3 + $0x34] ss:$12 sps:$4 sm:$0xff]   ;;  %v2760_v48 = vld [vmem:[%s3216_s3 + $0x18] ss:$12 sps:$4 sm:$0xff]   ;;  %v2772_v50 = vld [vmem:[%s3216_s3 + $0x50] ss:$12 sps:$4 sm:$0xff]  }
  0x23   : > { %565 = vmatprep.subr.bf16.mxu0 %v2333_v11  ;;  %v2730_v43 = vld [vmem:[%s3216_s3 + $0x80] ss:$12 sps:$4 sm:$0xff]   ;;  %v2751_v47 = vld [vmem:[%s3216_s3 + $0x68] ss:$12 sps:$4 sm:$0xff]   ;;  %v2766_v49 = vld [vmem:[%s3216_s3 + $0x4] ss:$12 sps:$4 sm:$0xff]  }
  0x24   : > { %v2779_v51 = vld [vmem:[%s3216_s3] ss:$12 sps:$4 sm:$0xff]   ;;  %v2789_v53 = vld [vmem:[%s3216_s3 + $0x38] ss:$12 sps:$4 sm:$0xff]   ;;  %v2806_v56 = vld [vmem:[%s3216_s3 + $0x8] ss:$12 sps:$4 sm:$0xff]  }
  0x25   : > { %2117 = vmatpush3.bf16.msra.mxu1 %v2355_v17  ;;  %v2782_v52 = vld [vmem:[#allocation2] sm:$0xff]  ;;  %v392_v59 = vsub.s32 0, %v391_v58  ;;  %v396_v61 = vsub.s32 1, %v391_v58  ;;  %v400_v5 = vsub.s32 2, %v391_v58  ;;  %p1994_p6 = scmp.ne.s32.totalorder %s2554_s28, 11 }
  0x26   : > { %566 = vmatpush1.bf16.msra.mxu0 %v2335_v14  ;;  %2118 = vmatprep.subr.bf16.mxu1 %v2360_v20  ;;  %v757_v54 = vpack.c.bf16 %v2782_v52, %v2782_v52  ;;  %v2799_v55 = vld [vmem:[%s3216_s3 + $0x20] ss:$12 sps:$4 sm:$0xff]  }
  0x27   : > { %567 = vmatprep.subr.bf16.mxu0 %v2336_v16  ;;  %v388_v60 = vld [vmem:[%s3217_s4] sm:$0x7] }
  0x28   : > { %v2813_v62 = vrot.slane %v388_v60, %v392_v59  ;;  %v2815_v63 = vrot.slane %v388_v60, %v396_v61  ;;  %v401_v10 = vrot.slane %v388_v60, %v400_v5 }
  0x29   : > { %2119 = vmatpush3.bf16.msra.mxu1 %v2360_v20 }
  0x2a   : > { %568 = vmatpush1.bf16.msra.mxu0 %v2338_v18  ;;  %2120 = vmatprep.subr.bf16.mxu1 %v2364_v23 }
  0x2b   : > { %569 = vmatprep.subr.bf16.mxu0 %v2339_v19 }
  0x2d   : > { %2121 = vmatpush3.bf16.msra.mxu1 %v2364_v23 }
  0x2e   : > { %570 = vmatpush1.bf16.msra.mxu0 %v2341_v21  ;;  %2122 = vmatprep.subr.bf16.mxu1 %v2369_v26 }
  0x2f   : > { %571 = vmatprep.subr.bf16.mxu0 %v2343_v22 }
  0x31   : > { %2123 = vmatpush3.bf16.msra.mxu1 %v2369_v26 }
  0x32   : > { %572 = vmatpush1.bf16.msra.mxu0 %v2345_v24  ;;  %2124 = vmatprep.subr.bf16.mxu1 %v2373_v29 }
  0x33   : > { %886 = vmatprep.subr.bf16.mxu0 %v2642_v25 }
  0x35   : > { %590 = vmatmul.mubr.bf16.vlgmr.msra.gmra.mxu0 %v2347_v13  ;;  %2125 = vmatpush3.bf16.msra.mxu1 %v2373_v29 }
  0x36   : > { %887 = vmatpush1.bf16.msra.mxu0 %v2650_v27  ;;  %599 = vmatprep.mubr.bf16.mxu0 %v2493_v3 }
  0x37   : > { %888 = vmatprep.subr.bf16.mxu0 %v2656_v28  ;;  %2134 = vmatprep.subr.bf16.mxu1 %v2494_v36 }
  0x38   : > { %2127 = vmatmul.mubr.bf16.vlgmr.msra.gmra.mxu1 %v2356_v32 }
  0x39   : > { %2135 = vmatpush3.bf16.msra.mxu1 %v2690_v35  ;;  %2130 = vmatprep.mubr.bf16.mxu1 %v2365_v38 }
  0x3a   : > { %889 = vmatpush1.bf16.msra.mxu0 %v2665_v30  ;;  %2136 = vmatprep.subr.bf16.mxu1 %v2494_v36 }
  0x3b   : > { %890 = vmatprep.subr.bf16.mxu0 %v2672_v31 }
  0x3d   : > { %600 = vmatmul.mubr.bf16.gmra.mxu0 %v2356_v32  ;;  %2137 = vmatpush3.bf16.msra.mxu1 %v2711_v40 }
  0x3e   : > { %891 = vmatpush1.bf16.msra.mxu0 %v2679_v33  ;;  %609 = vmatprep.mubr.bf16.mxu0 %v2493_v3 }
  0x3f   : > { %892 = vmatprep.subr.bf16.mxu0 %v2685_v34  ;;  %2138 = vmatprep.subr.bf16.mxu1 %v2494_v36 }
  0x40   : > { %2131 = vmatmul.mubr.bf16.gmra.mxu1 %v2374_v44 }
  0x41   : > { %2139 = vmatpush3.bf16.msra.mxu1 %v2730_v43  ;;  %2150 = vmatprep.mubr.msk.bf16.mxu1 %vm2495_vm0, %v2494_v36 }
  0x42   : > { %893 = vmatpush1.bf16.msra.mxu0 %v2697_v37  ;;  %2140 = vmatprep.subr.bf16.mxu1 %v2494_v36 }
  0x43   : > { %894 = vmatprep.subr.bf16.mxu0 %v2705_v39 }
  0x45   : > { %610 = vmatmul.mubr.bf16.gmra.mxu0 %v2365_v38  ;;  %2141 = vmatpush3.bf16.msra.mxu1 %v2751_v47 }
  0x46   : > { %895 = vmatpush1.bf16.msra.mxu0 %v2718_v41  ;;  %619 = vmatprep.mubr.bf16.mxu0 %v2493_v3 }
  0x47   : > { %896 = vmatprep.subr.bf16.mxu0 %v2724_v42  ;;  %2142 = vmatprep.subr.bf16.mxu1 %v2494_v36 }
  0x49   : > { %2143 = vmatpush3.bf16.msra.mxu1 %v2772_v50 }
  0x4a   : > { %897 = vmatpush1.bf16.msra.mxu0 %v2738_v45  ;;  %2144 = vmatprep.subr.bf16.mxu1 %v2494_v36 }
  0x4b   : > { %898 = vmatprep.subr.bf16.mxu0 %v2745_v46 }
  0x4d   : > { %620 = vmatmul.mubr.bf16.gmra.mxu0 %v2374_v44  ;;  %2145 = vmatpush3.bf16.msra.mxu1 %v2789_v53 }
  0x4e   : > { %899 = vmatpush1.bf16.msra.mxu0 %v2760_v48  ;;  %918 = vmatprep.mubr.bf16.mxu0 %v2493_v3 }
  0x4f   : > { %900 = vmatprep.subr.bf16.mxu0 %v2766_v49  ;;  %2146 = vmatprep.subr.bf16.mxu1 %v2494_v36 }
  0x51   : > { %2147 = vmatpush3.bf16.msra.mxu1 %v2799_v55 }
  0x52   : > { %901 = vmatpush1.bf16.msra.mxu0 %v2779_v51  ;;  %2148 = vmatprep.subr.bf16.mxu1 %v2494_v36 }
  0x55   : > { %919 = vmatmul.mubr.bf16.vlgmr.msra.gmra.mxu0 %v757_v54  ;;  %2149 = vmatpush3.bf16.msra.mxu1 %v2806_v56 }
  0x58   : > { %2151 = vmatmul.mubr.bf16.vlgmr.msra.gmra.mxu1 %v757_v54 }
  0xf5   : > { %v591_v0 = vpop.f32.mrf.mxu0 }
  0xf6   : > { %v2818_v1 = vadd.f32 %v591_v0, %v2813_v62 }
  0xf7   : > { %v593_v2 = vpop.f32.mrf.mxu0 }
  0xf8   : > { %v2821_v4 = vadd.f32 %v593_v2, %v2815_v63  ;;  %v2128_v14 = vpop.f32.mrf.mxu1 }
  0xf9   : > { %v595_v6 = vpop.f32.mrf.mxu0  ;;  %v673_v16 = vadd.f32 %v2128_v14, %v401_v10 }
  0xfa   : > { %v596_v7 = vadd.f32 %v595_v6, %v2813_v62  ;;  %v664_v18 = vpop.f32.mrf.mxu1 }
  0xfb   : > { %v597_v8 = vpop.f32.mrf.mxu0  ;;  %703 = vst [vmem:[#allocation3 + $0x88] sm:$0xff] %v673_v16  ;;  %v2828_v20 = vadd.f32 %v664_v18, %v401_v10 }
  0xfc   : > { %698 = vst [vmem:[#allocation3 + $0x48] sm:$0xff] %v596_v7  ;;  %v598_v9 = vadd.f32 %v597_v8, %v2815_v63  ;;  %v2129_v22 = vpop.f32.mrf.mxu1 }
  0xfd   : > { %v601_v11 = vpop.f32.mrf.mxu0  ;;  %v676_v24 = vadd.f32 %v2129_v22, %v401_v10 }
  0xfe   : > { %699 = vst [vmem:[#allocation3 + $0x60] sm:$0xff] %v598_v9  ;;  %v602_v12 = vadd.f32 %v601_v11, %v2813_v62  ;;  %v667_v29 = vpop.f32.mrf.mxu1 }
  0xff   : > { %v603_v13 = vpop.f32.mrf.mxu0  ;;  %706 = vst [vmem:[#allocation3 + $0x98] sm:$0xff] %v676_v24  ;;  %v668_v38 = vadd.f32 %v667_v29, %v401_v10 }
 0x100   : > { %701 = vst [vmem:[#allocation3 + $0x40] sm:$0xff] %v602_v12  ;;  %v604_v15 = vadd.f32 %v603_v13, %v2815_v63  ;;  %v2132_v54 = vpop.f32.mrf.mxu1 }
 0x101   : > { %v605_v17 = vpop.f32.mrf.mxu0  ;;  %700 = vst [vmem:[#allocation3 + $0x28] sm:$0xff] %v668_v38  ;;  %v689_v58 = vadd.f32 %v2132_v54, %v401_v10 }
 0x102   : > { %702 = vst [vmem:[#allocation3 + $0x78] sm:$0xff] %v604_v15  ;;  %v606_v19 = vadd.f32 %v605_v17, %v2813_v62  ;;  %v680_v60 = vpop.f32.mrf.mxu1 }
 0x103   : > { %v607_v21 = vpop.f32.mrf.mxu0  ;;  %715 = vst [vmem:[#allocation3 + $0x80] sm:$0xff] %v689_v58  ;;  %v681_v0 = vadd.f32 %v680_v60, %v401_v10 }
 0x104   : > { %704 = vst [vmem:[#allocation3 + $0x90] sm:$0xff] %v606_v19  ;;  %v608_v23 = vadd.f32 %v607_v21, %v2815_v63  ;;  %v2133_v5 = vpop.f32.mrf.mxu1 }
 0x105   : > { %v611_v26 = vpop.f32.mrf.mxu0  ;;  %709 = vst [vmem:[#allocation3 + $0x70] sm:$0xff] %v681_v0  ;;  %v692_v7 = vadd.f32 %v2133_v5, %v401_v10 }
 0x106   : > { %705 = vst [vmem:[#allocation3 + $0x18] sm:$0xff] %v608_v23  ;;  %v612_v32 = vadd.f32 %v611_v26, %v2813_v62  ;;  %v683_v9 = vpop.f32.mrf.mxu1 }
 0x107   : > { %v613_v44 = vpop.f32.mrf.mxu0  ;;  %718 = vst [vmem:[#allocation3 + $0x8] sm:$0xff] %v692_v7  ;;  %v684_v12 = vadd.f32 %v683_v9, %v401_v10 }
 0x108   : > { %707 = vst [vmem:[#allocation3 + $0x38] sm:$0xff] %v612_v32  ;;  %v614_v57 = vadd.f32 %v613_v44, %v2815_v63 }
 0x109   : > { %v615_v59 = vpop.f32.mrf.mxu0  ;;  %712 = vst [vmem:[#allocation3 + $0x68] sm:$0xff] %v684_v12 }
 0x10a   : > { %708 = vst [vmem:[#allocation3 + $0x50] sm:$0xff] %v614_v57  ;;  %v616_v61 = vadd.f32 %v615_v59, %v2813_v62 }
 0x10b   : > { %v617_v2 = vpop.f32.mrf.mxu0 }
 0x10c   : > { %710 = vst [vmem:[#allocation3 + $0xa0] sm:$0xff] %v616_v61  ;;  %v618_v6 = vadd.f32 %v617_v2, %v2815_v63 }
 0x10d   : > { %v621_v8 = vpop.f32.mrf.mxu0 }
 0x10e   : > { %711 = vst [vmem:[#allocation3 + $0xa8] sm:$0xff] %v618_v6  ;;  %v622_v11 = vadd.f32 %v621_v8, %v2813_v62 }
 0x10f   : > { %v623_v13 = vpop.f32.mrf.mxu0 }
 0x110   : > { %713 = vst [vmem:[#allocation3 + $0x30] sm:$0xff] %v622_v11  ;;  %v624_v14 = vadd.f32 %v623_v13, %v2815_v63 }
 0x111   : > { %v625_v15 = vpop.f32.mrf.mxu0 }
 0x112   : > { %714 = vst [vmem:[#allocation3 + $0x58] sm:$0xff] %v624_v14  ;;  %v626_v16 = vadd.f32 %v625_v15, %v2813_v62 }
 0x113   : > { %v627_v17 = vpop.f32.mrf.mxu0 }
 0x114   : > { %716 = vst [vmem:[#allocation3 + $0xb8] sm:$0xff] %v626_v16  ;;  %v628_v18 = vadd.f32 %v627_v17, %v2815_v63  ;;  %v2844_v63 = vld [vmem:[%s3218_s5] ss:$0 sm:$0xff] }
 0x115   : > { %v920_v19 = vpop.f32.mrf.mxu0 }
 0x116   : > { %717 = vst [vmem:[#allocation3 + $0x20] sm:$0xff] %v628_v18  ;;  %v967_v21 = vadd.f32 %v920_v19, %v2818_v1 }
 0x117   : > { %v922_v22 = vpop.f32.mrf.mxu0 }
 0x118   : > { %v1991_v23 = vmul.f32 -1.442695, %v967_v21  ;;  %v961_v26 = vpop.f32.mrf.mxu1  ;;  %v974_v29 = vadd.f32 %v922_v22, %v2821_v4 }
 0x119   : > { %v924_v10 = vpop.f32.mrf.mxu0  ;;  %v987_v1 = vadd.f32 %v2844_v63, %v961_v26 }
 0x11a   : > { %2389 = vpow2.f32 %v1991_v23  ;;  %v2152_v32 = vpop.f32.mrf.mxu1  ;;  %v1992_v44 = vmul.f32 -1.442695, %v974_v29 }
 0x11b   : > { %v925_v24 = vpop.f32.mrf.mxu0 }
 0x11c   : > { %v964_v38 = vpop.f32.mrf.mxu1  ;;  %2391 = vpow2.f32 %v1992_v44 }
 0x11e   : > { %v2153_v62 = vpop.f32.mrf.mxu1 }
 0x127   : > { %v2390_v54 = vpop.eup %2389 }
 0x128   : > { %v971_v57 = vadd.f32 1.0, %v2390_v54 }
 0x129   : > { %v2392_v58 = vpop.eup %2391 }
 0x12a   : > { %2393 = vrcp.f32 %v971_v57  ;;  %v978_v4 = vadd.f32 1.0, %v2392_v58 }
 0x137   : > { %v2394_v59 = vpop.eup %2393 }
 0x138   : > { %v988_v60 = vmul.f32 %v2394_v59, %v987_v1 }
 0x13a   : > { %v989_v61 = vadd.f32 %v988_v60, %v2828_v20 }
 0x13c   : > { %2395 = vtanh.f32 %v989_v61 }
 0x13d   : > { %2397 = vrcp.f32 %v978_v4 }
 0x149   : > { %v2396_v0 = vpop.eup %2395 }
 0x14a   : > { %v991_v2 = vsub.f32 %v2782_v52, %v2396_v0  ;;  %v2398_v5 = vpop.eup %2397 }
 0x14c   : > { %v992_v6 = vmul.f32 %v2398_v5, %v991_v2  ;;  %998 = sbr.rel (%p1994_p6) target bundleno = 338 (0x152), region = 52 }
 0x14e   : > { %v2849_v7 = vadd.f32 %v2396_v0, %v992_v6 }
 0x150   : > { %994 = vst [vmem:[%s2566_s14] sm:$0xff] %v2849_v7 }
 0x151   : > { %999 = vst [vmem:[%s3220_s7] sm:$0xff] %v2849_v7 }
 0x152 PF: > { %1005 = vmatprep.subr.bf16.mxu0 %v2642_v25  ;;  %2154 = vmatprep.subr.bf16.mxu1 %v2494_v36  ;;  %v1004_v52 = vpack.c.bf16 %v2849_v7, %v2849_v7  ;;  %s1109_s15 = sadd.s32 1, %s2554_s28  ;;  %v1001_v20 = vld [vmem:[#allocation3 + $0x48] sm:$0xff]  ;;  %v1002_v19 = vld [vmem:[#allocation3 + $0x60] sm:$0xff] }
 0x153   : > { %1006 = vmatpush1.bf16.msra.mxu0 %v2650_v27  ;;  %2155 = vmatpush3.bf16.msra.mxu1 %v2690_v35  ;;  %v1003_v32 = vld [vmem:[#allocation3 + $0x28] sm:$0xff]  ;;  %p1998_p7 = scmp.ne.s32.totalorder %s1109_s15, 11 }
 0x154   : > { %1007 = vmatprep.subr.bf16.mxu0 %v2656_v28  ;;  %2156 = vmatprep.subr.bf16.mxu1 %v2494_v36 }
 0x155   : > { %1037 = vmatprep.mubr.bf16.mxu0 %v2493_v3  ;;  %2170 = vmatprep.mubr.msk.bf16.mxu1 %vm2495_vm0, %v2494_v36 }
 0x157   : > { %1008 = vmatpush1.bf16.msra.mxu0 %v2665_v30  ;;  %2157 = vmatpush3.bf16.msra.mxu1 %v2711_v40 }
 0x158   : > { %1009 = vmatprep.subr.bf16.mxu0 %v2672_v31  ;;  %2158 = vmatprep.subr.bf16.mxu1 %v2494_v36 }
 0x15b   : > { %1010 = vmatpush1.bf16.msra.mxu0 %v2679_v33  ;;  %2159 = vmatpush3.bf16.msra.mxu1 %v2730_v43 }
 0x15c   : > { %1011 = vmatprep.subr.bf16.mxu0 %v2685_v34  ;;  %2160 = vmatprep.subr.bf16.mxu1 %v2494_v36 }
 0x15f   : > { %1012 = vmatpush1.bf16.msra.mxu0 %v2697_v37  ;;  %2161 = vmatpush3.bf16.msra.mxu1 %v2751_v47 }
 0x160   : > { %1013 = vmatprep.subr.bf16.mxu0 %v2705_v39  ;;  %2162 = vmatprep.subr.bf16.mxu1 %v2494_v36 }
 0x163   : > { %1014 = vmatpush1.bf16.msra.mxu0 %v2718_v41  ;;  %2163 = vmatpush3.bf16.msra.mxu1 %v2772_v50 }
 0x164   : > { %1015 = vmatprep.subr.bf16.mxu0 %v2724_v42  ;;  %2164 = vmatprep.subr.bf16.mxu1 %v2494_v36 }
 0x167   : > { %1016 = vmatpush1.bf16.msra.mxu0 %v2738_v45  ;;  %2165 = vmatpush3.bf16.msra.mxu1 %v2789_v53 }
 0x168   : > { %1017 = vmatprep.subr.bf16.mxu0 %v2745_v46  ;;  %2166 = vmatprep.subr.bf16.mxu1 %v2494_v36 }
 0x16b   : > { %1018 = vmatpush1.bf16.msra.mxu0 %v2760_v48  ;;  %2167 = vmatpush3.bf16.msra.mxu1 %v2799_v55 }
 0x16c   : > { %1019 = vmatprep.subr.bf16.mxu0 %v2766_v49  ;;  %2168 = vmatprep.subr.bf16.mxu1 %v2494_v36 }
 0x16f   : > { %1020 = vmatpush1.bf16.msra.mxu0 %v2779_v51  ;;  %2169 = vmatpush3.bf16.msra.mxu1 %v2806_v56 }
 0x172   : > { %1038 = vmatmul.mubr.bf16.vlgmr.msra.gmra.mxu0 %v1004_v52  ;;  %2171 = vmatmul.mubr.bf16.vlgmr.msra.gmra.mxu1 %v1004_v52 }
 0x232   : > { %v1039_v8 = vpop.f32.mrf.mxu0  ;;  %v1080_v9 = vpop.f32.mrf.mxu1 }
 0x233   : > { %v1086_v11 = vadd.f32 %v1039_v8, %v1001_v20  ;;  %v1100_v24 = vadd.f32 %v2844_v63, %v1080_v9 }
 0x234   : > { %v1041_v12 = vpop.f32.mrf.mxu0  ;;  %v2172_v13 = vpop.f32.mrf.mxu1 }
 0x235   : > { %v1995_v14 = vmul.f32 -1.442695, %v1086_v11  ;;  %v1093_v21 = vadd.f32 %v1041_v12, %v1002_v19 }
 0x236   : > { %v1043_v15 = vpop.f32.mrf.mxu0  ;;  %v1083_v16 = vpop.f32.mrf.mxu1 }
 0x237   : > { %2399 = vpow2.f32 %v1995_v14  ;;  %v1996_v22 = vmul.f32 -1.442695, %v1093_v21 }
 0x238   : > { %v1044_v17 = vpop.f32.mrf.mxu0  ;;  %v2173_v18 = vpop.f32.mrf.mxu1 }
 0x239   : > { %2401 = vpow2.f32 %v1996_v22 }
 0x244   : > { %v2400_v23 = vpop.eup %2399 }
 0x245   : > { %v1090_v10 = vadd.f32 1.0, %v2400_v23 }
 0x246   : > { %v2402_v26 = vpop.eup %2401 }
 0x247   : > { %2403 = vrcp.f32 %v1090_v10  ;;  %v1097_v44 = vadd.f32 1.0, %v2402_v26 }
 0x254   : > { %v2404_v29 = vpop.eup %2403 }
 0x255   : > { %v1101_v38 = vmul.f32 %v2404_v29, %v1100_v24 }
 0x257   : > { %v1102_v62 = vadd.f32 %v1101_v38, %v1003_v32 }
 0x259   : > { %2405 = vtanh.f32 %v1102_v62 }
 0x25a   : > { %2407 = vrcp.f32 %v1097_v44 }
 0x266   : > { %v2406_v54 = vpop.eup %2405 }
 0x267   : > { %v1104_v57 = vsub.f32 %v2849_v7, %v2406_v54  ;;  %v2408_v1 = vpop.eup %2407 }
 0x269   : > { %v1105_v58 = vmul.f32 %v2408_v1, %v1104_v57  ;;  %1113 = sbr.rel (%p1998_p7) target bundleno = 623 (0x26f), region = 56 }
 0x26b   : > { %v2898_v59 = vadd.f32 %v2406_v54, %v1105_v58 }
 0x26d   : > { %1997 = vst [vmem:[%s2566_s14 + $0x8] sm:$0xff] %v2898_v59 }
 0x26e   : > { %1114 = vst [vmem:[%s3220_s7] sm:$0xff] %v2898_v59 }
 0x26f PF: > { %1120 = vmatprep.subr.bf16.mxu0 %v2642_v25  ;;  %2174 = vmatprep.subr.bf16.mxu1 %v2494_v36  ;;  %v1119_v60 = vpack.c.bf16 %v2898_v59, %v2898_v59  ;;  %s1224_s18 = sadd.s32 2, %s2554_s28  ;;  %v1116_v4 = vld [vmem:[#allocation3 + $0x40] sm:$0xff]  ;;  %v1117_v11 = vld [vmem:[#allocation3 + $0x78] sm:$0xff]  ;;  %v1118_v19 = vld [vmem:[#allocation3 + $0x88] sm:$0xff] }
 0x270   : > { %1121 = vmatpush1.bf16.msra.mxu0 %v2650_v27  ;;  %2175 = vmatpush3.bf16.msra.mxu1 %v2690_v35  ;;  %p2002_p8 = scmp.ne.s32.totalorder %s1224_s18, 11 }
 0x271   : > { %1122 = vmatprep.subr.bf16.mxu0 %v2656_v28  ;;  %2176 = vmatprep.subr.bf16.mxu1 %v2494_v36 }
 0x272   : > { %1152 = vmatprep.mubr.bf16.mxu0 %v2493_v3  ;;  %2190 = vmatprep.mubr.msk.bf16.mxu1 %vm2495_vm0, %v2494_v36 }
 0x274   : > { %1123 = vmatpush1.bf16.msra.mxu0 %v2665_v30  ;;  %2177 = vmatpush3.bf16.msra.mxu1 %v2711_v40 }
 0x275   : > { %1124 = vmatprep.subr.bf16.mxu0 %v2672_v31  ;;  %2178 = vmatprep.subr.bf16.mxu1 %v2494_v36 }
 0x278   : > { %1125 = vmatpush1.bf16.msra.mxu0 %v2679_v33  ;;  %2179 = vmatpush3.bf16.msra.mxu1 %v2730_v43 }
 0x279   : > { %1126 = vmatprep.subr.bf16.mxu0 %v2685_v34  ;;  %2180 = vmatprep.subr.bf16.mxu1 %v2494_v36 }
 0x27c   : > { %1127 = vmatpush1.bf16.msra.mxu0 %v2697_v37  ;;  %2181 = vmatpush3.bf16.msra.mxu1 %v2751_v47 }
 0x27d   : > { %1128 = vmatprep.subr.bf16.mxu0 %v2705_v39  ;;  %2182 = vmatprep.subr.bf16.mxu1 %v2494_v36 }
 0x280   : > { %1129 = vmatpush1.bf16.msra.mxu0 %v2718_v41  ;;  %2183 = vmatpush3.bf16.msra.mxu1 %v2772_v50 }
 0x281   : > { %1130 = vmatprep.subr.bf16.mxu0 %v2724_v42  ;;  %2184 = vmatprep.subr.bf16.mxu1 %v2494_v36 }
 0x284   : > { %1131 = vmatpush1.bf16.msra.mxu0 %v2738_v45  ;;  %2185 = vmatpush3.bf16.msra.mxu1 %v2789_v53 }
 0x285   : > { %1132 = vmatprep.subr.bf16.mxu0 %v2745_v46  ;;  %2186 = vmatprep.subr.bf16.mxu1 %v2494_v36 }
 0x288   : > { %1133 = vmatpush1.bf16.msra.mxu0 %v2760_v48  ;;  %2187 = vmatpush3.bf16.msra.mxu1 %v2799_v55 }
 0x289   : > { %1134 = vmatprep.subr.bf16.mxu0 %v2766_v49  ;;  %2188 = vmatprep.subr.bf16.mxu1 %v2494_v36 }
 0x28c   : > { %1135 = vmatpush1.bf16.msra.mxu0 %v2779_v51  ;;  %2189 = vmatpush3.bf16.msra.mxu1 %v2806_v56 }
 0x28f   : > { %1153 = vmatmul.mubr.bf16.vlgmr.msra.gmra.mxu0 %v1119_v60  ;;  %2191 = vmatmul.mubr.bf16.vlgmr.msra.gmra.mxu1 %v1119_v60 }
 0x34f   : > { %v1154_v61 = vpop.f32.mrf.mxu0  ;;  %v1195_v0 = vpop.f32.mrf.mxu1 }
 0x350   : > { %v1201_v2 = vadd.f32 %v1154_v61, %v1116_v4  ;;  %v1215_v16 = vadd.f32 %v2844_v63, %v1195_v0 }
 0x351   : > { %v1156_v5 = vpop.f32.mrf.mxu0  ;;  %v2192_v6 = vpop.f32.mrf.mxu1 }
 0x352   : > { %v1999_v7 = vmul.f32 -1.442695, %v1201_v2  ;;  %v1208_v12 = vadd.f32 %v1156_v5, %v1117_v11 }
 0x353   : > { %v1158_v52 = vpop.f32.mrf.mxu0  ;;  %v1198_v20 = vpop.f32.mrf.mxu1 }
 0x354   : > { %2409 = vpow2.f32 %v1999_v7  ;;  %v2000_v13 = vmul.f32 -1.442695, %v1208_v12 }
 0x355   : > { %v1159_v8 = vpop.f32.mrf.mxu0  ;;  %v2193_v9 = vpop.f32.mrf.mxu1 }
 0x356   : > { %2411 = vpow2.f32 %v2000_v13 }
 0x361   : > { %v2410_v14 = vpop.eup %2409 }
 0x362   : > { %v1205_v15 = vadd.f32 1.0, %v2410_v14 }
 0x363   : > { %v2412_v17 = vpop.eup %2411 }
 0x364   : > { %2413 = vrcp.f32 %v1205_v15  ;;  %v1212_v22 = vadd.f32 1.0, %v2412_v17 }
 0x371   : > { %v2414_v18 = vpop.eup %2413 }
 0x372   : > { %v1216_v21 = vmul.f32 %v2414_v18, %v1215_v16 }
 0x374   : > { %v1217_v23 = vadd.f32 %v1216_v21, %v1118_v19 }
 0x376   : > { %2415 = vtanh.f32 %v1217_v23 }
 0x377   : > { %2417 = vrcp.f32 %v1212_v22 }
 0x383   : > { %v2416_v10 = vpop.eup %2415 }
 0x384   : > { %v1219_v24 = vsub.f32 %v2898_v59, %v2416_v10  ;;  %v2418_v26 = vpop.eup %2417 }
 0x386   : > { %v1220_v29 = vmul.f32 %v2418_v26, %v1219_v24  ;;  %1228 = sbr.rel (%p2002_p8) target bundleno = 908 (0x38c), region = 60 }
 0x388   : > { %v2948_v32 = vadd.f32 %v2416_v10, %v1220_v29 }
 0x38a   : > { %2001 = vst [vmem:[%s2566_s14 + $0x10] sm:$0xff] %v2948_v32 }
 0x38b   : > { %1229 = vst [vmem:[%s3220_s7] sm:$0xff] %v2948_v32 }
 0x38c PF: > { %1235 = vmatprep.subr.bf16.mxu0 %v2642_v25  ;;  %2194 = vmatprep.subr.bf16.mxu1 %v2494_v36  ;;  %v1234_v38 = vpack.c.bf16 %v2948_v32, %v2948_v32  ;;  %s1339_s21 = sadd.s32 3, %s2554_s28  ;;  %v1231_v44 = vld [vmem:[#allocation3 + $0x90] sm:$0xff]  ;;  %v1232_v2 = vld [vmem:[#allocation3 + $0x18] sm:$0xff] }
 0x38d   : > { %1236 = vmatpush1.bf16.msra.mxu0 %v2650_v27  ;;  %2195 = vmatpush3.bf16.msra.mxu1 %v2690_v35  ;;  %v1233_v11 = vld [vmem:[#allocation3 + $0x98] sm:$0xff]  ;;  %p2006_p9 = scmp.ne.s32.totalorder %s1339_s21, 11 }
 0x38e   : > { %1237 = vmatprep.subr.bf16.mxu0 %v2656_v28  ;;  %2196 = vmatprep.subr.bf16.mxu1 %v2494_v36 }
 0x38f   : > { %1267 = vmatprep.mubr.bf16.mxu0 %v2493_v3  ;;  %2210 = vmatprep.mubr.msk.bf16.mxu1 %vm2495_vm0, %v2494_v36 }
 0x391   : > { %1238 = vmatpush1.bf16.msra.mxu0 %v2665_v30  ;;  %2197 = vmatpush3.bf16.msra.mxu1 %v2711_v40 }
 0x392   : > { %1239 = vmatprep.subr.bf16.mxu0 %v2672_v31  ;;  %2198 = vmatprep.subr.bf16.mxu1 %v2494_v36 }
 0x395   : > { %1240 = vmatpush1.bf16.msra.mxu0 %v2679_v33  ;;  %2199 = vmatpush3.bf16.msra.mxu1 %v2730_v43 }
 0x396   : > { %1241 = vmatprep.subr.bf16.mxu0 %v2685_v34  ;;  %2200 = vmatprep.subr.bf16.mxu1 %v2494_v36 }
 0x399   : > { %1242 = vmatpush1.bf16.msra.mxu0 %v2697_v37  ;;  %2201 = vmatpush3.bf16.msra.mxu1 %v2751_v47 }
 0x39a   : > { %1243 = vmatprep.subr.bf16.mxu0 %v2705_v39  ;;  %2202 = vmatprep.subr.bf16.mxu1 %v2494_v36 }
 0x39d   : > { %1244 = vmatpush1.bf16.msra.mxu0 %v2718_v41  ;;  %2203 = vmatpush3.bf16.msra.mxu1 %v2772_v50 }
 0x39e   : > { %1245 = vmatprep.subr.bf16.mxu0 %v2724_v42  ;;  %2204 = vmatprep.subr.bf16.mxu1 %v2494_v36 }
 0x3a1   : > { %1246 = vmatpush1.bf16.msra.mxu0 %v2738_v45  ;;  %2205 = vmatpush3.bf16.msra.mxu1 %v2789_v53 }
 0x3a2   : > { %1247 = vmatprep.subr.bf16.mxu0 %v2745_v46  ;;  %2206 = vmatprep.subr.bf16.mxu1 %v2494_v36 }
 0x3a5   : > { %1248 = vmatpush1.bf16.msra.mxu0 %v2760_v48  ;;  %2207 = vmatpush3.bf16.msra.mxu1 %v2799_v55 }
 0x3a6   : > { %1249 = vmatprep.subr.bf16.mxu0 %v2766_v49  ;;  %2208 = vmatprep.subr.bf16.mxu1 %v2494_v36 }
 0x3a9   : > { %1250 = vmatpush1.bf16.msra.mxu0 %v2779_v51  ;;  %2209 = vmatpush3.bf16.msra.mxu1 %v2806_v56 }
 0x3ac   : > { %1268 = vmatmul.mubr.bf16.vlgmr.msra.gmra.mxu0 %v1234_v38  ;;  %2211 = vmatmul.mubr.bf16.vlgmr.msra.gmra.mxu1 %v1234_v38 }
 0x46c   : > { %v1269_v62 = vpop.f32.mrf.mxu0  ;;  %v1310_v54 = vpop.f32.mrf.mxu1 }
 0x46d   : > { %v1316_v57 = vadd.f32 %v1269_v62, %v1231_v44  ;;  %v1330_v20 = vadd.f32 %v2844_v63, %v1310_v54 }
 0x46e   : > { %v1271_v1 = vpop.f32.mrf.mxu0  ;;  %v2212_v58 = vpop.f32.mrf.mxu1 }
 0x46f   : > { %v2003_v59 = vmul.f32 -1.442695, %v1316_v57  ;;  %v1323_v5 = vadd.f32 %v1271_v1, %v1232_v2 }
 0x470   : > { %v1273_v60 = vpop.f32.mrf.mxu0  ;;  %v1313_v4 = vpop.f32.mrf.mxu1 }
 0x471   : > { %2419 = vpow2.f32 %v2003_v59  ;;  %v2004_v6 = vmul.f32 -1.442695, %v1323_v5 }
 0x472   : > { %v1274_v61 = vpop.f32.mrf.mxu0  ;;  %v2213_v0 = vpop.f32.mrf.mxu1 }
 0x473   : > { %2421 = vpow2.f32 %v2004_v6 }
 0x47e   : > { %v2420_v7 = vpop.eup %2419 }
 0x47f   : > { %v1320_v52 = vadd.f32 1.0, %v2420_v7 }
 0x480   : > { %v2422_v8 = vpop.eup %2421 }
 0x481   : > { %2423 = vrcp.f32 %v1320_v52  ;;  %v1327_v13 = vadd.f32 1.0, %v2422_v8 }
 0x48e   : > { %v2424_v9 = vpop.eup %2423 }
 0x48f   : > { %v1331_v12 = vmul.f32 %v2424_v9, %v1330_v20 }
 0x491   : > { %v1332_v14 = vadd.f32 %v1331_v12, %v1233_v11 }
 0x493   : > { %2425 = vtanh.f32 %v1332_v14 }
 0x494   : > { %2427 = vrcp.f32 %v1327_v13 }
 0x4a0   : > { %v2426_v15 = vpop.eup %2425 }
 0x4a1   : > { %v1334_v16 = vsub.f32 %v2948_v32, %v2426_v15  ;;  %v2428_v17 = vpop.eup %2427 }
 0x4a3   : > { %v1335_v18 = vmul.f32 %v2428_v17, %v1334_v16  ;;  %1343 = sbr.rel (%p2006_p9) target bundleno = 1193 (0x4a9), region = 64 }
 0x4a5   : > { %v2998_v19 = vadd.f32 %v2426_v15, %v1335_v18 }
 0x4a7   : > { %2005 = vst [vmem:[%s2566_s14 + $0x18] sm:$0xff] %v2998_v19 }
 0x4a8   : > { %1344 = vst [vmem:[%s3220_s7] sm:$0xff] %v2998_v19 }
 0x4a9 PF: > { %1350 = vmatprep.subr.bf16.mxu0 %v2642_v25  ;;  %2214 = vmatprep.subr.bf16.mxu1 %v2494_v36  ;;  %v1349_v21 = vpack.c.bf16 %v2998_v19, %v2998_v19  ;;  %s1454_s24 = sadd.s32 4, %s2554_s28  ;;  %v1346_v22 = vld [vmem:[#allocation3 + $0x38] sm:$0xff]  ;;  %v1347_v57 = vld [vmem:[#allocation3 + $0x50] sm:$0xff] }
 0x4aa   : > { %1351 = vmatpush1.bf16.msra.mxu0 %v2650_v27  ;;  %2215 = vmatpush3.bf16.msra.mxu1 %v2690_v35  ;;  %v1348_v2 = vld [vmem:[#allocation3 + $0x70] sm:$0xff]  ;;  %p2010_p10 = scmp.ne.s32.totalorder %s1454_s24, 11 }
 0x4ab   : > { %1352 = vmatprep.subr.bf16.mxu0 %v2656_v28  ;;  %2216 = vmatprep.subr.bf16.mxu1 %v2494_v36 }
 0x4ac   : > { %1382 = vmatprep.mubr.bf16.mxu0 %v2493_v3  ;;  %2230 = vmatprep.mubr.msk.bf16.mxu1 %vm2495_vm0, %v2494_v36 }
 0x4ae   : > { %1353 = vmatpush1.bf16.msra.mxu0 %v2665_v30  ;;  %2217 = vmatpush3.bf16.msra.mxu1 %v2711_v40 }
 0x4af   : > { %1354 = vmatprep.subr.bf16.mxu0 %v2672_v31  ;;  %2218 = vmatprep.subr.bf16.mxu1 %v2494_v36 }
 0x4b2   : > { %1355 = vmatpush1.bf16.msra.mxu0 %v2679_v33  ;;  %2219 = vmatpush3.bf16.msra.mxu1 %v2730_v43 }
 0x4b3   : > { %1356 = vmatprep.subr.bf16.mxu0 %v2685_v34  ;;  %2220 = vmatprep.subr.bf16.mxu1 %v2494_v36 }
 0x4b6   : > { %1357 = vmatpush1.bf16.msra.mxu0 %v2697_v37  ;;  %2221 = vmatpush3.bf16.msra.mxu1 %v2751_v47 }
 0x4b7   : > { %1358 = vmatprep.subr.bf16.mxu0 %v2705_v39  ;;  %2222 = vmatprep.subr.bf16.mxu1 %v2494_v36 }
 0x4ba   : > { %1359 = vmatpush1.bf16.msra.mxu0 %v2718_v41  ;;  %2223 = vmatpush3.bf16.msra.mxu1 %v2772_v50 }
 0x4bb   : > { %1360 = vmatprep.subr.bf16.mxu0 %v2724_v42  ;;  %2224 = vmatprep.subr.bf16.mxu1 %v2494_v36 }
 0x4be   : > { %1361 = vmatpush1.bf16.msra.mxu0 %v2738_v45  ;;  %2225 = vmatpush3.bf16.msra.mxu1 %v2789_v53 }
 0x4bf   : > { %1362 = vmatprep.subr.bf16.mxu0 %v2745_v46  ;;  %2226 = vmatprep.subr.bf16.mxu1 %v2494_v36 }
 0x4c2   : > { %1363 = vmatpush1.bf16.msra.mxu0 %v2760_v48  ;;  %2227 = vmatpush3.bf16.msra.mxu1 %v2799_v55 }
 0x4c3   : > { %1364 = vmatprep.subr.bf16.mxu0 %v2766_v49  ;;  %2228 = vmatprep.subr.bf16.mxu1 %v2494_v36 }
 0x4c6   : > { %1365 = vmatpush1.bf16.msra.mxu0 %v2779_v51  ;;  %2229 = vmatpush3.bf16.msra.mxu1 %v2806_v56 }
 0x4c9   : > { %1383 = vmatmul.mubr.bf16.vlgmr.msra.gmra.mxu0 %v1349_v21  ;;  %2231 = vmatmul.mubr.bf16.vlgmr.msra.gmra.mxu1 %v1349_v21 }
 0x589   : > { %v1384_v23 = vpop.f32.mrf.mxu0  ;;  %v1425_v10 = vpop.f32.mrf.mxu1 }
 0x58a   : > { %v1431_v24 = vadd.f32 %v1384_v23, %v1346_v22  ;;  %v1445_v4 = vadd.f32 %v2844_v63, %v1425_v10 }
 0x58b   : > { %v1386_v26 = vpop.f32.mrf.mxu0  ;;  %v2232_v29 = vpop.f32.mrf.mxu1 }
 0x58c   : > { %v2007_v32 = vmul.f32 -1.442695, %v1431_v24  ;;  %v1438_v1 = vadd.f32 %v1386_v26, %v1347_v57 }
 0x58d   : > { %v1388_v38 = vpop.f32.mrf.mxu0  ;;  %v1428_v44 = vpop.f32.mrf.mxu1 }
 0x58e   : > { %2429 = vpow2.f32 %v2007_v32  ;;  %v2008_v58 = vmul.f32 -1.442695, %v1438_v1 }
 0x58f   : > { %v1389_v62 = vpop.f32.mrf.mxu0  ;;  %v2233_v54 = vpop.f32.mrf.mxu1 }
 0x590   : > { %2431 = vpow2.f32 %v2008_v58 }
 0x59b   : > { %v2430_v59 = vpop.eup %2429 }
 0x59c   : > { %v1435_v60 = vadd.f32 1.0, %v2430_v59 }
 0x59d   : > { %v2432_v61 = vpop.eup %2431 }
 0x59e   : > { %2433 = vrcp.f32 %v1435_v60  ;;  %v1442_v6 = vadd.f32 1.0, %v2432_v61 }
 0x5ab   : > { %v2434_v0 = vpop.eup %2433 }
 0x5ac   : > { %v1446_v5 = vmul.f32 %v2434_v0, %v1445_v4 }
 0x5ae   : > { %v1447_v7 = vadd.f32 %v1446_v5, %v1348_v2 }
 0x5b0   : > { %2435 = vtanh.f32 %v1447_v7 }
 0x5b1   : > { %2437 = vrcp.f32 %v1442_v6 }
 0x5bd   : > { %v2436_v52 = vpop.eup %2435 }
 0x5be   : > { %v1449_v20 = vsub.f32 %v2998_v19, %v2436_v52  ;;  %v2438_v8 = vpop.eup %2437 }
 0x5c0   : > { %v1450_v9 = vmul.f32 %v2438_v8, %v1449_v20  ;;  %1458 = sbr.rel (%p2010_p10) target bundleno = 1478 (0x5c6), region = 68 }
 0x5c2   : > { %v3048_v11 = vadd.f32 %v2436_v52, %v1450_v9 }
 0x5c4   : > { %2009 = vst [vmem:[%s2566_s14 + $0x20] sm:$0xff] %v3048_v11 }
 0x5c5   : > { %1459 = vst [vmem:[%s3220_s7] sm:$0xff] %v3048_v11 }
 0x5c6 PF: > { %1465 = vmatprep.subr.bf16.mxu0 %v2642_v25  ;;  %2234 = vmatprep.subr.bf16.mxu1 %v2494_v36  ;;  %v1464_v12 = vpack.c.bf16 %v3048_v11, %v3048_v11  ;;  %s1569_s8 = sadd.s32 5, %s2554_s28  ;;  %v1461_v13 = vld [vmem:[#allocation3 + $0xa0] sm:$0xff]  ;;  %v1462_v24 = vld [vmem:[#allocation3 + $0xa8] sm:$0xff] }
 0x5c7   : > { %1466 = vmatpush1.bf16.msra.mxu0 %v2650_v27  ;;  %2235 = vmatpush3.bf16.msra.mxu1 %v2690_v35  ;;  %v1463_v57 = vld [vmem:[#allocation3 + $0x68] sm:$0xff]  ;;  %p2014_p11 = scmp.ne.s32.totalorder %s1569_s8, 11 }
 0x5c8   : > { %1467 = vmatprep.subr.bf16.mxu0 %v2656_v28  ;;  %2236 = vmatprep.subr.bf16.mxu1 %v2494_v36 }
 0x5c9   : > { %1497 = vmatprep.mubr.bf16.mxu0 %v2493_v3  ;;  %2250 = vmatprep.mubr.msk.bf16.mxu1 %vm2495_vm0, %v2494_v36 }
 0x5cb   : > { %1468 = vmatpush1.bf16.msra.mxu0 %v2665_v30  ;;  %2237 = vmatpush3.bf16.msra.mxu1 %v2711_v40 }
 0x5cc   : > { %1469 = vmatprep.subr.bf16.mxu0 %v2672_v31  ;;  %2238 = vmatprep.subr.bf16.mxu1 %v2494_v36 }
 0x5cf   : > { %1470 = vmatpush1.bf16.msra.mxu0 %v2679_v33  ;;  %2239 = vmatpush3.bf16.msra.mxu1 %v2730_v43 }
 0x5d0   : > { %1471 = vmatprep.subr.bf16.mxu0 %v2685_v34  ;;  %2240 = vmatprep.subr.bf16.mxu1 %v2494_v36 }
 0x5d3   : > { %1472 = vmatpush1.bf16.msra.mxu0 %v2697_v37  ;;  %2241 = vmatpush3.bf16.msra.mxu1 %v2751_v47 }
 0x5d4   : > { %1473 = vmatprep.subr.bf16.mxu0 %v2705_v39  ;;  %2242 = vmatprep.subr.bf16.mxu1 %v2494_v36 }
 0x5d7   : > { %1474 = vmatpush1.bf16.msra.mxu0 %v2718_v41  ;;  %2243 = vmatpush3.bf16.msra.mxu1 %v2772_v50 }
 0x5d8   : > { %1475 = vmatprep.subr.bf16.mxu0 %v2724_v42  ;;  %2244 = vmatprep.subr.bf16.mxu1 %v2494_v36 }
 0x5db   : > { %1476 = vmatpush1.bf16.msra.mxu0 %v2738_v45  ;;  %2245 = vmatpush3.bf16.msra.mxu1 %v2789_v53 }
 0x5dc   : > { %1477 = vmatprep.subr.bf16.mxu0 %v2745_v46  ;;  %2246 = vmatprep.subr.bf16.mxu1 %v2494_v36 }
 0x5df   : > { %1478 = vmatpush1.bf16.msra.mxu0 %v2760_v48  ;;  %2247 = vmatpush3.bf16.msra.mxu1 %v2799_v55 }
 0x5e0   : > { %1479 = vmatprep.subr.bf16.mxu0 %v2766_v49  ;;  %2248 = vmatprep.subr.bf16.mxu1 %v2494_v36 }
 0x5e3   : > { %1480 = vmatpush1.bf16.msra.mxu0 %v2779_v51  ;;  %2249 = vmatpush3.bf16.msra.mxu1 %v2806_v56 }
 0x5e6   : > { %1498 = vmatmul.mubr.bf16.vlgmr.msra.gmra.mxu0 %v1464_v12  ;;  %2251 = vmatmul.mubr.bf16.vlgmr.msra.gmra.mxu1 %v1464_v12 }
 0x6a6   : > { %v1499_v14 = vpop.f32.mrf.mxu0  ;;  %v1540_v15 = vpop.f32.mrf.mxu1 }
 0x6a7   : > { %v1546_v16 = vadd.f32 %v1499_v14, %v1461_v13  ;;  %v1560_v44 = vadd.f32 %v2844_v63, %v1540_v15 }
 0x6a8   : > { %v1501_v17 = vpop.f32.mrf.mxu0  ;;  %v2252_v18 = vpop.f32.mrf.mxu1 }
 0x6a9   : > { %v2011_v19 = vmul.f32 -1.442695, %v1546_v16  ;;  %v1553_v26 = vadd.f32 %v1501_v17, %v1462_v24 }
 0x6aa   : > { %v1503_v21 = vpop.f32.mrf.mxu0  ;;  %v1543_v22 = vpop.f32.mrf.mxu1 }
 0x6ab   : > { %2439 = vpow2.f32 %v2011_v19  ;;  %v2012_v29 = vmul.f32 -1.442695, %v1553_v26 }
 0x6ac   : > { %v1504_v23 = vpop.f32.mrf.mxu0  ;;  %v2253_v10 = vpop.f32.mrf.mxu1 }
 0x6ad   : > { %2441 = vpow2.f32 %v2012_v29 }
 0x6b8   : > { %v2440_v32 = vpop.eup %2439 }
 0x6b9   : > { %v1550_v38 = vadd.f32 1.0, %v2440_v32 }
 0x6ba   : > { %v2442_v62 = vpop.eup %2441 }
 0x6bb   : > { %2443 = vrcp.f32 %v1550_v38  ;;  %v1557_v58 = vadd.f32 1.0, %v2442_v62 }
 0x6c8   : > { %v2444_v54 = vpop.eup %2443 }
 0x6c9   : > { %v1561_v1 = vmul.f32 %v2444_v54, %v1560_v44 }
 0x6cb   : > { %v1562_v59 = vadd.f32 %v1561_v1, %v1463_v57 }
 0x6cd   : > { %2445 = vtanh.f32 %v1562_v59 }
 0x6ce   : > { %2447 = vrcp.f32 %v1557_v58 }
 0x6da   : > { %v2446_v60 = vpop.eup %2445 }
 0x6db   : > { %v1564_v4 = vsub.f32 %v3048_v11, %v2446_v60  ;;  %v2448_v61 = vpop.eup %2447 }
 0x6dd   : > { %v1565_v0 = vmul.f32 %v2448_v61, %v1564_v4  ;;  %1573 = sbr.rel (%p2014_p11) target bundleno = 1763 (0x6e3), region = 72 }
 0x6df   : > { %v3098_v2 = vadd.f32 %v2446_v60, %v1565_v0 }
 0x6e1   : > { %2013 = vst [vmem:[%s2566_s14 + $0x28] sm:$0xff] %v3098_v2 }
 0x6e2   : > { %1574 = vst [vmem:[%s3220_s7] sm:$0xff] %v3098_v2 }
 0x6e3 PF: > { %1580 = vmatprep.subr.bf16.mxu0 %v2642_v25  ;;  %2254 = vmatprep.subr.bf16.mxu1 %v2494_v36  ;;  %v1579_v5 = vpack.c.bf16 %v3098_v2, %v3098_v2  ;;  %s1684_s10 = sadd.s32 6, %s2554_s28  ;;  %v1576_v6 = vld [vmem:[#allocation3 + $0x30] sm:$0xff]  ;;  %v1577_v16 = vld [vmem:[#allocation3 + $0x58] sm:$0xff]  ;;  %v1578_v24 = vld [vmem:[#allocation3 + $0x80] sm:$0xff] }
 0x6e4   : > { %1581 = vmatpush1.bf16.msra.mxu0 %v2650_v27  ;;  %2255 = vmatpush3.bf16.msra.mxu1 %v2690_v35  ;;  %p2018_p12 = scmp.ne.s32.totalorder %s1684_s10, 11 }
 0x6e5   : > { %1582 = vmatprep.subr.bf16.mxu0 %v2656_v28  ;;  %2256 = vmatprep.subr.bf16.mxu1 %v2494_v36 }
 0x6e6   : > { %1612 = vmatprep.mubr.bf16.mxu0 %v2493_v3  ;;  %2270 = vmatprep.mubr.msk.bf16.mxu1 %vm2495_vm0, %v2494_v36 }
 0x6e8   : > { %1583 = vmatpush1.bf16.msra.mxu0 %v2665_v30  ;;  %2257 = vmatpush3.bf16.msra.mxu1 %v2711_v40 }
 0x6e9   : > { %1584 = vmatprep.subr.bf16.mxu0 %v2672_v31  ;;  %2258 = vmatprep.subr.bf16.mxu1 %v2494_v36 }
 0x6ec   : > { %1585 = vmatpush1.bf16.msra.mxu0 %v2679_v33  ;;  %2259 = vmatpush3.bf16.msra.mxu1 %v2730_v43 }
 0x6ed   : > { %1586 = vmatprep.subr.bf16.mxu0 %v2685_v34  ;;  %2260 = vmatprep.subr.bf16.mxu1 %v2494_v36 }
 0x6f0   : > { %1587 = vmatpush1.bf16.msra.mxu0 %v2697_v37  ;;  %2261 = vmatpush3.bf16.msra.mxu1 %v2751_v47 }
 0x6f1   : > { %1588 = vmatprep.subr.bf16.mxu0 %v2705_v39  ;;  %2262 = vmatprep.subr.bf16.mxu1 %v2494_v36 }
 0x6f4   : > { %1589 = vmatpush1.bf16.msra.mxu0 %v2718_v41  ;;  %2263 = vmatpush3.bf16.msra.mxu1 %v2772_v50 }
 0x6f5   : > { %1590 = vmatprep.subr.bf16.mxu0 %v2724_v42  ;;  %2264 = vmatprep.subr.bf16.mxu1 %v2494_v36 }
 0x6f8   : > { %1591 = vmatpush1.bf16.msra.mxu0 %v2738_v45  ;;  %2265 = vmatpush3.bf16.msra.mxu1 %v2789_v53 }
 0x6f9   : > { %1592 = vmatprep.subr.bf16.mxu0 %v2745_v46  ;;  %2266 = vmatprep.subr.bf16.mxu1 %v2494_v36 }
 0x6fc   : > { %1593 = vmatpush1.bf16.msra.mxu0 %v2760_v48  ;;  %2267 = vmatpush3.bf16.msra.mxu1 %v2799_v55 }
 0x6fd   : > { %1594 = vmatprep.subr.bf16.mxu0 %v2766_v49  ;;  %2268 = vmatprep.subr.bf16.mxu1 %v2494_v36 }
 0x700   : > { %1595 = vmatpush1.bf16.msra.mxu0 %v2779_v51  ;;  %2269 = vmatpush3.bf16.msra.mxu1 %v2806_v56 }
 0x703   : > { %1613 = vmatmul.mubr.bf16.vlgmr.msra.gmra.mxu0 %v1579_v5  ;;  %2271 = vmatmul.mubr.bf16.vlgmr.msra.gmra.mxu1 %v1579_v5 }
 0x7c3   : > { %v1614_v7 = vpop.f32.mrf.mxu0  ;;  %v1655_v52 = vpop.f32.mrf.mxu1 }
 0x7c4   : > { %v1661_v20 = vadd.f32 %v1614_v7, %v1576_v6  ;;  %v1675_v22 = vadd.f32 %v2844_v63, %v1655_v52 }
 0x7c5   : > { %v1616_v8 = vpop.f32.mrf.mxu0  ;;  %v2272_v9 = vpop.f32.mrf.mxu1 }
 0x7c6   : > { %v2015_v11 = vmul.f32 -1.442695, %v1661_v20  ;;  %v1668_v17 = vadd.f32 %v1616_v8, %v1577_v16 }
 0x7c7   : > { %v1618_v12 = vpop.f32.mrf.mxu0  ;;  %v1658_v13 = vpop.f32.mrf.mxu1 }
 0x7c8   : > { %2449 = vpow2.f32 %v2015_v11  ;;  %v2016_v18 = vmul.f32 -1.442695, %v1668_v17 }
 0x7c9   : > { %v1619_v14 = vpop.f32.mrf.mxu0  ;;  %v2273_v15 = vpop.f32.mrf.mxu1 }
 0x7ca   : > { %2451 = vpow2.f32 %v2016_v18 }
 0x7d5   : > { %v2450_v19 = vpop.eup %2449 }
 0x7d6   : > { %v1665_v21 = vadd.f32 1.0, %v2450_v19 }
 0x7d7   : > { %v2452_v23 = vpop.eup %2451 }
 0x7d8   : > { %2453 = vrcp.f32 %v1665_v21  ;;  %v1672_v29 = vadd.f32 1.0, %v2452_v23 }
 0x7e5   : > { %v2454_v10 = vpop.eup %2453 }
 0x7e6   : > { %v1676_v26 = vmul.f32 %v2454_v10, %v1675_v22 }
 0x7e8   : > { %v1677_v32 = vadd.f32 %v1676_v26, %v1578_v24 }
 0x7ea   : > { %2455 = vtanh.f32 %v1677_v32 }
 0x7eb   : > { %2457 = vrcp.f32 %v1672_v29 }
 0x7f7   : > { %v2456_v38 = vpop.eup %2455 }
 0x7f8   : > { %v1679_v44 = vsub.f32 %v3098_v2, %v2456_v38  ;;  %v2458_v62 = vpop.eup %2457 }
 0x7fa   : > { %v1680_v54 = vmul.f32 %v2458_v62, %v1679_v44  ;;  %1688 = sbr.rel (%p2018_p12) target bundleno = 2048 (0x800), region = 76 }
 0x7fc   : > { %v3148_v57 = vadd.f32 %v2456_v38, %v1680_v54 }
 0x7fe   : > { %2017 = vst [vmem:[%s2566_s14 + $0x30] sm:$0xff] %v3148_v57 }
 0x7ff   : > { %1689 = vst [vmem:[%s3220_s7] sm:$0xff] %v3148_v57 }
 0x800 PF: > { %1695 = vmatprep.subr.bf16.mxu0 %v2642_v25  ;;  %2274 = vmatprep.subr.bf16.mxu1 %v2494_v36  ;;  %s1799_s15 = sadd.s32 7, %s2554_s28  ;;  %v1691_v25 = vld [vmem:[#allocation3 + $0xb8] sm:$0xff] }
 0x801   : > { %1696 = vmatpush1.bf16.msra.mxu0 %v2650_v27  ;;  %2275 = vmatpush3.bf16.msra.mxu1 %v2690_v35  ;;  %p2022_p13 = scmp.ne.s32.totalorder %s1799_s15, 11 }
 0x802   : > { %1697 = vmatprep.subr.bf16.mxu0 %v2656_v28  ;;  %2276 = vmatprep.subr.bf16.mxu1 %v2494_v36 }
 0x803   : > { %1727 = vmatprep.mubr.bf16.mxu0 %v2493_v3  ;;  %2290 = vmatprep.mubr.msk.bf16.mxu1 %vm2495_vm0, %v2494_v36  ;;  %v1694_v3 = vpack.c.bf16 %v3148_v57, %v3148_v57 }
 0x805   : > { %1698 = vmatpush1.bf16.msra.mxu0 %v2665_v30  ;;  %2277 = vmatpush3.bf16.msra.mxu1 %v2711_v40  ;;  %v1692_v40 = vld [vmem:[#allocation3 + $0x20] sm:$0xff] }
 0x806   : > { %1699 = vmatprep.subr.bf16.mxu0 %v2672_v31  ;;  %2278 = vmatprep.subr.bf16.mxu1 %v2494_v36 }
 0x809   : > { %1700 = vmatpush1.bf16.msra.mxu0 %v2679_v33  ;;  %2279 = vmatpush3.bf16.msra.mxu1 %v2730_v43 }
 0x80a   : > { %1701 = vmatprep.subr.bf16.mxu0 %v2685_v34  ;;  %2280 = vmatprep.subr.bf16.mxu1 %v2494_v36 }
 0x80d   : > { %1702 = vmatpush1.bf16.msra.mxu0 %v2697_v37  ;;  %2281 = vmatpush3.bf16.msra.mxu1 %v2751_v47 }
 0x80e   : > { %1703 = vmatprep.subr.bf16.mxu0 %v2705_v39  ;;  %2282 = vmatprep.subr.bf16.mxu1 %v2494_v36 }
 0x811   : > { %1704 = vmatpush1.bf16.msra.mxu0 %v2718_v41  ;;  %2283 = vmatpush3.bf16.msra.mxu1 %v2772_v50 }
 0x812   : > { %1705 = vmatprep.subr.bf16.mxu0 %v2724_v42  ;;  %2284 = vmatprep.subr.bf16.mxu1 %v2494_v36 }
 0x815   : > { %1706 = vmatpush1.bf16.msra.mxu0 %v2738_v45  ;;  %2285 = vmatpush3.bf16.msra.mxu1 %v2789_v53 }
 0x816   : > { %1707 = vmatprep.subr.bf16.mxu0 %v2745_v46  ;;  %2286 = vmatprep.subr.bf16.mxu1 %v2494_v36 }
 0x819   : > { %1708 = vmatpush1.bf16.msra.mxu0 %v2760_v48  ;;  %2287 = vmatpush3.bf16.msra.mxu1 %v2799_v55 }
 0x81a   : > { %1709 = vmatprep.subr.bf16.mxu0 %v2766_v49  ;;  %2288 = vmatprep.subr.bf16.mxu1 %v2494_v36  ;;  %v1693_v49 = vld [vmem:[#allocation3 + $0x8] sm:$0xff] }
 0x81d   : > { %1710 = vmatpush1.bf16.msra.mxu0 %v2779_v51  ;;  %2289 = vmatpush3.bf16.msra.mxu1 %v2806_v56 }
 0x820   : > { %1728 = vmatmul.mubr.bf16.vlgmr.msra.gmra.mxu0 %v1694_v3  ;;  %2291 = vmatmul.mubr.bf16.vlgmr.msra.gmra.mxu1 %v1694_v3 }
 0x8e0   : > { %v1729_v27 = vpop.f32.mrf.mxu0  ;;  %v1770_v28 = vpop.f32.mrf.mxu1 }
 0x8e1   : > { %v1776_v30 = vadd.f32 %v1729_v27, %v1691_v25  ;;  %v1790_v46 = vadd.f32 %v2844_v63, %v1770_v28 }
 0x8e2   : > { %v1731_v31 = vpop.f32.mrf.mxu0  ;;  %v2292_v33 = vpop.f32.mrf.mxu1 }
 0x8e3   : > { %v2019_v34 = vmul.f32 -1.442695, %v1776_v30  ;;  %v1783_v41 = vadd.f32 %v1731_v31, %v1692_v40 }
 0x8e4   : > { %v1733_v35 = vpop.f32.mrf.mxu0  ;;  %v1773_v37 = vpop.f32.mrf.mxu1 }
 0x8e5   : > { %2459 = vpow2.f32 %v2019_v34  ;;  %v2020_v42 = vmul.f32 -1.442695, %v1783_v41 }
 0x8e6   : > { %v1734_v36 = vpop.f32.mrf.mxu0  ;;  %v2293_v39 = vpop.f32.mrf.mxu1 }
 0x8e7   : > { %2461 = vpow2.f32 %v2020_v42 }
 0x8f2   : > { %v2460_v43 = vpop.eup %2459 }
 0x8f3   : > { %v1780_v45 = vadd.f32 1.0, %v2460_v43 }
 0x8f4   : > { %v2462_v47 = vpop.eup %2461 }
 0x8f5   : > { %2463 = vrcp.f32 %v1780_v45  ;;  %v1787_v51 = vadd.f32 1.0, %v2462_v47 }
 0x902   : > { %v2464_v48 = vpop.eup %2463 }
 0x903   : > { %v1791_v50 = vmul.f32 %v2464_v48, %v1790_v46 }
 0x905   : > { %v1792_v53 = vadd.f32 %v1791_v50, %v1693_v49 }
 0x907   : > { %2465 = vtanh.f32 %v1792_v53 }
 0x908   : > { %2467 = vrcp.f32 %v1787_v51 }
 0x914   : > { %v2466_v55 = vpop.eup %2465 }
 0x915   : > { %v1794_v56 = vsub.f32 %v3148_v57, %v2466_v55  ;;  %v2468_v1 = vpop.eup %2467 }
 0x917   : > { %v1795_v58 = vmul.f32 %v2468_v1, %v1794_v56  ;;  %1803 = sbr.rel (%p2022_p13) target bundleno = 2333 (0x91d), region = 80 }
 0x919   : > { %v1796_v59 = vadd.f32 %v2466_v55, %v1795_v58 }
 0x91b   : > { %2021 = vst [vmem:[%s2566_s14 + $0x38] sm:$0xff] %v1796_v59 }
 0x91c   : > { %1804 = vst [vmem:[%s3220_s7] sm:$0xff] %v1796_v59 }
 0x91d PF: > { %1805 = vst [vmem:[#allocation2] sm:$0xff] %v1796_v59 }
 0x91e PF: > { %s18_s26 = sadd.s32 1, %s2491_s26   ;;  %s3221_s24 = smov %s2487_s25 }
 0x91f   : > { %p15_p0 = scmp.ge.s32.totalorder %s18_s26, 4   ;;  %s3222_s25 = smov %s3224_s27 }
 0x921   :  { %17 = sbr.rel (!%p15_p0) target bundleno = 2 (0x2), region = 139 }

// kernel: gru_forward.2
= control target key start
LH: loop header
LB: loop body
LE: loop exit
PB: predicated region body
PF: predicated region fallthrough
CT: control target
= control target key end

     0   :  { %13 = vsyncpa [#allocation5], 0  ;;  %s2612_s24 = smov 0   ;;  %s2614_s25 = smov 0   ;;  %s3236_s0 = inlined_call_operand.vmem [shape: bf16[16,8,128], index: 0, kind: input, shape index: {}]   ;;  %s3237_s1 = inlined_call_operand.vmem [shape: f32[8,128], index: 1, kind: input, shape index: {}]   ;;  %s3238_s2 = inlined_call_operand.vmem [shape: bf16[128,384], index: 2, kind: input, shape index: {}]   ;;  %s3239_s3 = inlined_call_operand.hbm [shape: bf16[128,384], index: 3, kind: input, shape index: {}]   ;;  %s3240_s4 = inlined_call_operand.vmem [shape: f32[1,384], index: 4, kind: input, shape index: {}]   ;;  %s3241_s5 = inlined_call_operand.vmem [shape: f32[1,128], index: 5, kind: input, shape index: {}]   ;;  %s3242_s6 = inlined_call_operand.vmem [shape: bf16[16,8,128], index: 6, kind: output, shape index: {0}]   ;;  %s3243_s7 = inlined_call_operand.vmem [shape: f32[8,128], index: 7, kind: output, shape index: {1}]  }
   0x1   :  { %s2616_s26 = smov 0  }
   0x2 LB: > { %s1955_s27 = sadd.s32 4294967295, %s2564_s26   ;;  %s28_s28 = sadd.s32 1, %s2560_s25  ;;  %s2564_s26 = sphi %s2616_s26, %s19_s26   ;;  %s2560_s25 = sphi %s2614_s25, %s3247_s25   ;;  %s2556_s24 = sphi %s2612_s24, %s3246_s24  }
   0x3   : > { %p29_p0 = scmp.ge.s32.totalorder %s28_s28, 2  ;;  %p1957_p1 = scmp.ge.s32.totalorder %s2564_s26, 1 }
   0x4   : > { %p228_p2 = scmp.lt.s32.totalorder %s2564_s26, 3  ;;  %p2637_p4 = scmp.eq.s32.totalorder %s1955_s27, 0 }
   0x5   : > { %s3249_s28 = smov (%p29_p0, %s28_s28), 0  ;;  %s2566_s8 = smov [#allocation4]  }
   0x6   : > { %p2633_p3 = pnand %p1957_p1, %p228_p2  ;;  %s250_s9 = sshll.u32 %s2566_s8, 4  ;;  %s251_s9 = int_to_ptr.vmem [resolvable:$true] %s250_s9 }
   0x7   : > { %s2523_s10 = scalar_lea.vmem %s251_s9, 3072  ;;  %p2531_p11 = scmp.lt.s32.totalorder %s251_s9, %s251_s9 }
   0x8   : > { %p2328_p5 = pneg %p2633_p3  ;;  %p2524_p8 = scmp.ne.s32.totalorder %s251_s9, %s2523_s10 }
   0x9   : > { %p2532_p12 = scmp.lt.s32.totalorder %s2523_s10, %s2523_s10 }
   0xa   : > { %p2329_p6 = pnand %p2637_p4, %p2328_p5 }
   0xb   : > { %p2533_p13 = por %p2532_p12, %p2531_p11 }
   0xc   : > { %p2514_p7 = pneg %p2329_p6 }
   0xe   : > { %p2526_p9 = pnand %p2524_p8, %p2514_p7 }
  0x10   : > { %p2527_p10 = pneg %p2526_p9 }
  0x12   : > { %p2534_p0 = pnand %p2533_p13, %p2527_p10 }
  0x14   : > { %2537 = shalt.err (!%p2534_p0)
}
  0x15   : > { %s2567_s11 = smov 192   ;;  %s2568_s12 = smov 12  }
  0x16   : > { %2331 = dma.hbm_to_vmem [thread:$0]  (!%p2329_p6), %s3239_s3, 3072, %s251_s9, [#allocation5], %s2567_s11, %s2567_s11, %s2568_s12  }
  0x17   : > { %284 = sbr.rel (%p2633_p3) target bundleno = 2368 (0x940), region = 44 }
  0x1c   : > { %2551 = dma.done.wait (%p2637_p4), [#allocation5], 3072  }
  0x1d   : > { %2553 = vsyncadd (%p2637_p4), [#allocation5], 4294964224  ;;  %s2655_s15 = sshll.u32 %s2556_s24, 3  ;;  %p1967_p2 = scmp.ne.s32.totalorder %s2556_s24, 0 }
  0x1e   : > { %p331_p1 = scmp.lt.s32.totalorder %s2655_s15, 15 }
  0x1f   : > { %360 = sbr.rel (%p1967_p2) target bundleno = 38 (0x26), region = 52 }
  0x20   : > { %s332_s16 = scalar_select %p331_p1, %s2655_s15, 15 }
  0x22   : > { %s1964_s17 = sshll.u32 %s332_s16, 2 }
  0x23   : > { %s2662_s20 = scalar_lea.vmem %s3236_s0, %s1964_s17  ;;  %s2667_s23 = scalar_lea.vmem %s3242_s6, %s1964_s17 }
  0x24   : > { %v361_v0 = vld [vmem:[%s3237_s1] sm:$0xff] }
  0x25   : > { %362 = vst [vmem:[#allocation2] sm:$0xff] %v361_v0 }
  0x26 PF: > { %v2364_v1 = vld [vmem:[%s3238_s2 + $0xac] ss:$12 sps:$4 sm:$0xff]   ;;  %v2366_v2 = vld [vmem:[%s3238_s2 + $0xa8] ss:$12 sps:$4 sm:$0xff]   ;;  %v2569_v3 = vmov 0   ;;  %v2390_v13 = vld [vmem:[%s2662_s20] sm:$0xff]   ;;  %v405_v57 = vlaneseq }
  0x27   : > { %604 = vmatprep.mubr.bf16.mxu0 %v2569_v3  ;;  %572 = vmatprep.subr.bf16.mxu0 %v2364_v1  ;;  %v2367_v4 = vld [vmem:[%s3238_s2 + $0x94] ss:$12 sps:$4 sm:$0xff]   ;;  %v2369_v5 = vld [vmem:[%s3238_s2 + $0x90] ss:$12 sps:$4 sm:$0xff]   ;;  %v2372_v7 = vld [vmem:[%s3238_s2 + $0x78] ss:$12 sps:$4 sm:$0xff]  }
  0x28   : > { %573 = vmatpush1.bf16.msra.mxu0 %v2366_v2  ;;  %v2370_v6 = vld [vmem:[%s3238_s2 + $0x7c] ss:$12 sps:$4 sm:$0xff]   ;;  %v2373_v8 = vld [vmem:[%s3238_s2 + $0x64] ss:$12 sps:$4 sm:$0xff]   ;;  %v2375_v10 = vld [vmem:[%s3238_s2 + $0x60] ss:$12 sps:$4 sm:$0xff]   ;;  %2156 = vmatprep.mubr.bf16.mxu1 %v2390_v13 }
  0x29   : > { %574 = vmatprep.subr.bf16.mxu0 %v2367_v4  ;;  %v2385_v9 = vld [vmem:[%s3238_s2 + $0xb0] ss:$12 sps:$4 sm:$0xff]   ;;  %v2376_v11 = vld [vmem:[%s3238_s2 + $0x4c] ss:$12 sps:$4 sm:$0xff]   ;;  %v2378_v14 = vld [vmem:[%s3238_s2 + $0x48] ss:$12 sps:$4 sm:$0xff]  }
  0x2a   : > { %2140 = vmatprep.subr.bf16.mxu1 %v2385_v9  ;;  %v2389_v12 = vld [vmem:[%s3238_s2 + $0x98] ss:$12 sps:$4 sm:$0xff]   ;;  %v2394_v15 = vld [vmem:[%s3238_s2 + $0x80] ss:$12 sps:$4 sm:$0xff]   ;;  %v2398_v17 = vld [vmem:[%s3238_s2 + $0x68] ss:$12 sps:$4 sm:$0xff]  }
  0x2b   : > { %2141 = vmatpush3.bf16.msra.mxu1 %v2385_v9  ;;  %v2379_v16 = vld [vmem:[%s3238_s2 + $0x34] ss:$12 sps:$4 sm:$0xff]   ;;  %v2381_v18 = vld [vmem:[%s3238_s2 + $0x30] ss:$12 sps:$4 sm:$0xff]   ;;  %v2384_v21 = vld [vmem:[%s3238_s2 + $0x18] ss:$12 sps:$4 sm:$0xff]  }
  0x2c   : > { %575 = vmatpush1.bf16.msra.mxu0 %v2369_v5  ;;  %2142 = vmatprep.subr.bf16.mxu1 %v2389_v12  ;;  %v2382_v19 = vld [vmem:[%s3238_s2 + $0x1c] ss:$12 sps:$4 sm:$0xff]   ;;  %v2386_v22 = vld [vmem:[%s3238_s2 + $0x4] ss:$12 sps:$4 sm:$0xff]   ;;  %v2388_v24 = vld [vmem:[%s3238_s2] ss:$12 sps:$4 sm:$0xff]  }
  0x2d   : > { %576 = vmatprep.subr.bf16.mxu0 %v2370_v6  ;;  %v2403_v20 = vld [vmem:[%s3238_s2 + $0x50] ss:$12 sps:$4 sm:$0xff]   ;;  %v2407_v23 = vld [vmem:[%s3238_s2 + $0x38] ss:$12 sps:$4 sm:$0xff]   ;;  %v2741_v25 = vld [vmem:[#allocation4 + $0xac] ss:$12 sps:$4 sm:$0xff]  }
  0x2e   : > { %v2412_v26 = vld [vmem:[%s3238_s2 + $0x20] ss:$12 sps:$4 sm:$0xff]   ;;  %v2746_v27 = vld [vmem:[#allocation4 + $0xa8] ss:$12 sps:$4 sm:$0xff]   ;;  %v2416_v29 = vld [vmem:[%s3238_s2 + $0x8] ss:$12 sps:$4 sm:$0xff]  }
  0x2f   : > { %2143 = vmatpush3.bf16.msra.mxu1 %v2389_v12  ;;  %v2749_v28 = vld [vmem:[#allocation4 + $0x94] ss:$12 sps:$4 sm:$0xff]   ;;  %v2755_v30 = vld [vmem:[#allocation4 + $0x90] ss:$12 sps:$4 sm:$0xff]   ;;  %v2763_v33 = vld [vmem:[#allocation4 + $0x78] ss:$12 sps:$4 sm:$0xff]  }
  0x30   : > { %577 = vmatpush1.bf16.msra.mxu0 %v2372_v7  ;;  %2144 = vmatprep.subr.bf16.mxu1 %v2394_v15  ;;  %v2759_v31 = vld [vmem:[#allocation4 + $0x7c] ss:$12 sps:$4 sm:$0xff]   ;;  %v2399_v32 = vld [vmem:[%s2662_s20 + $0x8] sm:$0xff]   ;;  %v2570_v36 = vmov 0.0   ;;  %v2777_v39 = vld [vmem:[#allocation4 + $0x4c] ss:$12 sps:$4 sm:$0xff]  }
  0x31   : > { %578 = vmatprep.subr.bf16.mxu0 %v2373_v8  ;;  %v2766_v34 = vld [vmem:[#allocation4 + $0x64] ss:$12 sps:$4 sm:$0xff]   ;;  %v2772_v37 = vld [vmem:[#allocation4 + $0x60] ss:$12 sps:$4 sm:$0xff]   ;;  %v2784_v41 = vld [vmem:[#allocation4 + $0x48] ss:$12 sps:$4 sm:$0xff]  }
  0x32   : > { %v2768_v35 = vld [vmem:[#allocation4 + $0xb0] ss:$12 sps:$4 sm:$0xff]   ;;  %v2408_v38 = vld [vmem:[%s2662_s20 + $0x10] sm:$0xff]   ;;  %v2780_v40 = vld [vmem:[#allocation4 + $0x98] ss:$12 sps:$4 sm:$0xff]   ;;  %vm2571_vm0 = vmmov 0  }
  0x33   : > { %2145 = vmatpush3.bf16.msra.mxu1 %v2394_v15  ;;  %v2787_v42 = vld [vmem:[#allocation4 + $0x34] ss:$12 sps:$4 sm:$0xff]   ;;  %v2795_v45 = vld [vmem:[#allocation4 + $0x30] ss:$12 sps:$4 sm:$0xff]   ;;  %v2808_v48 = vld [vmem:[#allocation4 + $0x18] ss:$12 sps:$4 sm:$0xff]  }
  0x34   : > { %579 = vmatpush1.bf16.msra.mxu0 %v2375_v10  ;;  %2146 = vmatprep.subr.bf16.mxu1 %v2398_v17  ;;  %v2790_v43 = vld [vmem:[#allocation4 + $0x80] ss:$12 sps:$4 sm:$0xff]   ;;  %v2417_v44 = vld [vmem:[%s2662_s20 + $0x18] sm:$0xff]   ;;  %v2799_v46 = vld [vmem:[#allocation4 + $0x1c] ss:$12 sps:$4 sm:$0xff]   ;;  %v406_v58 = vshrl.u32 %v405_v57, 7 }
  0x35   : > { %580 = vmatprep.subr.bf16.mxu0 %v2376_v11  ;;  %v2802_v47 = vld [vmem:[#allocation4 + $0x68] ss:$12 sps:$4 sm:$0xff]   ;;  %v2811_v49 = vld [vmem:[#allocation4 + $0x4] ss:$12 sps:$4 sm:$0xff]   ;;  %v2818_v51 = vld [vmem:[#allocation4] ss:$12 sps:$4 sm:$0xff]  }
  0x36   : > { %v2814_v50 = vld [vmem:[#allocation4 + $0x50] ss:$12 sps:$4 sm:$0xff]   ;;  %v2825_v53 = vld [vmem:[#allocation4 + $0x38] ss:$12 sps:$4 sm:$0xff]   ;;  %v2832_v55 = vld [vmem:[#allocation4 + $0x20] ss:$12 sps:$4 sm:$0xff]  }
  0x37   : > { %2147 = vmatpush3.bf16.msra.mxu1 %v2398_v17  ;;  %v2821_v52 = vld [vmem:[#allocation2] sm:$0xff]  ;;  %v2836_v56 = vld [vmem:[#allocation4 + $0x8] ss:$12 sps:$4 sm:$0xff]   ;;  %v407_v59 = vsub.s32 0, %v406_v58  ;;  %v411_v61 = vsub.s32 1, %v406_v58  ;;  %v415_v5 = vsub.s32 2, %v406_v58 }
  0x38   : > { %581 = vmatpush1.bf16.msra.mxu0 %v2378_v14  ;;  %2148 = vmatprep.subr.bf16.mxu1 %v2403_v20  ;;  %v772_v54 = vpack.c.bf16 %v2821_v52, %v2821_v52  ;;  %v403_v60 = vld [vmem:[%s3240_s4] sm:$0x7]  ;;  %p2024_p3 = scmp.ne.s32.totalorder %s2655_s15, 11 }
  0x39   : > { %582 = vmatprep.subr.bf16.mxu0 %v2379_v16  ;;  %v2843_v62 = vrot.slane %v403_v60, %v407_v59  ;;  %v2845_v63 = vrot.slane %v403_v60, %v411_v61  ;;  %v416_v10 = vrot.slane %v403_v60, %v415_v5 }
  0x3b   : > { %2149 = vmatpush3.bf16.msra.mxu1 %v2403_v20 }
  0x3c   : > { %583 = vmatpush1.bf16.msra.mxu0 %v2381_v18  ;;  %2150 = vmatprep.subr.bf16.mxu1 %v2407_v23 }
  0x3d   : > { %584 = vmatprep.subr.bf16.mxu0 %v2382_v19 }
  0x3f   : > { %2151 = vmatpush3.bf16.msra.mxu1 %v2407_v23 }
  0x40   : > { %585 = vmatpush1.bf16.msra.mxu0 %v2384_v21  ;;  %2152 = vmatprep.subr.bf16.mxu1 %v2412_v26 }
  0x41   : > { %586 = vmatprep.subr.bf16.mxu0 %v2386_v22 }
  0x43   : > { %2153 = vmatpush3.bf16.msra.mxu1 %v2412_v26 }
  0x44   : > { %587 = vmatpush1.bf16.msra.mxu0 %v2388_v24  ;;  %2154 = vmatprep.subr.bf16.mxu1 %v2416_v29 }
  0x45   : > { %901 = vmatprep.subr.bf16.mxu0 %v2741_v25 }
  0x47   : > { %605 = vmatmul.mubr.bf16.vlgmr.msra.gmra.mxu0 %v2390_v13  ;;  %2155 = vmatpush3.bf16.msra.mxu1 %v2416_v29 }
  0x48   : > { %902 = vmatpush1.bf16.msra.mxu0 %v2746_v27  ;;  %614 = vmatprep.mubr.bf16.mxu0 %v2569_v3 }
  0x49   : > { %903 = vmatprep.subr.bf16.mxu0 %v2749_v28  ;;  %2164 = vmatprep.subr.bf16.mxu1 %v2570_v36 }
  0x4a   : > { %2157 = vmatmul.mubr.bf16.vlgmr.msra.gmra.mxu1 %v2399_v32 }
  0x4b   : > { %2165 = vmatpush3.bf16.msra.mxu1 %v2768_v35  ;;  %2160 = vmatprep.mubr.bf16.mxu1 %v2408_v38 }
  0x4c   : > { %904 = vmatpush1.bf16.msra.mxu0 %v2755_v30  ;;  %2166 = vmatprep.subr.bf16.mxu1 %v2570_v36 }
  0x4d   : > { %905 = vmatprep.subr.bf16.mxu0 %v2759_v31 }
  0x4f   : > { %615 = vmatmul.mubr.bf16.gmra.mxu0 %v2399_v32  ;;  %2167 = vmatpush3.bf16.msra.mxu1 %v2780_v40 }
  0x50   : > { %906 = vmatpush1.bf16.msra.mxu0 %v2763_v33  ;;  %624 = vmatprep.mubr.bf16.mxu0 %v2569_v3 }
  0x51   : > { %907 = vmatprep.subr.bf16.mxu0 %v2766_v34  ;;  %2168 = vmatprep.subr.bf16.mxu1 %v2570_v36 }
  0x52   : > { %2161 = vmatmul.mubr.bf16.gmra.mxu1 %v2417_v44 }
  0x53   : > { %2169 = vmatpush3.bf16.msra.mxu1 %v2790_v43  ;;  %2180 = vmatprep.mubr.msk.bf16.mxu1 %vm2571_vm0, %v2570_v36 }
  0x54   : > { %908 = vmatpush1.bf16.msra.mxu0 %v2772_v37  ;;  %2170 = vmatprep.subr.bf16.mxu1 %v2570_v36 }
  0x55   : > { %909 = vmatprep.subr.bf16.mxu0 %v2777_v39 }
  0x57   : > { %625 = vmatmul.mubr.bf16.gmra.mxu0 %v2408_v38  ;;  %2171 = vmatpush3.bf16.msra.mxu1 %v2802_v47 }
  0x58   : > { %910 = vmatpush1.bf16.msra.mxu0 %v2784_v41  ;;  %634 = vmatprep.mubr.bf16.mxu0 %v2569_v3 }
  0x59   : > { %911 = vmatprep.subr.bf16.mxu0 %v2787_v42  ;;  %2172 = vmatprep.subr.bf16.mxu1 %v2570_v36 }
  0x5b   : > { %2173 = vmatpush3.bf16.msra.mxu1 %v2814_v50 }
  0x5c   : > { %912 = vmatpush1.bf16.msra.mxu0 %v2795_v45  ;;  %2174 = vmatprep.subr.bf16.mxu1 %v2570_v36 }
  0x5d   : > { %913 = vmatprep.subr.bf16.mxu0 %v2799_v46 }
  0x5f   : > { %635 = vmatmul.mubr.bf16.gmra.mxu0 %v2417_v44  ;;  %2175 = vmatpush3.bf16.msra.mxu1 %v2825_v53 }
  0x60   : > { %914 = vmatpush1.bf16.msra.mxu0 %v2808_v48  ;;  %933 = vmatprep.mubr.bf16.mxu0 %v2569_v3 }
  0x61   : > { %915 = vmatprep.subr.bf16.mxu0 %v2811_v49  ;;  %2176 = vmatprep.subr.bf16.mxu1 %v2570_v36 }
  0x63   : > { %2177 = vmatpush3.bf16.msra.mxu1 %v2832_v55 }
  0x64   : > { %916 = vmatpush1.bf16.msra.mxu0 %v2818_v51  ;;  %2178 = vmatprep.subr.bf16.mxu1 %v2570_v36 }
  0x67   : > { %934 = vmatmul.mubr.bf16.vlgmr.msra.gmra.mxu0 %v772_v54  ;;  %2179 = vmatpush3.bf16.msra.mxu1 %v2836_v56 }
  0x6a   : > { %2181 = vmatmul.mubr.bf16.vlgmr.msra.gmra.mxu1 %v772_v54 }
 0x107   : > { %v606_v0 = vpop.f32.mrf.mxu0 }
 0x108   : > { %v2848_v1 = vadd.f32 %v606_v0, %v2843_v62 }
 0x109   : > { %v608_v2 = vpop.f32.mrf.mxu0 }
 0x10a   : > { %v2851_v4 = vadd.f32 %v608_v2, %v2845_v63  ;;  %v2158_v14 = vpop.f32.mrf.mxu1 }
 0x10b   : > { %v610_v6 = vpop.f32.mrf.mxu0  ;;  %v688_v16 = vadd.f32 %v2158_v14, %v416_v10 }
 0x10c   : > { %v611_v7 = vadd.f32 %v610_v6, %v2843_v62  ;;  %v679_v18 = vpop.f32.mrf.mxu1 }
 0x10d   : > { %v612_v8 = vpop.f32.mrf.mxu0  ;;  %718 = vst [vmem:[#allocation3 + $0x88] sm:$0xff] %v688_v16  ;;  %v2858_v20 = vadd.f32 %v679_v18, %v416_v10 }
 0x10e   : > { %713 = vst [vmem:[#allocation3 + $0x48] sm:$0xff] %v611_v7  ;;  %v613_v9 = vadd.f32 %v612_v8, %v2845_v63  ;;  %v2159_v22 = vpop.f32.mrf.mxu1 }
 0x10f   : > { %v616_v11 = vpop.f32.mrf.mxu0  ;;  %v691_v24 = vadd.f32 %v2159_v22, %v416_v10 }
 0x110   : > { %714 = vst [vmem:[#allocation3 + $0x60] sm:$0xff] %v613_v9  ;;  %v617_v12 = vadd.f32 %v616_v11, %v2843_v62  ;;  %v682_v29 = vpop.f32.mrf.mxu1 }
 0x111   : > { %v618_v13 = vpop.f32.mrf.mxu0  ;;  %721 = vst [vmem:[#allocation3 + $0x98] sm:$0xff] %v691_v24  ;;  %v683_v38 = vadd.f32 %v682_v29, %v416_v10 }
 0x112   : > { %716 = vst [vmem:[#allocation3 + $0x40] sm:$0xff] %v617_v12  ;;  %v619_v15 = vadd.f32 %v618_v13, %v2845_v63  ;;  %v2162_v54 = vpop.f32.mrf.mxu1 }
 0x113   : > { %v620_v17 = vpop.f32.mrf.mxu0  ;;  %715 = vst [vmem:[#allocation3 + $0x28] sm:$0xff] %v683_v38  ;;  %v704_v58 = vadd.f32 %v2162_v54, %v416_v10 }
 0x114   : > { %717 = vst [vmem:[#allocation3 + $0x78] sm:$0xff] %v619_v15  ;;  %v621_v19 = vadd.f32 %v620_v17, %v2843_v62  ;;  %v695_v60 = vpop.f32.mrf.mxu1 }
 0x115   : > { %v622_v21 = vpop.f32.mrf.mxu0  ;;  %730 = vst [vmem:[#allocation3 + $0x80] sm:$0xff] %v704_v58  ;;  %v696_v0 = vadd.f32 %v695_v60, %v416_v10 }
 0x116   : > { %719 = vst [vmem:[#allocation3 + $0x90] sm:$0xff] %v621_v19  ;;  %v623_v23 = vadd.f32 %v622_v21, %v2845_v63  ;;  %v2163_v5 = vpop.f32.mrf.mxu1 }
 0x117   : > { %v626_v26 = vpop.f32.mrf.mxu0  ;;  %724 = vst [vmem:[#allocation3 + $0x70] sm:$0xff] %v696_v0  ;;  %v707_v7 = vadd.f32 %v2163_v5, %v416_v10 }
 0x118   : > { %720 = vst [vmem:[#allocation3 + $0x18] sm:$0xff] %v623_v23  ;;  %v627_v32 = vadd.f32 %v626_v26, %v2843_v62  ;;  %v698_v9 = vpop.f32.mrf.mxu1 }
 0x119   : > { %v628_v44 = vpop.f32.mrf.mxu0  ;;  %733 = vst [vmem:[#allocation3 + $0x8] sm:$0xff] %v707_v7  ;;  %v699_v12 = vadd.f32 %v698_v9, %v416_v10 }
 0x11a   : > { %722 = vst [vmem:[#allocation3 + $0x38] sm:$0xff] %v627_v32  ;;  %v629_v57 = vadd.f32 %v628_v44, %v2845_v63 }
 0x11b   : > { %v630_v59 = vpop.f32.mrf.mxu0  ;;  %727 = vst [vmem:[#allocation3 + $0x68] sm:$0xff] %v699_v12 }
 0x11c   : > { %723 = vst [vmem:[#allocation3 + $0x50] sm:$0xff] %v629_v57  ;;  %v631_v61 = vadd.f32 %v630_v59, %v2843_v62 }
 0x11d   : > { %v632_v2 = vpop.f32.mrf.mxu0 }
 0x11e   : > { %725 = vst [vmem:[#allocation3 + $0xa0] sm:$0xff] %v631_v61  ;;  %v633_v6 = vadd.f32 %v632_v2, %v2845_v63 }
 0x11f   : > { %v636_v8 = vpop.f32.mrf.mxu0 }
 0x120   : > { %726 = vst [vmem:[#allocation3 + $0xa8] sm:$0xff] %v633_v6  ;;  %v637_v11 = vadd.f32 %v636_v8, %v2843_v62 }
 0x121   : > { %v638_v13 = vpop.f32.mrf.mxu0 }
 0x122   : > { %728 = vst [vmem:[#allocation3 + $0x30] sm:$0xff] %v637_v11  ;;  %v639_v14 = vadd.f32 %v638_v13, %v2845_v63 }
 0x123   : > { %v640_v15 = vpop.f32.mrf.mxu0 }
 0x124   : > { %729 = vst [vmem:[#allocation3 + $0x58] sm:$0xff] %v639_v14  ;;  %v641_v16 = vadd.f32 %v640_v15, %v2843_v62 }
 0x125   : > { %v642_v17 = vpop.f32.mrf.mxu0 }
 0x126   : > { %731 = vst [vmem:[#allocation3 + $0xb8] sm:$0xff] %v641_v16  ;;  %v643_v18 = vadd.f32 %v642_v17, %v2845_v63  ;;  %v2874_v63 = vld [vmem:[%s3241_s5] ss:$0 sm:$0xff] }
 0x127   : > { %v935_v19 = vpop.f32.mrf.mxu0 }
 0x128   : > { %732 = vst [vmem:[#allocation3 + $0x20] sm:$0xff] %v643_v18  ;;  %v982_v21 = vadd.f32 %v935_v19, %v2848_v1 }
 0x129   : > { %v937_v22 = vpop.f32.mrf.mxu0 }
 0x12a   : > { %v2021_v23 = vmul.f32 -1.442695, %v982_v21  ;;  %v976_v26 = vpop.f32.mrf.mxu1  ;;  %v989_v29 = vadd.f32 %v937_v22, %v2851_v4 }
 0x12b   : > { %v939_v10 = vpop.f32.mrf.mxu0  ;;  %v1002_v1 = vadd.f32 %v2874_v63, %v976_v26 }
 0x12c   : > { %2432 = vpow2.f32 %v2021_v23  ;;  %v2182_v32 = vpop.f32.mrf.mxu1  ;;  %v2022_v44 = vmul.f32 -1.442695, %v989_v29 }
 0x12d   : > { %v940_v24 = vpop.f32.mrf.mxu0 }
 0x12e   : > { %v979_v38 = vpop.f32.mrf.mxu1  ;;  %2434 = vpow2.f32 %v2022_v44 }
 0x130   : > { %v2183_v62 = vpop.f32.mrf.mxu1 }
 0x139   : > { %v2433_v54 = vpop.eup %2432 }
 0x13a   : > { %v986_v57 = vadd.f32 1.0, %v2433_v54 }
 0x13b   : > { %v2435_v58 = vpop.eup %2434 }
 0x13c   : > { %2436 = vrcp.f32 %v986_v57  ;;  %v993_v4 = vadd.f32 1.0, %v2435_v58 }
 0x149   : > { %v2437_v59 = vpop.eup %2436 }
 0x14a   : > { %v1003_v60 = vmul.f32 %v2437_v59, %v1002_v1 }
 0x14c   : > { %v1004_v61 = vadd.f32 %v1003_v60, %v2858_v20 }
 0x14e   : > { %2438 = vtanh.f32 %v1004_v61 }
 0x14f   : > { %2440 = vrcp.f32 %v993_v4 }
 0x15b   : > { %v2439_v0 = vpop.eup %2438 }
 0x15c   : > { %v1006_v2 = vsub.f32 %v2821_v52, %v2439_v0  ;;  %v2441_v5 = vpop.eup %2440 }
 0x15e   : > { %v1007_v6 = vmul.f32 %v2441_v5, %v1006_v2 }
 0x160   : > { %v2879_v7 = vadd.f32 %v2439_v0, %v1007_v6  ;;  %1014 = sbr.rel (%p2024_p3) target bundleno = 358 (0x166), region = 56 }
 0x162   : > { %v1009_v8 = vpack.c.bf16 %v2879_v7, %v2879_v7 }
 0x164   : > { %1010 = vst [vmem:[%s2667_s23] sm:$0xf] %v1009_v8 }
 0x165   : > { %1015 = vst [vmem:[%s3243_s7] sm:$0xff] %v2879_v7 }
 0x166 PF: > { %1020 = vmatprep.subr.bf16.mxu0 %v2741_v25  ;;  %2184 = vmatprep.subr.bf16.mxu1 %v2570_v36  ;;  %s1125_s9 = sadd.s32 1, %s2655_s15  ;;  %v1017_v52 = vld [vmem:[#allocation3 + $0x48] sm:$0xff]  ;;  %v1018_v19 = vld [vmem:[#allocation3 + $0x60] sm:$0xff] }
 0x167   : > { %1021 = vmatpush1.bf16.msra.mxu0 %v2746_v27  ;;  %2185 = vmatpush3.bf16.msra.mxu1 %v2768_v35  ;;  %v1019_v32 = vld [vmem:[#allocation3 + $0x28] sm:$0xff]  ;;  %p2028_p4 = scmp.ne.s32.totalorder %s1125_s9, 11 }
 0x168   : > { %1022 = vmatprep.subr.bf16.mxu0 %v2749_v28  ;;  %2186 = vmatprep.subr.bf16.mxu1 %v2570_v36 }
 0x169   : > { %1052 = vmatprep.mubr.bf16.mxu0 %v2569_v3  ;;  %2200 = vmatprep.mubr.msk.bf16.mxu1 %vm2571_vm0, %v2570_v36 }
 0x16b   : > { %1023 = vmatpush1.bf16.msra.mxu0 %v2755_v30  ;;  %2187 = vmatpush3.bf16.msra.mxu1 %v2780_v40 }
 0x16c   : > { %1024 = vmatprep.subr.bf16.mxu0 %v2759_v31  ;;  %2188 = vmatprep.subr.bf16.mxu1 %v2570_v36 }
 0x16f   : > { %1025 = vmatpush1.bf16.msra.mxu0 %v2763_v33  ;;  %2189 = vmatpush3.bf16.msra.mxu1 %v2790_v43 }
 0x170   : > { %1026 = vmatprep.subr.bf16.mxu0 %v2766_v34  ;;  %2190 = vmatprep.subr.bf16.mxu1 %v2570_v36 }
 0x173   : > { %1027 = vmatpush1.bf16.msra.mxu0 %v2772_v37  ;;  %2191 = vmatpush3.bf16.msra.mxu1 %v2802_v47 }
 0x174   : > { %1028 = vmatprep.subr.bf16.mxu0 %v2777_v39  ;;  %2192 = vmatprep.subr.bf16.mxu1 %v2570_v36 }
 0x177   : > { %1029 = vmatpush1.bf16.msra.mxu0 %v2784_v41  ;;  %2193 = vmatpush3.bf16.msra.mxu1 %v2814_v50 }
 0x178   : > { %1030 = vmatprep.subr.bf16.mxu0 %v2787_v42  ;;  %2194 = vmatprep.subr.bf16.mxu1 %v2570_v36 }
 0x17b   : > { %1031 = vmatpush1.bf16.msra.mxu0 %v2795_v45  ;;  %2195 = vmatpush3.bf16.msra.mxu1 %v2825_v53 }
 0x17c   : > { %1032 = vmatprep.subr.bf16.mxu0 %v2799_v46  ;;  %2196 = vmatprep.subr.bf16.mxu1 %v2570_v36 }
 0x17f   : > { %1033 = vmatpush1.bf16.msra.mxu0 %v2808_v48  ;;  %2197 = vmatpush3.bf16.msra.mxu1 %v2832_v55 }
 0x180   : > { %1034 = vmatprep.subr.bf16.mxu0 %v2811_v49  ;;  %2198 = vmatprep.subr.bf16.mxu1 %v2570_v36 }
 0x183   : > { %1035 = vmatpush1.bf16.msra.mxu0 %v2818_v51  ;;  %2199 = vmatpush3.bf16.msra.mxu1 %v2836_v56 }
 0x186   : > { %1053 = vmatmul.mubr.bf16.vlgmr.msra.gmra.mxu0 %v1009_v8  ;;  %2201 = vmatmul.mubr.bf16.vlgmr.msra.gmra.mxu1 %v1009_v8 }
 0x246   : > { %v1054_v20 = vpop.f32.mrf.mxu0  ;;  %v1095_v9 = vpop.f32.mrf.mxu1 }
 0x247   : > { %v1101_v11 = vadd.f32 %v1054_v20, %v1017_v52  ;;  %v1115_v24 = vadd.f32 %v2874_v63, %v1095_v9 }
 0x248   : > { %v1056_v12 = vpop.f32.mrf.mxu0  ;;  %v2202_v13 = vpop.f32.mrf.mxu1 }
 0x249   : > { %v2025_v14 = vmul.f32 -1.442695, %v1101_v11  ;;  %v1108_v21 = vadd.f32 %v1056_v12, %v1018_v19 }
 0x24a   : > { %v1058_v15 = vpop.f32.mrf.mxu0  ;;  %v1098_v16 = vpop.f32.mrf.mxu1 }
 0x24b   : > { %2442 = vpow2.f32 %v2025_v14  ;;  %v2026_v22 = vmul.f32 -1.442695, %v1108_v21 }
 0x24c   : > { %v1059_v17 = vpop.f32.mrf.mxu0  ;;  %v2203_v18 = vpop.f32.mrf.mxu1 }
 0x24d   : > { %2444 = vpow2.f32 %v2026_v22 }
 0x258   : > { %v2443_v23 = vpop.eup %2442 }
 0x259   : > { %v1105_v10 = vadd.f32 1.0, %v2443_v23 }
 0x25a   : > { %v2445_v26 = vpop.eup %2444 }
 0x25b   : > { %2446 = vrcp.f32 %v1105_v10  ;;  %v1112_v44 = vadd.f32 1.0, %v2445_v26 }
 0x268   : > { %v2447_v29 = vpop.eup %2446 }
 0x269   : > { %v1116_v38 = vmul.f32 %v2447_v29, %v1115_v24 }
 0x26b   : > { %v1117_v62 = vadd.f32 %v1116_v38, %v1019_v32 }
 0x26d   : > { %2448 = vtanh.f32 %v1117_v62 }
 0x26e   : > { %2450 = vrcp.f32 %v1112_v44 }
 0x27a   : > { %v2449_v54 = vpop.eup %2448 }
 0x27b   : > { %v1119_v57 = vsub.f32 %v2879_v7, %v2449_v54  ;;  %v2451_v1 = vpop.eup %2450 }
 0x27d   : > { %v1120_v58 = vmul.f32 %v2451_v1, %v1119_v57 }
 0x27f   : > { %v2927_v59 = vadd.f32 %v2449_v54, %v1120_v58  ;;  %1129 = sbr.rel (%p2028_p4) target bundleno = 645 (0x285), region = 60 }
 0x281   : > { %v1122_v60 = vpack.c.bf16 %v2927_v59, %v2927_v59 }
 0x283   : > { %2027 = vst [vmem:[%s2667_s23 + $0x4] sm:$0xf] %v1122_v60 }
 0x284   : > { %1130 = vst [vmem:[%s3243_s7] sm:$0xff] %v2927_v59 }
 0x285 PF: > { %1135 = vmatprep.subr.bf16.mxu0 %v2741_v25  ;;  %2204 = vmatprep.subr.bf16.mxu1 %v2570_v36  ;;  %s1240_s11 = sadd.s32 2, %s2655_s15  ;;  %v1132_v4 = vld [vmem:[#allocation3 + $0x40] sm:$0xff]  ;;  %v1133_v11 = vld [vmem:[#allocation3 + $0x78] sm:$0xff]  ;;  %v1134_v19 = vld [vmem:[#allocation3 + $0x88] sm:$0xff] }
 0x286   : > { %1136 = vmatpush1.bf16.msra.mxu0 %v2746_v27  ;;  %2205 = vmatpush3.bf16.msra.mxu1 %v2768_v35  ;;  %p2032_p5 = scmp.ne.s32.totalorder %s1240_s11, 11 }
 0x287   : > { %1137 = vmatprep.subr.bf16.mxu0 %v2749_v28  ;;  %2206 = vmatprep.subr.bf16.mxu1 %v2570_v36 }
 0x288   : > { %1167 = vmatprep.mubr.bf16.mxu0 %v2569_v3  ;;  %2220 = vmatprep.mubr.msk.bf16.mxu1 %vm2571_vm0, %v2570_v36 }
 0x28a   : > { %1138 = vmatpush1.bf16.msra.mxu0 %v2755_v30  ;;  %2207 = vmatpush3.bf16.msra.mxu1 %v2780_v40 }
 0x28b   : > { %1139 = vmatprep.subr.bf16.mxu0 %v2759_v31  ;;  %2208 = vmatprep.subr.bf16.mxu1 %v2570_v36 }
 0x28e   : > { %1140 = vmatpush1.bf16.msra.mxu0 %v2763_v33  ;;  %2209 = vmatpush3.bf16.msra.mxu1 %v2790_v43 }
 0x28f   : > { %1141 = vmatprep.subr.bf16.mxu0 %v2766_v34  ;;  %2210 = vmatprep.subr.bf16.mxu1 %v2570_v36 }
 0x292   : > { %1142 = vmatpush1.bf16.msra.mxu0 %v2772_v37  ;;  %2211 = vmatpush3.bf16.msra.mxu1 %v2802_v47 }
 0x293   : > { %1143 = vmatprep.subr.bf16.mxu0 %v2777_v39  ;;  %2212 = vmatprep.subr.bf16.mxu1 %v2570_v36 }
 0x296   : > { %1144 = vmatpush1.bf16.msra.mxu0 %v2784_v41  ;;  %2213 = vmatpush3.bf16.msra.mxu1 %v2814_v50 }
 0x297   : > { %1145 = vmatprep.subr.bf16.mxu0 %v2787_v42  ;;  %2214 = vmatprep.subr.bf16.mxu1 %v2570_v36 }
 0x29a   : > { %1146 = vmatpush1.bf16.msra.mxu0 %v2795_v45  ;;  %2215 = vmatpush3.bf16.msra.mxu1 %v2825_v53 }
 0x29b   : > { %1147 = vmatprep.subr.bf16.mxu0 %v2799_v46  ;;  %2216 = vmatprep.subr.bf16.mxu1 %v2570_v36 }
 0x29e   : > { %1148 = vmatpush1.bf16.msra.mxu0 %v2808_v48  ;;  %2217 = vmatpush3.bf16.msra.mxu1 %v2832_v55 }
 0x29f   : > { %1149 = vmatprep.subr.bf16.mxu0 %v2811_v49  ;;  %2218 = vmatprep.subr.bf16.mxu1 %v2570_v36 }
 0x2a2   : > { %1150 = vmatpush1.bf16.msra.mxu0 %v2818_v51  ;;  %2219 = vmatpush3.bf16.msra.mxu1 %v2836_v56 }
 0x2a5   : > { %1168 = vmatmul.mubr.bf16.vlgmr.msra.gmra.mxu0 %v1122_v60  ;;  %2221 = vmatmul.mubr.bf16.vlgmr.msra.gmra.mxu1 %v1122_v60 }
 0x365   : > { %v1169_v61 = vpop.f32.mrf.mxu0  ;;  %v1210_v0 = vpop.f32.mrf.mxu1 }
 0x366   : > { %v1216_v2 = vadd.f32 %v1169_v61, %v1132_v4  ;;  %v1230_v16 = vadd.f32 %v2874_v63, %v1210_v0 }
 0x367   : > { %v1171_v5 = vpop.f32.mrf.mxu0  ;;  %v2222_v6 = vpop.f32.mrf.mxu1 }
 0x368   : > { %v2029_v7 = vmul.f32 -1.442695, %v1216_v2  ;;  %v1223_v12 = vadd.f32 %v1171_v5, %v1133_v11 }
 0x369   : > { %v1173_v8 = vpop.f32.mrf.mxu0  ;;  %v1213_v52 = vpop.f32.mrf.mxu1 }
 0x36a   : > { %2452 = vpow2.f32 %v2029_v7  ;;  %v2030_v13 = vmul.f32 -1.442695, %v1223_v12 }
 0x36b   : > { %v1174_v20 = vpop.f32.mrf.mxu0  ;;  %v2223_v9 = vpop.f32.mrf.mxu1 }
 0x36c   : > { %2454 = vpow2.f32 %v2030_v13 }
 0x377   : > { %v2453_v14 = vpop.eup %2452 }
 0x378   : > { %v1220_v15 = vadd.f32 1.0, %v2453_v14 }
 0x379   : > { %v2455_v17 = vpop.eup %2454 }
 0x37a   : > { %2456 = vrcp.f32 %v1220_v15  ;;  %v1227_v22 = vadd.f32 1.0, %v2455_v17 }
 0x387   : > { %v2457_v18 = vpop.eup %2456 }
 0x388   : > { %v1231_v21 = vmul.f32 %v2457_v18, %v1230_v16 }
 0x38a   : > { %v1232_v23 = vadd.f32 %v1231_v21, %v1134_v19 }
 0x38c   : > { %2458 = vtanh.f32 %v1232_v23 }
 0x38d   : > { %2460 = vrcp.f32 %v1227_v22 }
 0x399   : > { %v2459_v10 = vpop.eup %2458 }
 0x39a   : > { %v1234_v24 = vsub.f32 %v2927_v59, %v2459_v10  ;;  %v2461_v26 = vpop.eup %2460 }
 0x39c   : > { %v1235_v29 = vmul.f32 %v2461_v26, %v1234_v24 }
 0x39e   : > { %v2976_v32 = vadd.f32 %v2459_v10, %v1235_v29  ;;  %1244 = sbr.rel (%p2032_p5) target bundleno = 932 (0x3a4), region = 64 }
 0x3a0   : > { %v1237_v38 = vpack.c.bf16 %v2976_v32, %v2976_v32 }
 0x3a2   : > { %2031 = vst [vmem:[%s2667_s23 + $0x8] sm:$0xf] %v1237_v38 }
 0x3a3   : > { %1245 = vst [vmem:[%s3243_s7] sm:$0xff] %v2976_v32 }
 0x3a4 PF: > { %1250 = vmatprep.subr.bf16.mxu0 %v2741_v25  ;;  %2224 = vmatprep.subr.bf16.mxu1 %v2570_v36  ;;  %s1355_s14 = sadd.s32 3, %s2655_s15  ;;  %v1247_v44 = vld [vmem:[#allocation3 + $0x90] sm:$0xff]  ;;  %v1248_v2 = vld [vmem:[#allocation3 + $0x18] sm:$0xff] }
 0x3a5   : > { %1251 = vmatpush1.bf16.msra.mxu0 %v2746_v27  ;;  %2225 = vmatpush3.bf16.msra.mxu1 %v2768_v35  ;;  %v1249_v11 = vld [vmem:[#allocation3 + $0x98] sm:$0xff]  ;;  %p2036_p6 = scmp.ne.s32.totalorder %s1355_s14, 11 }
 0x3a6   : > { %1252 = vmatprep.subr.bf16.mxu0 %v2749_v28  ;;  %2226 = vmatprep.subr.bf16.mxu1 %v2570_v36 }
 0x3a7   : > { %1282 = vmatprep.mubr.bf16.mxu0 %v2569_v3  ;;  %2240 = vmatprep.mubr.msk.bf16.mxu1 %vm2571_vm0, %v2570_v36 }
 0x3a9   : > { %1253 = vmatpush1.bf16.msra.mxu0 %v2755_v30  ;;  %2227 = vmatpush3.bf16.msra.mxu1 %v2780_v40 }
 0x3aa   : > { %1254 = vmatprep.subr.bf16.mxu0 %v2759_v31  ;;  %2228 = vmatprep.subr.bf16.mxu1 %v2570_v36 }
 0x3ad   : > { %1255 = vmatpush1.bf16.msra.mxu0 %v2763_v33  ;;  %2229 = vmatpush3.bf16.msra.mxu1 %v2790_v43 }
 0x3ae   : > { %1256 = vmatprep.subr.bf16.mxu0 %v2766_v34  ;;  %2230 = vmatprep.subr.bf16.mxu1 %v2570_v36 }
 0x3b1   : > { %1257 = vmatpush1.bf16.msra.mxu0 %v2772_v37  ;;  %2231 = vmatpush3.bf16.msra.mxu1 %v2802_v47 }
 0x3b2   : > { %1258 = vmatprep.subr.bf16.mxu0 %v2777_v39  ;;  %2232 = vmatprep.subr.bf16.mxu1 %v2570_v36 }
 0x3b5   : > { %1259 = vmatpush1.bf16.msra.mxu0 %v2784_v41  ;;  %2233 = vmatpush3.bf16.msra.mxu1 %v2814_v50 }
 0x3b6   : > { %1260 = vmatprep.subr.bf16.mxu0 %v2787_v42  ;;  %2234 = vmatprep.subr.bf16.mxu1 %v2570_v36 }
 0x3b9   : > { %1261 = vmatpush1.bf16.msra.mxu0 %v2795_v45  ;;  %2235 = vmatpush3.bf16.msra.mxu1 %v2825_v53 }
 0x3ba   : > { %1262 = vmatprep.subr.bf16.mxu0 %v2799_v46  ;;  %2236 = vmatprep.subr.bf16.mxu1 %v2570_v36 }
 0x3bd   : > { %1263 = vmatpush1.bf16.msra.mxu0 %v2808_v48  ;;  %2237 = vmatpush3.bf16.msra.mxu1 %v2832_v55 }
 0x3be   : > { %1264 = vmatprep.subr.bf16.mxu0 %v2811_v49  ;;  %2238 = vmatprep.subr.bf16.mxu1 %v2570_v36 }
 0x3c1   : > { %1265 = vmatpush1.bf16.msra.mxu0 %v2818_v51  ;;  %2239 = vmatpush3.bf16.msra.mxu1 %v2836_v56 }
 0x3c4   : > { %1283 = vmatmul.mubr.bf16.vlgmr.msra.gmra.mxu0 %v1237_v38  ;;  %2241 = vmatmul.mubr.bf16.vlgmr.msra.gmra.mxu1 %v1237_v38 }
 0x484   : > { %v1284_v62 = vpop.f32.mrf.mxu0  ;;  %v1325_v54 = vpop.f32.mrf.mxu1 }
 0x485   : > { %v1331_v57 = vadd.f32 %v1284_v62, %v1247_v44  ;;  %v1345_v52 = vadd.f32 %v2874_v63, %v1325_v54 }
 0x486   : > { %v1286_v1 = vpop.f32.mrf.mxu0  ;;  %v2242_v58 = vpop.f32.mrf.mxu1 }
 0x487   : > { %v2033_v59 = vmul.f32 -1.442695, %v1331_v57  ;;  %v1338_v5 = vadd.f32 %v1286_v1, %v1248_v2 }
 0x488   : > { %v1288_v60 = vpop.f32.mrf.mxu0  ;;  %v1328_v4 = vpop.f32.mrf.mxu1 }
 0x489   : > { %2462 = vpow2.f32 %v2033_v59  ;;  %v2034_v6 = vmul.f32 -1.442695, %v1338_v5 }
 0x48a   : > { %v1289_v61 = vpop.f32.mrf.mxu0  ;;  %v2243_v0 = vpop.f32.mrf.mxu1 }
 0x48b   : > { %2464 = vpow2.f32 %v2034_v6 }
 0x496   : > { %v2463_v7 = vpop.eup %2462 }
 0x497   : > { %v1335_v8 = vadd.f32 1.0, %v2463_v7 }
 0x498   : > { %v2465_v20 = vpop.eup %2464 }
 0x499   : > { %2466 = vrcp.f32 %v1335_v8  ;;  %v1342_v13 = vadd.f32 1.0, %v2465_v20 }
 0x4a6   : > { %v2467_v9 = vpop.eup %2466 }
 0x4a7   : > { %v1346_v12 = vmul.f32 %v2467_v9, %v1345_v52 }
 0x4a9   : > { %v1347_v14 = vadd.f32 %v1346_v12, %v1249_v11 }
 0x4ab   : > { %2468 = vtanh.f32 %v1347_v14 }
 0x4ac   : > { %2470 = vrcp.f32 %v1342_v13 }
 0x4b8   : > { %v2469_v15 = vpop.eup %2468 }
 0x4b9   : > { %v1349_v16 = vsub.f32 %v2976_v32, %v2469_v15  ;;  %v2471_v17 = vpop.eup %2470 }
 0x4bb   : > { %v1350_v18 = vmul.f32 %v2471_v17, %v1349_v16 }
 0x4bd   : > { %v3025_v19 = vadd.f32 %v2469_v15, %v1350_v18  ;;  %1359 = sbr.rel (%p2036_p6) target bundleno = 1219 (0x4c3), region = 68 }
 0x4bf   : > { %v1352_v21 = vpack.c.bf16 %v3025_v19, %v3025_v19 }
 0x4c1   : > { %2035 = vst [vmem:[%s2667_s23 + $0xc] sm:$0xf] %v1352_v21 }
 0x4c2   : > { %1360 = vst [vmem:[%s3243_s7] sm:$0xff] %v3025_v19 }
 0x4c3 PF: > { %1365 = vmatprep.subr.bf16.mxu0 %v2741_v25  ;;  %2244 = vmatprep.subr.bf16.mxu1 %v2570_v36  ;;  %s1470_s18 = sadd.s32 4, %s2655_s15  ;;  %v1362_v22 = vld [vmem:[#allocation3 + $0x38] sm:$0xff]  ;;  %v1363_v57 = vld [vmem:[#allocation3 + $0x50] sm:$0xff] }
 0x4c4   : > { %1366 = vmatpush1.bf16.msra.mxu0 %v2746_v27  ;;  %2245 = vmatpush3.bf16.msra.mxu1 %v2768_v35  ;;  %v1364_v2 = vld [vmem:[#allocation3 + $0x70] sm:$0xff]  ;;  %p2040_p7 = scmp.ne.s32.totalorder %s1470_s18, 11 }
 0x4c5   : > { %1367 = vmatprep.subr.bf16.mxu0 %v2749_v28  ;;  %2246 = vmatprep.subr.bf16.mxu1 %v2570_v36 }
 0x4c6   : > { %1397 = vmatprep.mubr.bf16.mxu0 %v2569_v3  ;;  %2260 = vmatprep.mubr.msk.bf16.mxu1 %vm2571_vm0, %v2570_v36 }
 0x4c8   : > { %1368 = vmatpush1.bf16.msra.mxu0 %v2755_v30  ;;  %2247 = vmatpush3.bf16.msra.mxu1 %v2780_v40 }
 0x4c9   : > { %1369 = vmatprep.subr.bf16.mxu0 %v2759_v31  ;;  %2248 = vmatprep.subr.bf16.mxu1 %v2570_v36 }
 0x4cc   : > { %1370 = vmatpush1.bf16.msra.mxu0 %v2763_v33  ;;  %2249 = vmatpush3.bf16.msra.mxu1 %v2790_v43 }
 0x4cd   : > { %1371 = vmatprep.subr.bf16.mxu0 %v2766_v34  ;;  %2250 = vmatprep.subr.bf16.mxu1 %v2570_v36 }
 0x4d0   : > { %1372 = vmatpush1.bf16.msra.mxu0 %v2772_v37  ;;  %2251 = vmatpush3.bf16.msra.mxu1 %v2802_v47 }
 0x4d1   : > { %1373 = vmatprep.subr.bf16.mxu0 %v2777_v39  ;;  %2252 = vmatprep.subr.bf16.mxu1 %v2570_v36 }
 0x4d4   : > { %1374 = vmatpush1.bf16.msra.mxu0 %v2784_v41  ;;  %2253 = vmatpush3.bf16.msra.mxu1 %v2814_v50 }
 0x4d5   : > { %1375 = vmatprep.subr.bf16.mxu0 %v2787_v42  ;;  %2254 = vmatprep.subr.bf16.mxu1 %v2570_v36 }
 0x4d8   : > { %1376 = vmatpush1.bf16.msra.mxu0 %v2795_v45  ;;  %2255 = vmatpush3.bf16.msra.mxu1 %v2825_v53 }
 0x4d9   : > { %1377 = vmatprep.subr.bf16.mxu0 %v2799_v46  ;;  %2256 = vmatprep.subr.bf16.mxu1 %v2570_v36 }
 0x4dc   : > { %1378 = vmatpush1.bf16.msra.mxu0 %v2808_v48  ;;  %2257 = vmatpush3.bf16.msra.mxu1 %v2832_v55 }
 0x4dd   : > { %1379 = vmatprep.subr.bf16.mxu0 %v2811_v49  ;;  %2258 = vmatprep.subr.bf16.mxu1 %v2570_v36 }
 0x4e0   : > { %1380 = vmatpush1.bf16.msra.mxu0 %v2818_v51  ;;  %2259 = vmatpush3.bf16.msra.mxu1 %v2836_v56 }
 0x4e3   : > { %1398 = vmatmul.mubr.bf16.vlgmr.msra.gmra.mxu0 %v1352_v21  ;;  %2261 = vmatmul.mubr.bf16.vlgmr.msra.gmra.mxu1 %v1352_v21 }
 0x5a3   : > { %v1399_v23 = vpop.f32.mrf.mxu0  ;;  %v1440_v10 = vpop.f32.mrf.mxu1 }
 0x5a4   : > { %v1446_v24 = vadd.f32 %v1399_v23, %v1362_v22  ;;  %v1460_v4 = vadd.f32 %v2874_v63, %v1440_v10 }
 0x5a5   : > { %v1401_v26 = vpop.f32.mrf.mxu0  ;;  %v2262_v29 = vpop.f32.mrf.mxu1 }
 0x5a6   : > { %v2037_v32 = vmul.f32 -1.442695, %v1446_v24  ;;  %v1453_v1 = vadd.f32 %v1401_v26, %v1363_v57 }
 0x5a7   : > { %v1403_v38 = vpop.f32.mrf.mxu0  ;;  %v1443_v44 = vpop.f32.mrf.mxu1 }
 0x5a8   : > { %2472 = vpow2.f32 %v2037_v32  ;;  %v2038_v58 = vmul.f32 -1.442695, %v1453_v1 }
 0x5a9   : > { %v1404_v62 = vpop.f32.mrf.mxu0  ;;  %v2263_v54 = vpop.f32.mrf.mxu1 }
 0x5aa   : > { %2474 = vpow2.f32 %v2038_v58 }
 0x5b5   : > { %v2473_v59 = vpop.eup %2472 }
 0x5b6   : > { %v1450_v60 = vadd.f32 1.0, %v2473_v59 }
 0x5b7   : > { %v2475_v61 = vpop.eup %2474 }
 0x5b8   : > { %2476 = vrcp.f32 %v1450_v60  ;;  %v1457_v6 = vadd.f32 1.0, %v2475_v61 }
 0x5c5   : > { %v2477_v0 = vpop.eup %2476 }
 0x5c6   : > { %v1461_v5 = vmul.f32 %v2477_v0, %v1460_v4 }
 0x5c8   : > { %v1462_v7 = vadd.f32 %v1461_v5, %v1364_v2 }
 0x5ca   : > { %2478 = vtanh.f32 %v1462_v7 }
 0x5cb   : > { %2480 = vrcp.f32 %v1457_v6 }
 0x5d7   : > { %v2479_v8 = vpop.eup %2478 }
 0x5d8   : > { %v1464_v52 = vsub.f32 %v3025_v19, %v2479_v8  ;;  %v2481_v20 = vpop.eup %2480 }
 0x5da   : > { %v1465_v9 = vmul.f32 %v2481_v20, %v1464_v52 }
 0x5dc   : > { %v3074_v11 = vadd.f32 %v2479_v8, %v1465_v9  ;;  %1474 = sbr.rel (%p2040_p7) target bundleno = 1506 (0x5e2), region = 72 }
 0x5de   : > { %v1467_v12 = vpack.c.bf16 %v3074_v11, %v3074_v11 }
 0x5e0   : > { %2039 = vst [vmem:[%s2667_s23 + $0x10] sm:$0xf] %v1467_v12 }
 0x5e1   : > { %1475 = vst [vmem:[%s3243_s7] sm:$0xff] %v3074_v11 }
 0x5e2 PF: > { %1480 = vmatprep.subr.bf16.mxu0 %v2741_v25  ;;  %2264 = vmatprep.subr.bf16.mxu1 %v2570_v36  ;;  %s1585_s20 = sadd.s32 5, %s2655_s15  ;;  %v1477_v13 = vld [vmem:[#allocation3 + $0xa0] sm:$0xff]  ;;  %v1478_v24 = vld [vmem:[#allocation3 + $0xa8] sm:$0xff] }
 0x5e3   : > { %1481 = vmatpush1.bf16.msra.mxu0 %v2746_v27  ;;  %2265 = vmatpush3.bf16.msra.mxu1 %v2768_v35  ;;  %v1479_v57 = vld [vmem:[#allocation3 + $0x68] sm:$0xff]  ;;  %p2044_p8 = scmp.ne.s32.totalorder %s1585_s20, 11 }
 0x5e4   : > { %1482 = vmatprep.subr.bf16.mxu0 %v2749_v28  ;;  %2266 = vmatprep.subr.bf16.mxu1 %v2570_v36 }
 0x5e5   : > { %1512 = vmatprep.mubr.bf16.mxu0 %v2569_v3  ;;  %2280 = vmatprep.mubr.msk.bf16.mxu1 %vm2571_vm0, %v2570_v36 }
 0x5e7   : > { %1483 = vmatpush1.bf16.msra.mxu0 %v2755_v30  ;;  %2267 = vmatpush3.bf16.msra.mxu1 %v2780_v40 }
 0x5e8   : > { %1484 = vmatprep.subr.bf16.mxu0 %v2759_v31  ;;  %2268 = vmatprep.subr.bf16.mxu1 %v2570_v36 }
 0x5eb   : > { %1485 = vmatpush1.bf16.msra.mxu0 %v2763_v33  ;;  %2269 = vmatpush3.bf16.msra.mxu1 %v2790_v43 }
 0x5ec   : > { %1486 = vmatprep.subr.bf16.mxu0 %v2766_v34  ;;  %2270 = vmatprep.subr.bf16.mxu1 %v2570_v36 }
 0x5ef   : > { %1487 = vmatpush1.bf16.msra.mxu0 %v2772_v37  ;;  %2271 = vmatpush3.bf16.msra.mxu1 %v2802_v47 }
 0x5f0   : > { %1488 = vmatprep.subr.bf16.mxu0 %v2777_v39  ;;  %2272 = vmatprep.subr.bf16.mxu1 %v2570_v36 }
 0x5f3   : > { %1489 = vmatpush1.bf16.msra.mxu0 %v2784_v41  ;;  %2273 = vmatpush3.bf16.msra.mxu1 %v2814_v50 }
 0x5f4   : > { %1490 = vmatprep.subr.bf16.mxu0 %v2787_v42  ;;  %2274 = vmatprep.subr.bf16.mxu1 %v2570_v36 }
 0x5f7   : > { %1491 = vmatpush1.bf16.msra.mxu0 %v2795_v45  ;;  %2275 = vmatpush3.bf16.msra.mxu1 %v2825_v53 }
 0x5f8   : > { %1492 = vmatprep.subr.bf16.mxu0 %v2799_v46  ;;  %2276 = vmatprep.subr.bf16.mxu1 %v2570_v36 }
 0x5fb   : > { %1493 = vmatpush1.bf16.msra.mxu0 %v2808_v48  ;;  %2277 = vmatpush3.bf16.msra.mxu1 %v2832_v55 }
 0x5fc   : > { %1494 = vmatprep.subr.bf16.mxu0 %v2811_v49  ;;  %2278 = vmatprep.subr.bf16.mxu1 %v2570_v36 }
 0x5ff   : > { %1495 = vmatpush1.bf16.msra.mxu0 %v2818_v51  ;;  %2279 = vmatpush3.bf16.msra.mxu1 %v2836_v56 }
 0x602   : > { %1513 = vmatmul.mubr.bf16.vlgmr.msra.gmra.mxu0 %v1467_v12  ;;  %2281 = vmatmul.mubr.bf16.vlgmr.msra.gmra.mxu1 %v1467_v12 }
 0x6c2   : > { %v1514_v14 = vpop.f32.mrf.mxu0  ;;  %v1555_v15 = vpop.f32.mrf.mxu1 }
 0x6c3   : > { %v1561_v16 = vadd.f32 %v1514_v14, %v1477_v13  ;;  %v1575_v44 = vadd.f32 %v2874_v63, %v1555_v15 }
 0x6c4   : > { %v1516_v17 = vpop.f32.mrf.mxu0  ;;  %v2282_v18 = vpop.f32.mrf.mxu1 }
 0x6c5   : > { %v2041_v19 = vmul.f32 -1.442695, %v1561_v16  ;;  %v1568_v26 = vadd.f32 %v1516_v17, %v1478_v24 }
 0x6c6   : > { %v1518_v21 = vpop.f32.mrf.mxu0  ;;  %v1558_v22 = vpop.f32.mrf.mxu1 }
 0x6c7   : > { %2482 = vpow2.f32 %v2041_v19  ;;  %v2042_v29 = vmul.f32 -1.442695, %v1568_v26 }
 0x6c8   : > { %v1519_v23 = vpop.f32.mrf.mxu0  ;;  %v2283_v10 = vpop.f32.mrf.mxu1 }
 0x6c9   : > { %2484 = vpow2.f32 %v2042_v29 }
 0x6d4   : > { %v2483_v32 = vpop.eup %2482 }
 0x6d5   : > { %v1565_v38 = vadd.f32 1.0, %v2483_v32 }
 0x6d6   : > { %v2485_v62 = vpop.eup %2484 }
 0x6d7   : > { %2486 = vrcp.f32 %v1565_v38  ;;  %v1572_v58 = vadd.f32 1.0, %v2485_v62 }
 0x6e4   : > { %v2487_v54 = vpop.eup %2486 }
 0x6e5   : > { %v1576_v1 = vmul.f32 %v2487_v54, %v1575_v44 }
 0x6e7   : > { %v1577_v59 = vadd.f32 %v1576_v1, %v1479_v57 }
 0x6e9   : > { %2488 = vtanh.f32 %v1577_v59 }
 0x6ea   : > { %2490 = vrcp.f32 %v1572_v58 }
 0x6f6   : > { %v2489_v60 = vpop.eup %2488 }
 0x6f7   : > { %v1579_v4 = vsub.f32 %v3074_v11, %v2489_v60  ;;  %v2491_v61 = vpop.eup %2490 }
 0x6f9   : > { %v1580_v0 = vmul.f32 %v2491_v61, %v1579_v4 }
 0x6fb   : > { %v3123_v2 = vadd.f32 %v2489_v60, %v1580_v0  ;;  %1589 = sbr.rel (%p2044_p8) target bundleno = 1793 (0x701), region = 76 }
 0x6fd   : > { %v1582_v5 = vpack.c.bf16 %v3123_v2, %v3123_v2 }
 0x6ff   : > { %2043 = vst [vmem:[%s2667_s23 + $0x14] sm:$0xf] %v1582_v5 }
 0x700   : > { %1590 = vst [vmem:[%s3243_s7] sm:$0xff] %v3123_v2 }
 0x701 PF: > { %1595 = vmatprep.subr.bf16.mxu0 %v2741_v25  ;;  %2284 = vmatprep.subr.bf16.mxu1 %v2570_v36  ;;  %s1700_s29 = sadd.s32 6, %s2655_s15  ;;  %v1592_v6 = vld [vmem:[#allocation3 + $0x30] sm:$0xff]  ;;  %v1593_v16 = vld [vmem:[#allocation3 + $0x58] sm:$0xff]  ;;  %v1594_v24 = vld [vmem:[#allocation3 + $0x80] sm:$0xff] }
 0x702   : > { %1596 = vmatpush1.bf16.msra.mxu0 %v2746_v27  ;;  %2285 = vmatpush3.bf16.msra.mxu1 %v2768_v35  ;;  %p2048_p9 = scmp.ne.s32.totalorder %s1700_s29, 11 }
 0x703   : > { %1597 = vmatprep.subr.bf16.mxu0 %v2749_v28  ;;  %2286 = vmatprep.subr.bf16.mxu1 %v2570_v36 }
 0x704   : > { %1627 = vmatprep.mubr.bf16.mxu0 %v2569_v3  ;;  %2300 = vmatprep.mubr.msk.bf16.mxu1 %vm2571_vm0, %v2570_v36 }
 0x706   : > { %1598 = vmatpush1.bf16.msra.mxu0 %v2755_v30  ;;  %2287 = vmatpush3.bf16.msra.mxu1 %v2780_v40 }
 0x707   : > { %1599 = vmatprep.subr.bf16.mxu0 %v2759_v31  ;;  %2288 = vmatprep.subr.bf16.mxu1 %v2570_v36 }
 0x70a   : > { %1600 = vmatpush1.bf16.msra.mxu0 %v2763_v33  ;;  %2289 = vmatpush3.bf16.msra.mxu1 %v2790_v43 }
 0x70b   : > { %1601 = vmatprep.subr.bf16.mxu0 %v2766_v34  ;;  %2290 = vmatprep.subr.bf16.mxu1 %v2570_v36 }
 0x70e   : > { %1602 = vmatpush1.bf16.msra.mxu0 %v2772_v37  ;;  %2291 = vmatpush3.bf16.msra.mxu1 %v2802_v47 }
 0x70f   : > { %1603 = vmatprep.subr.bf16.mxu0 %v2777_v39  ;;  %2292 = vmatprep.subr.bf16.mxu1 %v2570_v36 }
 0x712   : > { %1604 = vmatpush1.bf16.msra.mxu0 %v2784_v41  ;;  %2293 = vmatpush3.bf16.msra.mxu1 %v2814_v50 }
 0x713   : > { %1605 = vmatprep.subr.bf16.mxu0 %v2787_v42  ;;  %2294 = vmatprep.subr.bf16.mxu1 %v2570_v36 }
 0x716   : > { %1606 = vmatpush1.bf16.msra.mxu0 %v2795_v45  ;;  %2295 = vmatpush3.bf16.msra.mxu1 %v2825_v53 }
 0x717   : > { %1607 = vmatprep.subr.bf16.mxu0 %v2799_v46  ;;  %2296 = vmatprep.subr.bf16.mxu1 %v2570_v36 }
 0x71a   : > { %1608 = vmatpush1.bf16.msra.mxu0 %v2808_v48  ;;  %2297 = vmatpush3.bf16.msra.mxu1 %v2832_v55 }
 0x71b   : > { %1609 = vmatprep.subr.bf16.mxu0 %v2811_v49  ;;  %2298 = vmatprep.subr.bf16.mxu1 %v2570_v36 }
 0x71e   : > { %1610 = vmatpush1.bf16.msra.mxu0 %v2818_v51  ;;  %2299 = vmatpush3.bf16.msra.mxu1 %v2836_v56 }
 0x721   : > { %1628 = vmatmul.mubr.bf16.vlgmr.msra.gmra.mxu0 %v1582_v5  ;;  %2301 = vmatmul.mubr.bf16.vlgmr.msra.gmra.mxu1 %v1582_v5 }
 0x7e1   : > { %v1629_v7 = vpop.f32.mrf.mxu0  ;;  %v1670_v8 = vpop.f32.mrf.mxu1 }
 0x7e2   : > { %v1676_v52 = vadd.f32 %v1629_v7, %v1592_v6  ;;  %v1690_v22 = vadd.f32 %v2874_v63, %v1670_v8 }
 0x7e3   : > { %v1631_v20 = vpop.f32.mrf.mxu0  ;;  %v2302_v9 = vpop.f32.mrf.mxu1 }
 0x7e4   : > { %v2045_v11 = vmul.f32 -1.442695, %v1676_v52  ;;  %v1683_v17 = vadd.f32 %v1631_v20, %v1593_v16 }
 0x7e5   : > { %v1633_v12 = vpop.f32.mrf.mxu0  ;;  %v1673_v13 = vpop.f32.mrf.mxu1 }
 0x7e6   : > { %2492 = vpow2.f32 %v2045_v11  ;;  %v2046_v18 = vmul.f32 -1.442695, %v1683_v17 }
 0x7e7   : > { %v1634_v14 = vpop.f32.mrf.mxu0  ;;  %v2303_v15 = vpop.f32.mrf.mxu1 }
 0x7e8   : > { %2494 = vpow2.f32 %v2046_v18 }
 0x7f3   : > { %v2493_v19 = vpop.eup %2492 }
 0x7f4   : > { %v1680_v21 = vadd.f32 1.0, %v2493_v19 }
 0x7f5   : > { %v2495_v23 = vpop.eup %2494 }
 0x7f6   : > { %2496 = vrcp.f32 %v1680_v21  ;;  %v1687_v29 = vadd.f32 1.0, %v2495_v23 }
 0x803   : > { %v2497_v10 = vpop.eup %2496 }
 0x804   : > { %v1691_v26 = vmul.f32 %v2497_v10, %v1690_v22 }
 0x806   : > { %v1692_v32 = vadd.f32 %v1691_v26, %v1594_v24 }
 0x808   : > { %2498 = vtanh.f32 %v1692_v32 }
 0x809   : > { %2500 = vrcp.f32 %v1687_v29 }
 0x815   : > { %v2499_v38 = vpop.eup %2498 }
 0x816   : > { %v1694_v44 = vsub.f32 %v3123_v2, %v2499_v38  ;;  %v2501_v62 = vpop.eup %2500 }
 0x818   : > { %v1695_v54 = vmul.f32 %v2501_v62, %v1694_v44 }
 0x81a   : > { %v3172_v57 = vadd.f32 %v2499_v38, %v1695_v54  ;;  %1704 = sbr.rel (%p2048_p9) target bundleno = 2080 (0x820), region = 80 }
 0x81c   : > { %v1697_v1 = vpack.c.bf16 %v3172_v57, %v3172_v57 }
 0x81e   : > { %2047 = vst [vmem:[%s2667_s23 + $0x18] sm:$0xf] %v1697_v1 }
 0x81f   : > { %1705 = vst [vmem:[%s3243_s7] sm:$0xff] %v3172_v57 }
 0x820 PF: > { %1710 = vmatprep.subr.bf16.mxu0 %v2741_v25  ;;  %2304 = vmatprep.subr.bf16.mxu1 %v2570_v36  ;;  %s1815_s9 = sadd.s32 7, %s2655_s15 }
 0x821   : > { %1711 = vmatpush1.bf16.msra.mxu0 %v2746_v27  ;;  %2305 = vmatpush3.bf16.msra.mxu1 %v2768_v35  ;;  %p2052_p10 = scmp.ne.s32.totalorder %s1815_s9, 11 }
 0x822   : > { %1712 = vmatprep.subr.bf16.mxu0 %v2749_v28  ;;  %2306 = vmatprep.subr.bf16.mxu1 %v2570_v36 }
 0x823   : > { %1742 = vmatprep.mubr.bf16.mxu0 %v2569_v3  ;;  %2320 = vmatprep.mubr.msk.bf16.mxu1 %vm2571_vm0, %v2570_v36  ;;  %v1707_v3 = vld [vmem:[#allocation3 + $0xb8] sm:$0xff] }
 0x825   : > { %1713 = vmatpush1.bf16.msra.mxu0 %v2755_v30  ;;  %2307 = vmatpush3.bf16.msra.mxu1 %v2780_v40 }
 0x826   : > { %1714 = vmatprep.subr.bf16.mxu0 %v2759_v31  ;;  %2308 = vmatprep.subr.bf16.mxu1 %v2570_v36 }
 0x829   : > { %1715 = vmatpush1.bf16.msra.mxu0 %v2763_v33  ;;  %2309 = vmatpush3.bf16.msra.mxu1 %v2790_v43 }
 0x82a   : > { %1716 = vmatprep.subr.bf16.mxu0 %v2766_v34  ;;  %2310 = vmatprep.subr.bf16.mxu1 %v2570_v36 }
 0x82d   : > { %1717 = vmatpush1.bf16.msra.mxu0 %v2772_v37  ;;  %2311 = vmatpush3.bf16.msra.mxu1 %v2802_v47 }
 0x82e   : > { %1718 = vmatprep.subr.bf16.mxu0 %v2777_v39  ;;  %2312 = vmatprep.subr.bf16.mxu1 %v2570_v36 }
 0x831   : > { %1719 = vmatpush1.bf16.msra.mxu0 %v2784_v41  ;;  %2313 = vmatpush3.bf16.msra.mxu1 %v2814_v50 }
 0x832   : > { %1720 = vmatprep.subr.bf16.mxu0 %v2787_v42  ;;  %2314 = vmatprep.subr.bf16.mxu1 %v2570_v36 }
 0x835   : > { %1721 = vmatpush1.bf16.msra.mxu0 %v2795_v45  ;;  %2315 = vmatpush3.bf16.msra.mxu1 %v2825_v53 }
 0x836   : > { %1722 = vmatprep.subr.bf16.mxu0 %v2799_v46  ;;  %2316 = vmatprep.subr.bf16.mxu1 %v2570_v36 }
 0x839   : > { %1723 = vmatpush1.bf16.msra.mxu0 %v2808_v48  ;;  %2317 = vmatpush3.bf16.msra.mxu1 %v2832_v55  ;;  %v1709_v48 = vld [vmem:[#allocation3 + $0x8] sm:$0xff] }
 0x83a   : > { %1724 = vmatprep.subr.bf16.mxu0 %v2811_v49  ;;  %2318 = vmatprep.subr.bf16.mxu1 %v2570_v36  ;;  %v1708_v36 = vld [vmem:[#allocation3 + $0x20] sm:$0xff] }
 0x83d   : > { %1725 = vmatpush1.bf16.msra.mxu0 %v2818_v51  ;;  %2319 = vmatpush3.bf16.msra.mxu1 %v2836_v56 }
 0x840   : > { %1743 = vmatmul.mubr.bf16.vlgmr.msra.gmra.mxu0 %v1697_v1  ;;  %2321 = vmatmul.mubr.bf16.vlgmr.msra.gmra.mxu1 %v1697_v1 }
 0x900   : > { %v1744_v25 = vpop.f32.mrf.mxu0  ;;  %v1785_v27 = vpop.f32.mrf.mxu1 }
 0x901   : > { %v1791_v28 = vadd.f32 %v1744_v25, %v1707_v3  ;;  %v1805_v45 = vadd.f32 %v2874_v63, %v1785_v27 }
 0x902   : > { %v1746_v30 = vpop.f32.mrf.mxu0  ;;  %v2322_v31 = vpop.f32.mrf.mxu1 }
 0x903   : > { %v2049_v33 = vmul.f32 -1.442695, %v1791_v28  ;;  %v1798_v40 = vadd.f32 %v1746_v30, %v1708_v36 }
 0x904   : > { %v1748_v34 = vpop.f32.mrf.mxu0  ;;  %v1788_v35 = vpop.f32.mrf.mxu1 }
 0x905   : > { %2502 = vpow2.f32 %v2049_v33  ;;  %v2050_v41 = vmul.f32 -1.442695, %v1798_v40 }
 0x906   : > { %v1749_v37 = vpop.f32.mrf.mxu0  ;;  %v2323_v39 = vpop.f32.mrf.mxu1 }
 0x907   : > { %2504 = vpow2.f32 %v2050_v41 }
 0x912   : > { %v2503_v42 = vpop.eup %2502 }
 0x913   : > { %v1795_v43 = vadd.f32 1.0, %v2503_v42 }
 0x914   : > { %v2505_v46 = vpop.eup %2504 }
 0x915   : > { %2506 = vrcp.f32 %v1795_v43  ;;  %v1802_v50 = vadd.f32 1.0, %v2505_v46 }
 0x922   : > { %v2507_v47 = vpop.eup %2506 }
 0x923   : > { %v1806_v49 = vmul.f32 %v2507_v47, %v1805_v45 }
 0x925   : > { %v1807_v51 = vadd.f32 %v1806_v49, %v1709_v48 }
 0x927   : > { %2508 = vtanh.f32 %v1807_v51 }
 0x928   : > { %2510 = vrcp.f32 %v1802_v50 }
 0x934   : > { %v2509_v53 = vpop.eup %2508 }
 0x935   : > { %v1809_v55 = vsub.f32 %v3172_v57, %v2509_v53  ;;  %v2511_v56 = vpop.eup %2510 }
 0x937   : > { %v1810_v58 = vmul.f32 %v2511_v56, %v1809_v55 }
 0x939   : > { %v1811_v59 = vadd.f32 %v2509_v53, %v1810_v58  ;;  %1819 = sbr.rel (%p2052_p10) target bundleno = 2367 (0x93f), region = 84 }
 0x93b   : > { %v1812_v60 = vpack.c.bf16 %v1811_v59, %v1811_v59 }
 0x93d   : > { %2051 = vst [vmem:[%s2667_s23 + $0x1c] sm:$0xf] %v1812_v60 }
 0x93e   : > { %1820 = vst [vmem:[%s3243_s7] sm:$0xff] %v1811_v59 }
 0x93f PF: > { %1821 = vst [vmem:[#allocation2] sm:$0xff] %v1811_v59 }
 0x940 PF: > { %s19_s26 = sadd.s32 1, %s2564_s26   ;;  %s3246_s24 = smov %s2560_s25 }
 0x941   : > { %p16_p11 = scmp.ge.s32.totalorder %s19_s26, 4   ;;  %s3247_s25 = smov %s3249_s28 }
 0x943   :  { %18 = sbr.rel (!%p16_p11) target bundleno = 2 (0x2), region = 144 }
 0x948   :  { %1864 = vsyncpa [#allocation5], 1 }
 0x949   :  { %1866 = vsyncpa [#allocation5 + $0x1], 1 }

</bundles_post_ra>
